<compile_context>
chip_gen: v5e
topology: v5e:2x2
jax: 0.10.0
libtpu: 0.0.40
codegen_flags: <defaults>
</compile_context>

<pallas_src>
import jax
import jax.numpy as jnp
from jax.experimental import pallas as pl
from jax.experimental.pallas import tpu as pltpu

D_IN = 64
D_IN_PAD = 128       # zero-pad contraction of layer 1 -> lane-dense x, full MXU depth
D_H = 256
D_OUT = 784          # logical output width (28*28)
D_OUT_PAD = 896      # 7 * 128 -> lane-dense output stores


def _round_up(a, m):
    return ((a + m - 1) // m) * m


def generator_kernel(x_ref, w1_ref, b1_ref, w2_ref, b2_ref, w3_ref, b3_ref, o_ref):
    # x: (tb, 128) compute-dtype   w1: (128,256)  w2: (256,256)  w3: (256,896)
    # biases: (1, N) f32           o: (tb, 896) f32
    h1 = jnp.dot(x_ref[...], w1_ref[...], preferred_element_type=jnp.float32)
    h1 = jnp.maximum(h1 + b1_ref[...], 0.0)                         # ReLU (f32)
    h2 = jnp.dot(h1.astype(w2_ref.dtype), w2_ref[...],
                 preferred_element_type=jnp.float32)
    h2 = jnp.maximum(h2 + b2_ref[...], 0.0)                         # ReLU (f32)
    h3 = jnp.dot(h2.astype(w3_ref.dtype), w3_ref[...],
                 preferred_element_type=jnp.float32)
    o_ref[...] = jnp.tanh(h3 + b3_ref[...]).astype(o_ref.dtype)     # Tanh (f32)


def init_params(key):
    """Deterministic init mimicking PyTorch Linear default (U[-1/sqrt(fan_in), +])."""
    ks = jax.random.split(key, 6)

    def lin(kw, kb, fan_in, fan_out):
        bound = 1.0 / (fan_in ** 0.5)
        # stored as (in, out) == transpose of PyTorch's (out, in)
        w = jax.random.uniform(kw, (fan_in, fan_out), jnp.float32, -bound, bound)
        b = jax.random.uniform(kb, (1, fan_out), jnp.float32, -bound, bound)
        return w, b

    w1, b1 = lin(ks[0], ks[1], D_IN, D_H)
    w2, b2 = lin(ks[2], ks[3], D_H, D_H)
    w3, b3 = lin(ks[4], ks[5], D_H, D_OUT)
    return (w1, b1, w2, b2, w3, b3)


def prep_params(params, *, compute_dtype=jnp.bfloat16):
    """One-time parameter prep (do NOT call per forward):
       * pad layer-1 contraction 64 -> 128 (zeros),
       * pad layer-3 output 784 -> 896 (zeros; tanh(0)=0 so slicing is exact),
       * cast weights to the MXU compute dtype (bf16 by default, f32 for parity).
       Biases stay f32 (added after f32 accumulation)."""
    w1, b1, w2, b2, w3, b3 = params
    w1p = jnp.pad(w1, ((0, D_IN_PAD - D_IN), (0, 0))).astype(compute_dtype)
    w2p = w2.astype(compute_dtype)
    w3p = jnp.pad(w3, ((0, 0), (0, D_OUT_PAD - D_OUT))).astype(compute_dtype)
    b3p = jnp.pad(b3, ((0, 0), (0, D_OUT_PAD - D_OUT)))
    return (w1p, b1, w2p, b2, w3p, b3p)


def generator_forward(x, prepared, *, tb=None):
    """x: (B, 64) float32, prepared = prep_params(...) -> (B, 784) float32."""
    w1, b1, w2, b2, w3, b3 = prepared
    compute_dtype = w1.dtype
    B = x.shape[0]

    # Adaptive batch tile: don't pad tiny batches up to 512; 256 keeps tiles
    # aligned to the MXU rows of all chips (128 on v5e, 256 on v6e/v7x).
    if tb is None:
        tb = min(512, _round_up(max(B, 1), 256))
    B_pad = _round_up(B, tb)

    # Pad batch rows (independent, discarded) and contraction cols 64->128
    # (zeros, matching the zero-padded rows of w1), cast to MXU dtype.
    x = jnp.pad(x, ((0, B_pad - B), (0, D_IN_PAD - D_IN))).astype(compute_dtype)

    grid = (B_pad // tb,)
    full = lambda shape: pl.BlockSpec(shape, lambda i: (0, 0))  # resident operand
    wbytes = jnp.dtype(compute_dtype).itemsize

    flops = 2 * B_pad * (D_IN_PAD * D_H + D_H * D_H + D_H * D_OUT_PAD)
    transcendentals = B_pad * D_OUT_PAD  # tanh
    bytes_accessed = (
        wbytes * (B_pad * D_IN_PAD + D_IN_PAD * D_H + D_H * D_H + D_H * D_OUT_PAD)
        + 4 * (B_pad * D_OUT_PAD + D_H + D_H + D_OUT_PAD)
    )

    out = pl.pallas_call(
        generator_kernel,
        out_shape=jax.ShapeDtypeStruct((B_pad, D_OUT_PAD), jnp.float32),
        grid_spec=pltpu.PrefetchScalarGridSpec(
            num_scalar_prefetch=0,
            grid=grid,
            in_specs=[
                pl.BlockSpec((tb, D_IN_PAD), lambda i: (i, 0)),  # x tile
                full((D_IN_PAD, D_H)),                           # w1 (resident)
                full((1, D_H)),                                  # b1
                full((D_H, D_H)),                                # w2
                full((1, D_H)),                                  # b2
                full((D_H, D_OUT_PAD)),                          # w3 (padded)
                full((1, D_OUT_PAD)),                            # b3 (padded)
            ],
            out_specs=pl.BlockSpec((tb, D_OUT_PAD), lambda i: (i, 0)),
        ),
        compiler_params=pltpu.CompilerParams(
            dimension_semantics=("parallel",),      # batch tiles shard across TCs (v7x)
            vmem_limit_bytes=32 * 1024 * 1024,      # safe on v5e/v6e/v7x; ~8 MiB needed
        ),
        cost_estimate=pl.CostEstimate(
            flops=flops,
            transcendentals=transcendentals,
            bytes_accessed=bytes_accessed,
        ),
    )(x, w1, b1, w2, b2, w3, b3)

    # TODO(synk): in a fused pipeline, return the padded (B_pad, 896) slab and
    # let the consumer slice, to avoid this extra HBM copy.
    return out[:B, :D_OUT]


def reference_forward(x, params):
    w1, b1, w2, b2, w3, b3 = params
    h = jnp.maximum(x @ w1 + b1, 0.0)
    h = jnp.maximum(h @ w2 + b2, 0.0)
    return jnp.tanh(h @ w3 + b3)


if __name__ == "__main__":
    key = jax.random.PRNGKey(0)
    kx, kx2, kp = jax.random.split(key, 3)
    params = init_params(kp)
    prepared_bf16 = prep_params(params)                               # fast path
    prepared_f32 = prep_params(params, compute_dtype=jnp.float32)     # parity path

    # Small batch (exercises adaptive tile: tb=256, grid=1).
    B_small = 8
    x_small = jax.random.normal(kx, (B_small, D_IN), jnp.float32)
    ref_small = reference_forward(x_small, params)

    out_small = jax.block_until_ready(generator_forward(x_small, prepared_bf16))
    assert out_small.shape == (B_small, D_OUT), out_small.shape
    assert jnp.allclose(out_small, ref_small, atol=5e-2), "mismatch (small, bf16)"

    out_small_f32 = jax.block_until_ready(generator_forward(x_small, prepared_f32))
    assert jnp.allclose(out_small_f32, ref_small, atol=1e-5, rtol=1e-5), \
        "mismatch (small, f32 parity mode)"

    # Larger batch (tb=512, grid=2 -> both TensorCores busy on v7x).
    B_big = 1024
    x_big = jax.random.normal(kx2, (B_big, D_IN), jnp.float32)
    out_big = jax.block_until_ready(generator_forward(x_big, prepared_bf16))
    ref_big = reference_forward(x_big, params)
    assert out_big.shape == (B_big, D_OUT), out_big.shape
    assert jnp.allclose(out_big, ref_big, atol=5e-2), "mismatch (big, bf16)"

    print("KERNEL_OK")
</pallas_src>

<mosaic_0001>
module attributes {stable_mosaic.version = 11 : i64} {
  func.func @generator_kernel(%arg0: i32, %arg1: memref<256x128xbf16, #tpu.memory_space<vmem>>, %arg2: memref<128x256xbf16, #tpu.memory_space<vmem>>, %arg3: memref<1x256xf32, #tpu.memory_space<vmem>>, %arg4: memref<256x256xbf16, #tpu.memory_space<vmem>>, %arg5: memref<1x256xf32, #tpu.memory_space<vmem>>, %arg6: memref<256x896xbf16, #tpu.memory_space<vmem>>, %arg7: memref<1x896xf32, #tpu.memory_space<vmem>>, %arg8: memref<256x896xf32, #tpu.memory_space<vmem>>) attributes {dimension_semantics = [#tpu.dimension_semantics<parallel>], iteration_bounds = array<i64: 1>, scalar_prefetch = 0 : i64, scratch_operands = 0 : i64, tpu.core_type = #tpu.core_type<tc>, window_params = [{transform_indices = @transform_0, window_bounds = array<i64: 256, 128>}, {pipeline_mode = #tpu.pipeline_mode<synchronous>, transform_indices = @transform_1, window_bounds = array<i64: 128, 256>}, {pipeline_mode = #tpu.pipeline_mode<synchronous>, transform_indices = @transform_2, window_bounds = array<i64: 1, 256>}, {pipeline_mode = #tpu.pipeline_mode<synchronous>, transform_indices = @transform_3, window_bounds = array<i64: 256, 256>}, {pipeline_mode = #tpu.pipeline_mode<synchronous>, transform_indices = @transform_4, window_bounds = array<i64: 1, 256>}, {pipeline_mode = #tpu.pipeline_mode<synchronous>, transform_indices = @transform_5, window_bounds = array<i64: 256, 896>}, {pipeline_mode = #tpu.pipeline_mode<synchronous>, transform_indices = @transform_6, window_bounds = array<i64: 1, 896>}, {transform_indices = @transform_7, window_bounds = array<i64: 256, 896>}]} {
    %c0 = arith.constant 0 : index
    %c0_0 = arith.constant 0 : index
    %0 = vector.load %arg1[%c0, %c0_0] : memref<256x128xbf16, #tpu.memory_space<vmem>>, vector<256x128xbf16>
    %c0_1 = arith.constant 0 : index
    %c0_2 = arith.constant 0 : index
    %1 = vector.load %arg2[%c0_1, %c0_2] : memref<128x256xbf16, #tpu.memory_space<vmem>>, vector<128x256xbf16>
    %cst = arith.constant dense<0.000000e+00> : vector<256x256xf32>
    %2 = tpu.matmul %0, %1, %cst {dimension_numbers = #tpu.dot_dimension_numbers<[1], [0], [0], [1], [0, 0, 1, 1], [], []>} : vector<256x128xbf16>, vector<128x256xbf16>, vector<256x256xf32> -> vector<256x256xf32>
    %c0_3 = arith.constant 0 : index
    %c0_4 = arith.constant 0 : index
    %3 = vector.load %arg3[%c0_3, %c0_4] : memref<1x256xf32, #tpu.memory_space<vmem>>, vector<1x256xf32>
    %4 = vector.broadcast %3 : vector<1x256xf32> to vector<256x256xf32>
    %5 = arith.addf %2, %4 : vector<256x256xf32>
    %cst_5 = arith.constant 0.000000e+00 : f32
    %6 = vector.broadcast %cst_5 : f32 to vector<256x256xf32>
    %7 = arith.maximumf %5, %6 : vector<256x256xf32>
    %8 = arith.truncf %7 : vector<256x256xf32> to vector<256x256xbf16>
    %c0_6 = arith.constant 0 : index
    %c0_7 = arith.constant 0 : index
    %9 = vector.load %arg4[%c0_6, %c0_7] : memref<256x256xbf16, #tpu.memory_space<vmem>>, vector<256x256xbf16>
    %cst_8 = arith.constant dense<0.000000e+00> : vector<256x256xf32>
    %10 = tpu.matmul %8, %9, %cst_8 {dimension_numbers = #tpu.dot_dimension_numbers<[1], [0], [0], [1], [0, 0, 1, 1], [], []>} : vector<256x256xbf16>, vector<256x256xbf16>, vector<256x256xf32> -> vector<256x256xf32>
    %c0_9 = arith.constant 0 : index
    %c0_10 = arith.constant 0 : index
    %11 = vector.load %arg5[%c0_9, %c0_10] : memref<1x256xf32, #tpu.memory_space<vmem>>, vector<1x256xf32>
    %12 = vector.broadcast %11 : vector<1x256xf32> to vector<256x256xf32>
    %13 = arith.addf %10, %12 : vector<256x256xf32>
    %cst_11 = arith.constant 0.000000e+00 : f32
    %14 = vector.broadcast %cst_11 : f32 to vector<256x256xf32>
    %15 = arith.maximumf %13, %14 : vector<256x256xf32>
    %16 = arith.truncf %15 : vector<256x256xf32> to vector<256x256xbf16>
    %c0_12 = arith.constant 0 : index
    %c0_13 = arith.constant 0 : index
    %17 = vector.load %arg6[%c0_12, %c0_13] : memref<256x896xbf16, #tpu.memory_space<vmem>>, vector<256x896xbf16>
    %cst_14 = arith.constant dense<0.000000e+00> : vector<256x896xf32>
    %18 = tpu.matmul %16, %17, %cst_14 {dimension_numbers = #tpu.dot_dimension_numbers<[1], [0], [0], [1], [0, 0, 1, 1], [], []>} : vector<256x256xbf16>, vector<256x896xbf16>, vector<256x896xf32> -> vector<256x896xf32>
    %c0_15 = arith.constant 0 : index
    %c0_16 = arith.constant 0 : index
    %19 = vector.load %arg7[%c0_15, %c0_16] : memref<1x896xf32, #tpu.memory_space<vmem>>, vector<1x896xf32>
    %20 = vector.broadcast %19 : vector<1x896xf32> to vector<256x896xf32>
    %21 = arith.addf %18, %20 : vector<256x896xf32>
    %22 = math.tanh %21 : vector<256x896xf32>
    %c0_17 = arith.constant 0 : index
    %c0_18 = arith.constant 0 : index
    %23 = vector.load %arg8[%c0_17, %c0_18] : memref<256x896xf32, #tpu.memory_space<vmem>>, vector<256x896xf32>
    tpu.vector_store %arg8[%c0_17, %c0_18], %22 {strides = array<i32>} : memref<256x896xf32, #tpu.memory_space<vmem>>, vector<256x896xf32>,
    return
  }
  func.func @transform_0(%arg0: i32) -> (i32, i32) {
    %c0_i32 = arith.constant 0 : i32
    %c0_i32_0 = arith.constant 0 : i32
    return %arg0, %c0_i32 : i32, i32
  }
  func.func @transform_1(%arg0: i32) -> (i32, i32) {
    %c0_i32 = arith.constant 0 : i32
    %c0_i32_0 = arith.constant 0 : i32
    %c0_i32_1 = arith.constant 0 : i32
    return %c0_i32, %c0_i32_0 : i32, i32
  }
  func.func @transform_2(%arg0: i32) -> (i32, i32) {
    %c0_i32 = arith.constant 0 : i32
    %c0_i32_0 = arith.constant 0 : i32
    %c0_i32_1 = arith.constant 0 : i32
    return %c0_i32, %c0_i32_0 : i32, i32
  }
  func.func @transform_3(%arg0: i32) -> (i32, i32) {
    %c0_i32 = arith.constant 0 : i32
    %c0_i32_0 = arith.constant 0 : i32
    %c0_i32_1 = arith.constant 0 : i32
    return %c0_i32, %c0_i32_0 : i32, i32
  }
  func.func @transform_4(%arg0: i32) -> (i32, i32) {
    %c0_i32 = arith.constant 0 : i32
    %c0_i32_0 = arith.constant 0 : i32
    %c0_i32_1 = arith.constant 0 : i32
    return %c0_i32, %c0_i32_0 : i32, i32
  }
  func.func @transform_5(%arg0: i32) -> (i32, i32) {
    %c0_i32 = arith.constant 0 : i32
    %c0_i32_0 = arith.constant 0 : i32
    %c0_i32_1 = arith.constant 0 : i32
    return %c0_i32, %c0_i32_0 : i32, i32
  }
  func.func @transform_6(%arg0: i32) -> (i32, i32) {
    %c0_i32 = arith.constant 0 : i32
    %c0_i32_0 = arith.constant 0 : i32
    %c0_i32_1 = arith.constant 0 : i32
    return %c0_i32, %c0_i32_0 : i32, i32
  }
  func.func @transform_7(%arg0: i32) -> (i32, i32) {
    %c0_i32 = arith.constant 0 : i32
    %c0_i32_0 = arith.constant 0 : i32
    return %arg0, %c0_i32 : i32, i32
  }
}

</mosaic_0001>

<bundles_post_ra>
// kernel: tpu_custom_call.1
= control target key start
LH: loop header
LB: loop body
LE: loop exit
PB: predicated region body
PF: predicated region fallthrough
CT: control target
= control target key end

     0   :  { %12 = vsyncpa [#allocation3], 0  ;;  %s6116_s0 = inlined_call_operand.hbm [shape: bf16[256,128], index: 0, kind: input, shape index: {}]   ;;  %s6117_s1 = inlined_call_operand.hbm [shape: bf16[128,256], index: 1, kind: input, shape index: {}]   ;;  %s6118_s2 = inlined_call_operand.hbm [shape: f32[1,256], index: 2, kind: input, shape index: {}]   ;;  %s6119_s3 = inlined_call_operand.hbm [shape: bf16[256,256], index: 3, kind: input, shape index: {}]   ;;  %s6120_s4 = inlined_call_operand.vmem [shape: f32[1,256], index: 4, kind: input, shape index: {}]   ;;  %s6121_s5 = inlined_call_operand.hbm [shape: bf16[256,896], index: 5, kind: input, shape index: {}]   ;;  %s6122_s6 = inlined_call_operand.hbm [shape: f32[1,896], index: 6, kind: input, shape index: {}]   ;;  %s6123_s7 = inlined_call_operand.hbm [shape: f32[256,896], index: 7, kind: output, shape index: {}]  }
   0x1   :  { %13 = vsyncpa [#allocation6], 0 }
   0x2   :  { %14 = vsyncpa [#allocation9], 0 }
   0x3   :  { %15 = vsyncpa [#allocation12], 0  ;;  %s34_s26 = sshll.u32 %s6117_s1, 4  ;;  %s35_s26 = int_to_ptr.hbm [resolvable:$true] %s34_s26 }
   0x4   :  { %16 = vsyncpa [#allocation4], 0  ;;  %s5231_s27 = smov [#allocation5]   ;;  %s58_s8 = sshll.u32 %s6119_s3, 4  ;;  %s59_s8 = int_to_ptr.hbm [resolvable:$true] %s58_s8 }
   0x5   :  { %s36_s28 = sshll.u32 %s5231_s27, 4  ;;  %s5232_s9 = smov 128   ;;  %s37_s28 = int_to_ptr.vmem [resolvable:$true] %s36_s28 }
   0x6   :  { %s5233_s10 = smov 8   ;;  %s5234_s11 = smov [#allocation8]  }
   0x7   :  { %42 = dma.hbm_to_vmem [thread:$0]  %s35_s26, 2048, %s37_s28, [#allocation6], %s5232_s9, %s5232_s9, %s5233_s10  }
   0x8   :  { %s60_s12 = sshll.u32 %s5234_s11, 4  ;;  %s21_s15 = sshll.u32 %s6116_s0, 4  ;;  %s61_s12 = int_to_ptr.vmem [resolvable:$true] %s60_s12  ;;  %s22_s15 = int_to_ptr.hbm [resolvable:$true] %s21_s15 }
   0x9   :  { %66 = dma.hbm_to_vmem [thread:$0]  %s59_s8, 4096, %s61_s12, [#allocation9], %s5232_s9, %s5232_s9, %s5233_s10  }
   0xa   :  { %s5235_s1 = smov [#allocation2]   ;;  %s48_s3 = sshll.u32 %s6118_s2, 4  ;;  %s49_s3 = int_to_ptr.hbm [resolvable:$true] %s48_s3 }
   0xb   :  { %s23_s16 = sshll.u32 %s5235_s1, 4  ;;  %s5236_s19 = smov 64   ;;  %s24_s16 = int_to_ptr.vmem [resolvable:$true] %s23_s16 }
   0xc   :  { %s5237_s20 = smov 4   ;;  %s5238_s21 = smov [#allocation7]  }
   0xd   :  { %29 = dma.hbm_to_vmem [thread:$0]  %s22_s15, 2048, %s24_s16, [#allocation3], %s5236_s19, %s5236_s19, %s5237_s20  }
   0xe   :  { %s50_s22 = sshll.u32 %s5238_s21, 4  ;;  %s73_s0 = sshll.u32 %s6121_s5, 4  ;;  %s51_s22 = int_to_ptr.vmem [resolvable:$true] %s50_s22  ;;  %s74_s0 = int_to_ptr.hbm [resolvable:$true] %s73_s0 }
   0xf   :  { %53 = dma.hbm_to_vmem [thread:$0]  %s49_s3, 32, %s51_s22, [#allocation6]  }
  0x10   :  { %s5239_s25 = smov [#allocation10]   ;;  %s87_s2 = sshll.u32 %s6122_s6, 4  ;;  %s88_s2 = int_to_ptr.hbm [resolvable:$true] %s87_s2 }
  0x11   :  { %s75_s26 = sshll.u32 %s5239_s25, 4  ;;  %s5240_s29 = smov 448   ;;  %s76_s26 = int_to_ptr.vmem [resolvable:$true] %s75_s26 }
  0x12   :  { %s5241_s30 = smov 28   ;;  %s5242_s8 = smov [#allocation11]  }
  0x13   :  { %81 = dma.hbm_to_vmem [thread:$0]  %s74_s0, 14336, %s76_s26, [#allocation9], %s5240_s29, %s5240_s29, %s5241_s30  }
  0x14   :  { %s89_s9 = sshll.u32 %s5242_s8, 4  ;;  %s90_s9 = int_to_ptr.vmem [resolvable:$true] %s89_s9 }
  0x15   :  { %92 = dma.hbm_to_vmem [thread:$0]  %s88_s2, 112, %s90_s9, [#allocation12]  }
  0x16   :  { %5221 = dma.done.wait [#allocation3], 2048  }
  0x17   :  { %5222 = vsyncadd [#allocation3], 4294965248 }
  0x18   :  { %5223 = dma.done.wait [#allocation6], 2080  }
  0x19   :  { %5224 = vsyncadd [#allocation6], 4294965216 }
  0x1a   :  { %5225 = dma.done.wait [#allocation9], 18432  }
  0x1b   :  { %5226 = vsyncadd [#allocation9], 4294948864 }
  0x1c   :  { %5227 = dma.done.wait [#allocation12], 112  }
  0x1d   :  { %5228 = vsyncadd [#allocation12], 4294967184  ;;  %v3829_v0 = vld [vmem:[#allocation5 + $0x70] sm:$0xf]  ;;  %v4442_v1 = vld [vmem:[#allocation5 + $0x74] sm:$0xf0] }
  0x1e   :  { %v4441_v2 = vld [vmem:[#allocation5 + $0x74] sm:$0xf]  ;;  %v3830_v3 = vor.u32 %v4442_v1, %v3829_v0  ;;  %v3831_v4 = vld [vmem:[#allocation5 + $0x78] sm:$0xf0]  ;;  %v3821_v5 = vld [vmem:[#allocation5 + $0x60] sm:$0xf] }
  0x1f   :  { %v4440_v6 = vld [vmem:[#allocation5 + $0x64] sm:$0xf0]  ;;  %v3834_v7 = vor.u32 %v4441_v2, %v3831_v4  ;;  %v4439_v8 = vld [vmem:[#allocation5 + $0x64] sm:$0xf]  ;;  %v3823_v9 = vld [vmem:[#allocation5 + $0x68] sm:$0xf0] }
  0x20   :  { %347 = vmatpush.bf16.msra.mxu0 %v3830_v3  ;;  %v3822_v10 = vor.u32 %v4440_v6, %v3821_v5  ;;  %v3826_v11 = vor.u32 %v4439_v8, %v3823_v9  ;;  %v3813_v12 = vld [vmem:[#allocation5 + $0x50] sm:$0xf]  ;;  %v4438_v13 = vld [vmem:[#allocation5 + $0x54] sm:$0xf0]  ;;  %v4437_v14 = vld [vmem:[#allocation5 + $0x54] sm:$0xf] }
  0x21   :  { %436 = vmatpush.bf16.msra.mxu1 %v3834_v7  ;;  %v3815_v15 = vld [vmem:[#allocation5 + $0x58] sm:$0xf0]  ;;  %v3814_v16 = vor.u32 %v4438_v13, %v3813_v12  ;;  %v3805_v18 = vld [vmem:[#allocation5 + $0x40] sm:$0xf]  ;;  %v4436_v19 = vld [vmem:[#allocation5 + $0x44] sm:$0xf0] }
  0x22   :  { %v3818_v17 = vor.u32 %v4437_v14, %v3815_v15  ;;  %v4435_v20 = vld [vmem:[#allocation5 + $0x44] sm:$0xf]  ;;  %v3807_v21 = vld [vmem:[#allocation5 + $0x48] sm:$0xf0]  ;;  %v3806_v22 = vor.u32 %v4436_v19, %v3805_v18  ;;  %v3797_v24 = vld [vmem:[#allocation5 + $0x30] sm:$0xf] }
  0x23   :  { %v3810_v23 = vor.u32 %v4435_v20, %v3807_v21  ;;  %v4434_v25 = vld [vmem:[#allocation5 + $0x34] sm:$0xf0]  ;;  %v4433_v26 = vld [vmem:[#allocation5 + $0x34] sm:$0xf]  ;;  %v3799_v27 = vld [vmem:[#allocation5 + $0x38] sm:$0xf0] }
  0x24   :  { %348 = vmatpush.bf16.msra.mxu0 %v3822_v10  ;;  %v3798_v28 = vor.u32 %v4434_v25, %v3797_v24  ;;  %v3802_v29 = vor.u32 %v4433_v26, %v3799_v27  ;;  %v3789_v30 = vld [vmem:[#allocation5 + $0x20] sm:$0xf]  ;;  %v4432_v31 = vld [vmem:[#allocation5 + $0x24] sm:$0xf0]  ;;  %v4431_v32 = vld [vmem:[#allocation5 + $0x24] sm:$0xf] }
  0x25   :  { %437 = vmatpush.bf16.msra.mxu1 %v3826_v11  ;;  %v3791_v33 = vld [vmem:[#allocation5 + $0x28] sm:$0xf0]  ;;  %v3790_v34 = vor.u32 %v4432_v31, %v3789_v30  ;;  %v3781_v36 = vld [vmem:[#allocation5 + $0x10] sm:$0xf]  ;;  %v4430_v37 = vld [vmem:[#allocation5 + $0x14] sm:$0xf0] }
  0x26   :  { %v3794_v35 = vor.u32 %v4431_v32, %v3791_v33  ;;  %v4429_v38 = vld [vmem:[#allocation5 + $0x14] sm:$0xf]  ;;  %v3783_v39 = vld [vmem:[#allocation5 + $0x18] sm:$0xf0]  ;;  %v3782_v40 = vor.u32 %v4430_v37, %v3781_v36  ;;  %v3773_v42 = vld [vmem:[#allocation5] sm:$0xf] }
  0x27   :  { %v3786_v41 = vor.u32 %v4429_v38, %v3783_v39  ;;  %v4428_v43 = vld [vmem:[#allocation5 + $0x4] sm:$0xf0]  ;;  %v4427_v44 = vld [vmem:[#allocation5 + $0x4] sm:$0xf]  ;;  %v3775_v45 = vld [vmem:[#allocation5 + $0x8] sm:$0xf0] }
  0x28   :  { %349 = vmatpush.bf16.msra.mxu0 %v3814_v16  ;;  %v4457_v46 = vld [vmem:[#allocation8 + $0x74] sm:$0xf]  ;;  %v3895_v47 = vld [vmem:[#allocation8 + $0x78] sm:$0xf0]  ;;  %v3774_v50 = vor.u32 %v4428_v43, %v3773_v42  ;;  %v3778_v51 = vor.u32 %v4427_v44, %v3775_v45  ;;  %v4455_v55 = vld [vmem:[#allocation8 + $0x64] sm:$0xf] }
  0x29   :  { %438 = vmatpush.bf16.msra.mxu1 %v3818_v17  ;;  %v4473_v48 = vld [vmem:[#allocation8 + $0xf4] sm:$0xf]  ;;  %v3959_v49 = vld [vmem:[#allocation8 + $0xf8] sm:$0xf0]  ;;  %v3898_v52 = vor.u32 %v4457_v46, %v3895_v47  ;;  %v3887_v56 = vld [vmem:[#allocation8 + $0x68] sm:$0xf0] }
  0x2a   :  { %v3962_v53 = vor.u32 %v4473_v48, %v3959_v49  ;;  %v4411_v54 = vld [vmem:[#allocation2] sm:$0xff]  ;;  %v3890_v58 = vor.u32 %v4455_v55, %v3887_v56  ;;  %v3951_v59 = vld [vmem:[#allocation8 + $0xe8] sm:$0xf0]  ;;  %v4453_v63 = vld [vmem:[#allocation8 + $0x54] sm:$0xf]  ;;  %s3691_s13 = sshll.u32 %s6123_s7, 4  ;;  %s3692_s13 = int_to_ptr.hbm [resolvable:$true] %s3691_s13 }
  0x2b   :  { %v4471_v57 = vld [vmem:[#allocation8 + $0xe4] sm:$0xf]  ;;  %v4413_v62 = vld [vmem:[#allocation2 + $0x10] sm:$0xff]  ;;  %v3879_v0 = vld [vmem:[#allocation8 + $0x58] sm:$0xf0]  ;;  %s5244_s14 = smov 896  }
  0x2c   :  { %350 = vmatpush.bf16.msra.mxu0 %v3806_v22  ;;  %v3954_v60 = vor.u32 %v4471_v57, %v3951_v59  ;;  %v4412_v61 = vld [vmem:[#allocation2 + $0x8] sm:$0xff]  ;;  %v4469_v1 = vld [vmem:[#allocation8 + $0xd4] sm:$0xf]  ;;  %v3882_v2 = vor.u32 %v4453_v63, %v3879_v0  ;;  %v3943_v3 = vld [vmem:[#allocation8 + $0xd8] sm:$0xf0]  ;;  %s5245_s15 = smov 56  }
  0x2d   :  { %439 = vmatpush.bf16.msra.mxu1 %v3810_v23  ;;  %v3946_v4 = vor.u32 %v4469_v1, %v3943_v3  ;;  %v4414_v5 = vld [vmem:[#allocation2 + $0x18] sm:$0xff]  ;;  %v4415_v6 = vld [vmem:[#allocation2 + $0x20] sm:$0xff]  ;;  %v3871_v8 = vld [vmem:[#allocation8 + $0x48] sm:$0xf0] }
  0x2e   :  { %v4451_v7 = vld [vmem:[#allocation8 + $0x44] sm:$0xf]  ;;  %v3935_v11 = vld [vmem:[#allocation8 + $0xc8] sm:$0xf0]  ;;  %v3893_v12 = vld [vmem:[#allocation8 + $0x70] sm:$0xf] }
  0x2f   :  { %v4467_v9 = vld [vmem:[#allocation8 + $0xc4] sm:$0xf]  ;;  %v3874_v10 = vor.u32 %v4451_v7, %v3871_v8  ;;  %v4458_v13 = vld [vmem:[#allocation8 + $0x74] sm:$0xf0]  ;;  %v3957_v16 = vld [vmem:[#allocation8 + $0xf0] sm:$0xf] }
  0x30   :  { %351 = vmatpush.bf16.msra.mxu0 %v3798_v28  ;;  %v3938_v14 = vor.u32 %v4467_v9, %v3935_v11  ;;  %v3894_v15 = vor.u32 %v4458_v13, %v3893_v12  ;;  %v4474_v17 = vld [vmem:[#allocation8 + $0xf4] sm:$0xf0]  ;;  %v4416_v19 = vld [vmem:[#allocation2 + $0x28] sm:$0xff]  ;;  %v3885_v20 = vld [vmem:[#allocation8 + $0x60] sm:$0xf] }
  0x31   :  { %440 = vmatpush.bf16.msra.mxu1 %v3802_v29  ;;  %v3958_v18 = vor.u32 %v4474_v17, %v3957_v16  ;;  %v4456_v21 = vld [vmem:[#allocation8 + $0x64] sm:$0xf0]  ;;  %v3949_v22 = vld [vmem:[#allocation8 + $0xe0] sm:$0xf]  ;;  %v3877_v26 = vld [vmem:[#allocation8 + $0x50] sm:$0xf] }
  0x32   :  { %819 = vmatpush.bf16.msra.mxu2 %v3894_v15  ;;  %v3886_v23 = vor.u32 %v4456_v21, %v3885_v20  ;;  %v4472_v24 = vld [vmem:[#allocation8 + $0xe4] sm:$0xf0]  ;;  %v4454_v27 = vld [vmem:[#allocation8 + $0x54] sm:$0xf0]  ;;  %v3941_v28 = vld [vmem:[#allocation8 + $0xd0] sm:$0xf] }
  0x33   :  { %908 = vmatpush.bf16.msra.mxu3 %v3958_v18  ;;  %v3950_v25 = vor.u32 %v4472_v24, %v3949_v22  ;;  %v3878_v29 = vor.u32 %v4454_v27, %v3877_v26  ;;  %v4470_v30 = vld [vmem:[#allocation8 + $0xd4] sm:$0xf0]  ;;  %v3869_v32 = vld [vmem:[#allocation8 + $0x40] sm:$0xf]  ;;  %v4452_v33 = vld [vmem:[#allocation8 + $0x44] sm:$0xf0] }
  0x34   :  { %352 = vmatpush.bf16.msra.mxu0 %v3790_v34  ;;  %v3942_v31 = vor.u32 %v4470_v30, %v3941_v28  ;;  %v3933_v34 = vld [vmem:[#allocation8 + $0xc0] sm:$0xf]  ;;  %v3870_v36 = vor.u32 %v4452_v33, %v3869_v32  ;;  %v3861_v38 = vld [vmem:[#allocation8 + $0x30] sm:$0xf]  ;;  %v4450_v39 = vld [vmem:[#allocation8 + $0x34] sm:$0xf0] }
  0x35   :  { %441 = vmatpush.bf16.msra.mxu1 %v3794_v35  ;;  %v4468_v35 = vld [vmem:[#allocation8 + $0xc4] sm:$0xf0]  ;;  %v3862_v42 = vor.u32 %v4450_v39, %v3861_v38  ;;  %v4466_v43 = vld [vmem:[#allocation8 + $0xb4] sm:$0xf0]  ;;  %v3853_v45 = vld [vmem:[#allocation8 + $0x20] sm:$0xf] }
  0x36   :  { %820 = vmatpush.bf16.msra.mxu2 %v3886_v23  ;;  %v3934_v37 = vor.u32 %v4468_v35, %v3933_v34  ;;  %v4448_v46 = vld [vmem:[#allocation8 + $0x24] sm:$0xf0]  ;;  %v3917_v48 = vld [vmem:[#allocation8 + $0xa0] sm:$0xf]  ;;  %v3927_v55 = vld [vmem:[#allocation8 + $0xb8] sm:$0xf0] }
  0x37   :  { %909 = vmatpush.bf16.msra.mxu3 %v3950_v25  ;;  %v3854_v47 = vor.u32 %v4448_v46, %v3853_v45  ;;  %v4464_v49 = vld [vmem:[#allocation8 + $0xa4] sm:$0xf0]  ;;  %v3845_v57 = vld [vmem:[#allocation8 + $0x10] sm:$0xf]  ;;  %v3837_v63 = vld [vmem:[#allocation8] sm:$0xf] }
  0x38   :  { %353 = vmatpush.bf16.msra.mxu0 %v3782_v40  ;;  %v3925_v40 = vld [vmem:[#allocation8 + $0xb0] sm:$0xf]  ;;  %v4444_v0 = vld [vmem:[#allocation8 + $0x4] sm:$0xf0]  ;;  %v3901_v1 = vld [vmem:[#allocation8 + $0x80] sm:$0xf] }
  0x39   :  { %442 = vmatpush.bf16.msra.mxu1 %v3786_v41  ;;  %v4417_v41 = vld [vmem:[#allocation2 + $0x30] sm:$0xff]  ;;  %v3926_v44 = vor.u32 %v4466_v43, %v3925_v40  ;;  %v4460_v3 = vld [vmem:[#allocation8 + $0x84] sm:$0xf0]  ;;  %v4527_v7 = vld [vmem:[#allocation10 + $0x1a0] sm:$0xf0] }
  0x3a   :  { %821 = vmatpush.bf16.msra.mxu2 %v3878_v29  ;;  %v3909_v59 = vld [vmem:[#allocation8 + $0x90] sm:$0xf]  ;;  %v4385_v9 = vld [vmem:[#allocation10 + $0x348] sm:$0xf]  ;;  %v4419_v12 = vld [vmem:[#allocation2 + $0x40] sm:$0xff] }
  0x3b   :  { %910 = vmatpush.bf16.msra.mxu3 %v3942_v31  ;;  %v165_v13 = vld [vmem:[#allocation7] sm:$0x3]  ;;  %v4447_v18 = vld [vmem:[#allocation8 + $0x24] sm:$0xf]  ;;  %v3919_v22 = vld [vmem:[#allocation8 + $0xa8] sm:$0xf0] }
  0x3c   :  { %354 = vmatpush.bf16.msra.mxu0 %v3774_v50  ;;  %v4449_v50 = vld [vmem:[#allocation8 + $0x34] sm:$0xf]  ;;  %v5304_v16 = vperm.slane %v165_v13, 0  ;;  %v5306_v17 = vperm.slane %v165_v13, 1  ;;  %v4463_v21 = vld [vmem:[#allocation8 + $0xa4] sm:$0xf] }
  0x3d   :  { %443 = vmatpush.bf16.msra.mxu1 %v3778_v51  ;;  %v3863_v51 = vld [vmem:[#allocation8 + $0x38] sm:$0xf0]  ;;  %v3922_v23 = vor.u32 %v4463_v21, %v3919_v22  ;;  %v4133_v38 = vld [vmem:[#allocation10 + $0x150] sm:$0xf]  ;;  %v4520_v39 = vld [vmem:[#allocation10 + $0x168] sm:$0xf0] }
  0x3e   :  { %822 = vmatpush.bf16.msra.mxu2 %v3870_v36  ;;  %v4420_v36 = vld [vmem:[#allocation2 + $0x48] sm:$0xff]  ;;  %v4329_v22 = vld [vmem:[#allocation10 + $0x2d8] sm:$0xf] }
  0x3f   :  { %355 = vmatmul.bf16.vlgmr.msra.gmra.mxu0 %v4411_v54  ;;  %911 = vmatpush.bf16.msra.mxu3 %v3934_v37  ;;  %v4576_v43 = vld [vmem:[#allocation10 + $0x328] sm:$0xf0] }
  0x40   :  { %997 = vmatpush.bf16.msrb.mxu0 %v3898_v52  ;;  %444 = vmatmul.bf16.vlgmr.msra.gmra.mxu1 %v4411_v54  ;;  %v3918_v52 = vor.u32 %v4464_v49, %v3917_v48  ;;  %v3866_v54 = vor.u32 %v4449_v50, %v3863_v51 }
  0x41   :  { %1086 = vmatpush.bf16.msrb.mxu1 %v3962_v53  ;;  %v4465_v53 = vld [vmem:[#allocation8 + $0xb4] sm:$0xf] }
  0x42   :  { %823 = vmatpush.bf16.msra.mxu2 %v3862_v42  ;;  %v3930_v56 = vor.u32 %v4465_v53, %v3927_v55  ;;  %v4357_v42 = vld [vmem:[#allocation10 + $0x310] sm:$0xf] }
  0x43   :  { %912 = vmatpush.bf16.msra.mxu3 %v3926_v44  ;;  %v4358_v44 = vor.u32 %v4576_v43, %v4357_v42  ;;  %v4443_v42 = vld [vmem:[#allocation8 + $0x4] sm:$0xf]  ;;  %v3839_v43 = vld [vmem:[#allocation8 + $0x8] sm:$0xf0] }
  0x44   :  { %998 = vmatpush.bf16.msrb.mxu0 %v3890_v58  ;;  %v4446_v58 = vld [vmem:[#allocation8 + $0x14] sm:$0xf0] }
  0x45   :  { %1087 = vmatpush.bf16.msrb.mxu1 %v3954_v60  ;;  %v3846_v60 = vor.u32 %v4446_v58, %v3845_v57  ;;  %v4421_v57 = vld [vmem:[#allocation2 + $0x50] sm:$0xff] }
  0x46   :  { %824 = vmatpush.bf16.msra.mxu2 %v3854_v47 }
  0x47   :  { %913 = vmatpush.bf16.msra.mxu3 %v3918_v52 }
  0x48   :  { %999 = vmatpush.bf16.msrb.mxu0 %v3882_v2  ;;  %v3838_v2 = vor.u32 %v4444_v0, %v3837_v63  ;;  %v4461_v63 = vld [vmem:[#allocation8 + $0x94] sm:$0xf]  ;;  %v3911_v0 = vld [vmem:[#allocation8 + $0x98] sm:$0xf0] }
  0x49   :  { %1088 = vmatpush.bf16.msrb.mxu1 %v3946_v4  ;;  %v3902_v4 = vor.u32 %v4460_v3, %v3901_v1  ;;  %v3914_v1 = vor.u32 %v4461_v63, %v3911_v0  ;;  %v4077_v0 = vld [vmem:[#allocation10 + $0xe0] sm:$0xf] }
  0x4a   :  { %825 = vmatpush.bf16.msra.mxu2 %v3846_v60  ;;  %v4445_v60 = vld [vmem:[#allocation8 + $0x14] sm:$0xf] }
  0x4c   :  { %1000 = vmatpush.bf16.msrb.mxu0 %v3874_v10  ;;  %v4583_v10 = vld [vmem:[#allocation10 + $0x360] sm:$0xf0] }
  0x4d   :  { %1089 = vmatpush.bf16.msrb.mxu1 %v3938_v14  ;;  %v4386_v11 = vor.u32 %v4583_v10, %v4385_v9 }
  0x4e   :  { %826 = vmatpush.bf16.msra.mxu2 %v3838_v2 }
  0x4f   :  { %360 = vmatmul.bf16.gmra.mxu0 %v4412_v61 }
  0x50   :  { %449 = vmatmul.bf16.gmra.mxu1 %v4412_v61  ;;  %1001 = vmatpush.bf16.msrb.mxu0 %v3866_v54  ;;  %v4462_v61 = vld [vmem:[#allocation8 + $0x94] sm:$0xf0] }
  0x51   :  { %1090 = vmatpush.bf16.msrb.mxu1 %v3930_v56 }
  0x55   :  { %1091 = vmatpush.bf16.msrb.mxu1 %v3922_v23  ;;  %v4569_v23 = vld [vmem:[#allocation10 + $0x2f0] sm:$0xf0] }
  0x59   :  { %1092 = vmatpush.bf16.msrb.mxu1 %v3914_v1  ;;  %v4506_v1 = vld [vmem:[#allocation10 + $0xf8] sm:$0xf0] }
  0x5f   :  { %365 = vmatmul.bf16.gmra.mxu0 %v4413_v62 }
  0x60   :  { %454 = vmatmul.bf16.gmra.mxu1 %v4413_v62  ;;  %v3910_v62 = vor.u32 %v4462_v61, %v3909_v59  ;;  %v3847_v61 = vld [vmem:[#allocation8 + $0x18] sm:$0xf0] }
  0x62   :  { %914 = vmatpush.bf16.msra.mxu3 %v3910_v62  ;;  %v3850_v62 = vor.u32 %v4445_v60, %v3847_v61 }
  0x66   :  { %915 = vmatpush.bf16.msra.mxu3 %v3902_v4 }
  0x6a   :  { %2080 = vmatpush.bf16.msrb.mxu3 %v4386_v11 }
  0x6e   :  { %2081 = vmatpush.bf16.msrb.mxu3 %v4358_v44  ;;  %v3842_v44 = vor.u32 %v4443_v42, %v3839_v43  ;;  %v4426_v42 = vld [vmem:[#allocation2 + $0x78] sm:$0xff] }
  0x6f   :  { %370 = vmatmul.bf16.gmra.mxu0 %v4414_v5 }
  0x70   :  { %459 = vmatmul.bf16.gmra.mxu1 %v4414_v5  ;;  %v4418_v5 = vld [vmem:[#allocation2 + $0x38] sm:$0xff] }
  0x7f   :  { %375 = vmatmul.bf16.gmra.mxu0 %v4415_v6 }
  0x80   :  { %464 = vmatmul.bf16.gmra.mxu1 %v4415_v6  ;;  %v4161_v6 = vld [vmem:[#allocation10 + $0x188] sm:$0xf] }
  0x81   :  { %v4162_v8 = vor.u32 %v4527_v7, %v4161_v6 }
  0x83   :  { %1991 = vmatpush.bf16.msrb.mxu2 %v4162_v8 }
  0x8f   :  { %380 = vmatmul.bf16.gmra.mxu0 %v4416_v19 }
  0x90   :  { %469 = vmatmul.bf16.gmra.mxu1 %v4416_v19  ;;  %v3855_v19 = vld [vmem:[#allocation8 + $0x28] sm:$0xf0] }
  0x91   :  { %v3858_v20 = vor.u32 %v4447_v18, %v3855_v19  ;;  %v4105_v18 = vld [vmem:[#allocation10 + $0x118] sm:$0xf]  ;;  %v4513_v19 = vld [vmem:[#allocation10 + $0x130] sm:$0xf0] }
  0x92   :  { %v4106_v21 = vor.u32 %v4513_v19, %v4105_v18 }
  0x93   :  { %1002 = vmatpush.bf16.msrb.mxu0 %v3858_v20 }
  0x97   :  { %1003 = vmatpush.bf16.msrb.mxu0 %v3850_v62  ;;  %v4424_v62 = vld [vmem:[#allocation2 + $0x68] sm:$0xff] }
  0x9b   :  { %1004 = vmatpush.bf16.msrb.mxu0 %v3842_v44  ;;  %v4049_v44 = vld [vmem:[#allocation10 + $0xa8] sm:$0xf] }
  0x9f   :  { %385 = vmatmul.bf16.gmra.mxu0 %v4417_v41 }
  0xa0   :  { %474 = vmatmul.bf16.gmra.mxu1 %v4417_v41  ;;  %v4134_v41 = vor.u32 %v4520_v39, %v4133_v38  ;;  %v4423_v39 = vld [vmem:[#allocation2 + $0x60] sm:$0xff] }
  0xa2   :  { %1992 = vmatpush.bf16.msrb.mxu2 %v4134_v41 }
  0xa6   :  { %1993 = vmatpush.bf16.msrb.mxu2 %v4106_v21 }
  0xaf   :  { %390 = vmatmul.bf16.gmra.mxu0 %v4418_v5 }
  0xb0   :  { %479 = vmatmul.bf16.gmra.mxu1 %v4418_v5 }
  0xbc   :  { %v356_v14 = vpop.f32.mrf.mxu0 }
  0xbd   :  { %v445_v15 = vpop.f32.mrf.mxu1  ;;  %v357_v24 = vadd.f32 %v356_v14, %v5304_v16  ;;  %v4422_v14 = vld [vmem:[#allocation2 + $0x58] sm:$0xff] }
  0xbe   :  { %v446_v25 = vadd.f32 %v445_v15, %v5306_v17 }
  0xbf   :  { %395 = vmatmul.bf16.gmra.mxu0 %v4419_v12  ;;  %v525_v30 = vmax.f32 %v357_v24, 0.0  ;;  %v4330_v24 = vor.u32 %v4569_v23, %v4329_v22  ;;  %v4425_v23 = vld [vmem:[#allocation2 + $0x70] sm:$0xff] }
  0xc0   :  { %484 = vmatmul.bf16.gmra.mxu1 %v4419_v12  ;;  %v526_v32 = vmax.f32 %v446_v25, 0.0 }
  0xc1   :  { %2082 = vmatpush.bf16.msrb.mxu3 %v4330_v24 }
  0xc4   :  { %v358_v26 = vpop.f32.mrf.mxu0 }
  0xc5   :  { %v359_v27 = vadd.f32 %v358_v26, %v5304_v16  ;;  %v447_v28 = vpop.f32.mrf.mxu1 }
  0xc6   :  { %v448_v29 = vadd.f32 %v447_v28, %v5306_v17 }
  0xc7   :  { %v527_v31 = vmax.f32 %v359_v27, 0.0 }
  0xc8   :  { %v528_v33 = vmax.f32 %v448_v29, 0.0 }
  0xc9   :  { %v5312_v34 = vpack.c.bf16 %v527_v31, %v525_v30 }
  0xca   :  { %v5314_v35 = vpack.c.bf16 %v528_v33, %v526_v32 }
  0xcb   :  { %827 = vmatmul.bf16.vlgmr.msra.gmra.mxu2 %v5312_v34 }
  0xcc   :  { %916 = vmatmul.bf16.vlgmr.msra.gmra.mxu3 %v5314_v35  ;;  %v361_v37 = vpop.f32.mrf.mxu0 }
  0xcd   :  { %v450_v40 = vpop.f32.mrf.mxu1  ;;  %v362_v45 = vadd.f32 %v361_v37, %v5304_v16 }
  0xce   :  { %v451_v46 = vadd.f32 %v450_v40, %v5306_v17 }
  0xcf   :  { %400 = vmatmul.bf16.gmra.mxu0 %v4420_v36  ;;  %v529_v51 = vmax.f32 %v362_v45, 0.0  ;;  %v4459_v45 = vld [vmem:[#allocation8 + $0x84] sm:$0xf] }
  0xd0   :  { %489 = vmatmul.bf16.gmra.mxu1 %v4420_v36  ;;  %v530_v53 = vmax.f32 %v451_v46, 0.0  ;;  %v3903_v46 = vld [vmem:[#allocation8 + $0x88] sm:$0xf0] }
  0xd4   :  { %v363_v47 = vpop.f32.mrf.mxu0 }
  0xd5   :  { %v364_v48 = vadd.f32 %v363_v47, %v5304_v16  ;;  %v452_v49 = vpop.f32.mrf.mxu1  ;;  %v3906_v47 = vor.u32 %v4459_v45, %v3903_v46  ;;  %v4499_v45 = vld [vmem:[#allocation10 + $0xc0] sm:$0xf0] }
  0xd6   :  { %v453_v50 = vadd.f32 %v452_v49, %v5306_v17 }
  0xd7   :  { %v531_v52 = vmax.f32 %v364_v48, 0.0  ;;  %1093 = vmatpush.bf16.msrb.mxu1 %v3906_v47  ;;  %v4050_v47 = vor.u32 %v4499_v45, %v4049_v44 }
  0xd8   :  { %v532_v54 = vmax.f32 %v453_v50, 0.0 }
  0xd9   :  { %v5322_v55 = vpack.c.bf16 %v531_v52, %v529_v51 }
  0xda   :  { %v5324_v56 = vpack.c.bf16 %v532_v54, %v530_v53 }
  0xdb   :  { %832 = vmatmul.bf16.gmra.mxu2 %v5322_v55 }
  0xdc   :  { %921 = vmatmul.bf16.gmra.mxu3 %v5324_v56  ;;  %v366_v58 = vpop.f32.mrf.mxu0 }
  0xdd   :  { %v455_v59 = vpop.f32.mrf.mxu1  ;;  %v367_v2 = vadd.f32 %v366_v58, %v5304_v16 }
  0xde   :  { %v456_v3 = vadd.f32 %v455_v59, %v5306_v17 }
  0xdf   :  { %405 = vmatmul.bf16.gmra.mxu0 %v4421_v57  ;;  %v533_v8 = vmax.f32 %v367_v2, 0.0 }
  0xe0   :  { %494 = vmatmul.bf16.gmra.mxu1 %v4421_v57  ;;  %v534_v10 = vmax.f32 %v456_v3, 0.0  ;;  %v4078_v3 = vor.u32 %v4506_v1, %v4077_v0 }
  0xe2   :  { %1994 = vmatpush.bf16.msrb.mxu2 %v4078_v3 }
  0xe4   :  { %v368_v4 = vpop.f32.mrf.mxu0 }
  0xe5   :  { %v369_v5 = vadd.f32 %v368_v4, %v5304_v16  ;;  %v457_v6 = vpop.f32.mrf.mxu1  ;;  %v4301_v4 = vld [vmem:[#allocation10 + $0x2a0] sm:$0xf] }
  0xe6   :  { %v458_v7 = vadd.f32 %v457_v6, %v5306_v17  ;;  %1995 = vmatpush.bf16.msrb.mxu2 %v4050_v47 }
  0xe7   :  { %v535_v9 = vmax.f32 %v369_v5, 0.0  ;;  %v4562_v5 = vld [vmem:[#allocation10 + $0x2b8] sm:$0xf0] }
  0xe8   :  { %v536_v11 = vmax.f32 %v458_v7, 0.0  ;;  %v4302_v6 = vor.u32 %v4562_v5, %v4301_v4 }
  0xe9   :  { %v5332_v12 = vpack.c.bf16 %v535_v9, %v533_v8 }
  0xea   :  { %v5334_v13 = vpack.c.bf16 %v536_v11, %v534_v10  ;;  %2083 = vmatpush.bf16.msrb.mxu3 %v4302_v6 }
  0xeb   :  { %837 = vmatmul.bf16.gmra.mxu2 %v5332_v12 }
  0xec   :  { %926 = vmatmul.bf16.gmra.mxu3 %v5334_v13  ;;  %v371_v15 = vpop.f32.mrf.mxu0 }
  0xed   :  { %v460_v20 = vpop.f32.mrf.mxu1  ;;  %v372_v25 = vadd.f32 %v371_v15, %v5304_v16 }
  0xee   :  { %v461_v26 = vadd.f32 %v460_v20, %v5306_v17 }
  0xef   :  { %410 = vmatmul.bf16.gmra.mxu0 %v4422_v14  ;;  %v537_v31 = vmax.f32 %v372_v25, 0.0 }
  0xf0   :  { %499 = vmatmul.bf16.gmra.mxu1 %v4422_v14  ;;  %v538_v33 = vmax.f32 %v461_v26, 0.0 }
  0xf4   :  { %v373_v27 = vpop.f32.mrf.mxu0 }
  0xf5   :  { %v374_v28 = vadd.f32 %v373_v27, %v5304_v16  ;;  %v462_v29 = vpop.f32.mrf.mxu1 }
  0xf6   :  { %v463_v30 = vadd.f32 %v462_v29, %v5306_v17 }
  0xf7   :  { %v539_v32 = vmax.f32 %v374_v28, 0.0 }
  0xf8   :  { %v540_v36 = vmax.f32 %v463_v30, 0.0 }
  0xf9   :  { %v5342_v37 = vpack.c.bf16 %v539_v32, %v537_v31 }
  0xfa   :  { %v5344_v38 = vpack.c.bf16 %v540_v36, %v538_v33 }
  0xfb   :  { %842 = vmatmul.bf16.gmra.mxu2 %v5342_v37 }
  0xfc   :  { %931 = vmatmul.bf16.gmra.mxu3 %v5344_v38  ;;  %v376_v40 = vpop.f32.mrf.mxu0 }
  0xfd   :  { %v465_v41 = vpop.f32.mrf.mxu1  ;;  %v377_v48 = vadd.f32 %v376_v40, %v5304_v16 }
  0xfe   :  { %v466_v49 = vadd.f32 %v465_v41, %v5306_v17 }
  0xff   :  { %415 = vmatmul.bf16.gmra.mxu0 %v4423_v39  ;;  %v541_v54 = vmax.f32 %v377_v48, 0.0  ;;  %v4273_v48 = vld [vmem:[#allocation10 + $0x268] sm:$0xf] }
 0x100   :  { %504 = vmatmul.bf16.gmra.mxu1 %v4423_v39  ;;  %v542_v58 = vmax.f32 %v466_v49, 0.0  ;;  %v4555_v49 = vld [vmem:[#allocation10 + $0x280] sm:$0xf0] }
 0x104   :  { %v378_v50 = vpop.f32.mrf.mxu0 }
 0x105   :  { %v379_v51 = vadd.f32 %v378_v50, %v5304_v16  ;;  %v467_v52 = vpop.f32.mrf.mxu1  ;;  %v4274_v50 = vor.u32 %v4555_v49, %v4273_v48 }
 0x106   :  { %v468_v53 = vadd.f32 %v467_v52, %v5306_v17 }
 0x107   :  { %v543_v57 = vmax.f32 %v379_v51, 0.0  ;;  %2084 = vmatpush.bf16.msrb.mxu3 %v4274_v50 }
 0x108   :  { %v544_v59 = vmax.f32 %v468_v53, 0.0 }
 0x109   :  { %v5352_v60 = vpack.c.bf16 %v543_v57, %v541_v54 }
 0x10a   :  { %v5354_v61 = vpack.c.bf16 %v544_v59, %v542_v58 }
 0x10b   :  { %847 = vmatmul.bf16.gmra.mxu2 %v5352_v60 }
 0x10c   :  { %936 = vmatmul.bf16.gmra.mxu3 %v5354_v61  ;;  %v381_v63 = vpop.f32.mrf.mxu0 }
 0x10d   :  { %v470_v2 = vpop.f32.mrf.mxu1  ;;  %v382_v7 = vadd.f32 %v381_v63, %v5304_v16 }
 0x10e   :  { %v471_v8 = vadd.f32 %v470_v2, %v5306_v17 }
 0x10f   :  { %420 = vmatmul.bf16.gmra.mxu0 %v4424_v62  ;;  %v545_v15 = vmax.f32 %v382_v7, 0.0 }
 0x110   :  { %509 = vmatmul.bf16.gmra.mxu1 %v4424_v62  ;;  %v546_v19 = vmax.f32 %v471_v8, 0.0 }
 0x114   :  { %v383_v9 = vpop.f32.mrf.mxu0 }
 0x115   :  { %v384_v10 = vadd.f32 %v383_v9, %v5304_v16  ;;  %v472_v11 = vpop.f32.mrf.mxu1 }
 0x116   :  { %v473_v14 = vadd.f32 %v472_v11, %v5306_v17 }
 0x117   :  { %v547_v18 = vmax.f32 %v384_v10, 0.0 }
 0x118   :  { %v548_v20 = vmax.f32 %v473_v14, 0.0 }
 0x119   :  { %v5362_v21 = vpack.c.bf16 %v547_v18, %v545_v15 }
 0x11a   :  { %v5364_v22 = vpack.c.bf16 %v548_v20, %v546_v19 }
 0x11b   :  { %852 = vmatmul.bf16.gmra.mxu2 %v5362_v21 }
 0x11c   :  { %941 = vmatmul.bf16.gmra.mxu3 %v5364_v22  ;;  %v386_v24 = vpop.f32.mrf.mxu0 }
 0x11d   :  { %v475_v25 = vpop.f32.mrf.mxu1  ;;  %v387_v26 = vadd.f32 %v386_v24, %v5304_v16 }
 0x11e   :  { %v476_v27 = vadd.f32 %v475_v25, %v5306_v17  ;;  %v4021_v25 = vld [vmem:[#allocation10 + $0x70] sm:$0xf] }
 0x11f   :  { %425 = vmatmul.bf16.gmra.mxu0 %v4425_v23  ;;  %v549_v32 = vmax.f32 %v387_v26, 0.0  ;;  %v4492_v26 = vld [vmem:[#allocation10 + $0x88] sm:$0xf0] }
 0x120   :  { %514 = vmatmul.bf16.gmra.mxu1 %v4425_v23  ;;  %v550_v36 = vmax.f32 %v476_v27, 0.0 }
 0x124   :  { %v388_v28 = vpop.f32.mrf.mxu0 }
 0x125   :  { %v389_v29 = vadd.f32 %v388_v28, %v5304_v16  ;;  %v477_v30 = vpop.f32.mrf.mxu1  ;;  %v4022_v28 = vor.u32 %v4492_v26, %v4021_v25 }
 0x126   :  { %v478_v31 = vadd.f32 %v477_v30, %v5306_v17 }
 0x127   :  { %v551_v33 = vmax.f32 %v389_v29, 0.0  ;;  %1996 = vmatpush.bf16.msrb.mxu2 %v4022_v28 }
 0x128   :  { %v552_v39 = vmax.f32 %v478_v31, 0.0  ;;  %v4245_v31 = vld [vmem:[#allocation10 + $0x230] sm:$0xf] }
 0x129   :  { %v5372_v40 = vpack.c.bf16 %v551_v33, %v549_v32  ;;  %v4548_v32 = vld [vmem:[#allocation10 + $0x248] sm:$0xf0] }
 0x12a   :  { %v5374_v41 = vpack.c.bf16 %v552_v39, %v550_v36  ;;  %v4246_v36 = vor.u32 %v4548_v32, %v4245_v31 }
 0x12b   :  { %857 = vmatmul.bf16.gmra.mxu2 %v5372_v40 }
 0x12c   :  { %946 = vmatmul.bf16.gmra.mxu3 %v5374_v41  ;;  %v391_v43 = vpop.f32.mrf.mxu0 }
 0x12d   :  { %v480_v46 = vpop.f32.mrf.mxu1  ;;  %v392_v51 = vadd.f32 %v391_v43, %v5304_v16  ;;  %2085 = vmatpush.bf16.msrb.mxu3 %v4246_v36  ;;  %v4485_v36 = vld [vmem:[#allocation10 + $0x50] sm:$0xf0] }
 0x12e   :  { %v481_v52 = vadd.f32 %v480_v46, %v5306_v17 }
 0x12f   :  { %430 = vmatmul.bf16.gmra.mxu0 %v4426_v42  ;;  %v553_v59 = vmax.f32 %v392_v51, 0.0 }
 0x130   :  { %519 = vmatmul.bf16.gmra.mxu1 %v4426_v42  ;;  %v554_v63 = vmax.f32 %v481_v52, 0.0 }
 0x134   :  { %v393_v53 = vpop.f32.mrf.mxu0 }
 0x135   :  { %v394_v54 = vadd.f32 %v393_v53, %v5304_v16  ;;  %v482_v57 = vpop.f32.mrf.mxu1 }
 0x136   :  { %v483_v58 = vadd.f32 %v482_v57, %v5306_v17 }
 0x137   :  { %v555_v62 = vmax.f32 %v394_v54, 0.0 }
 0x138   :  { %v556_v0 = vmax.f32 %v483_v58, 0.0 }
 0x139   :  { %v5382_v1 = vpack.c.bf16 %v555_v62, %v553_v59 }
 0x13a   :  { %v5384_v2 = vpack.c.bf16 %v556_v0, %v554_v63 }
 0x13b   :  { %862 = vmatmul.bf16.gmra.mxu2 %v5382_v1 }
 0x13c   :  { %951 = vmatmul.bf16.gmra.mxu3 %v5384_v2  ;;  %v396_v3 = vpop.f32.mrf.mxu0 }
 0x13d   :  { %v485_v4 = vpop.f32.mrf.mxu1  ;;  %v397_v5 = vadd.f32 %v396_v3, %v5304_v16 }
 0x13e   :  { %v486_v6 = vadd.f32 %v485_v4, %v5306_v17 }
 0x13f   :  { %1005 = vmatmul.bf16.vlgmr.msrb.gmra.mxu0 %v5312_v34  ;;  %v557_v11 = vmax.f32 %v397_v5, 0.0  ;;  %v5397_v34 = vld [vmem:[%s6120_s4] sm:$0x3]  ;;  %s5243_s4 = smov [#allocation13]  }
 0x140   :  { %1094 = vmatmul.bf16.vlgmr.msrb.gmra.mxu1 %v5314_v35  ;;  %v558_v15 = vmax.f32 %v486_v6, 0.0  ;;  %v5405_v20 = vperm.slane %v5397_v34, 0  ;;  %s3689_s10 = sshll.u32 %s5243_s4, 4  ;;  %s3690_s10 = int_to_ptr.vmem [resolvable:$true] %s3689_s10 }
 0x144   :  { %v398_v7 = vpop.f32.mrf.mxu0 }
 0x145   :  { %v399_v8 = vadd.f32 %v398_v7, %v5304_v16  ;;  %v487_v9 = vpop.f32.mrf.mxu1 }
 0x146   :  { %v488_v10 = vadd.f32 %v487_v9, %v5306_v17 }
 0x147   :  { %v559_v14 = vmax.f32 %v399_v8, 0.0 }
 0x148   :  { %v560_v18 = vmax.f32 %v488_v10, 0.0 }
 0x149   :  { %v5399_v35 = vpack.c.bf16 %v559_v14, %v557_v11 }
 0x14a   :  { %v5401_v19 = vpack.c.bf16 %v560_v18, %v558_v15 }
 0x14b   :  { %867 = vmatmul.bf16.gmra.mxu2 %v5399_v35 }
 0x14c   :  { %956 = vmatmul.bf16.gmra.mxu3 %v5401_v19  ;;  %v401_v23 = vpop.f32.mrf.mxu0 }
 0x14d   :  { %v490_v24 = vpop.f32.mrf.mxu1  ;;  %v402_v39 = vadd.f32 %v401_v23, %v5304_v16 }
 0x14e   :  { %v828_v27 = vpop.f32.mrf.mxu2  ;;  %v491_v42 = vadd.f32 %v490_v24, %v5306_v17 }
 0x14f   :  { %v829_v29 = vadd.f32 %v828_v27, %v5405_v20  ;;  %v917_v30 = vpop.f32.mrf.mxu3  ;;  %1010 = vmatmul.bf16.gmra.mxu0 %v5322_v55  ;;  %v561_v55 = vmax.f32 %v402_v39, 0.0 }
 0x150   :  { %1099 = vmatmul.bf16.gmra.mxu1 %v5324_v56  ;;  %v562_v50 = vmax.f32 %v491_v42, 0.0 }
 0x151   :  { %v918_v33 = vadd.f32 %v917_v30, %v829_v29 }
 0x153   :  { %v1175_v57 = vmax.f32 %v918_v33, 0.0  ;;  %v3993_v33 = vld [vmem:[#allocation10 + $0x38] sm:$0xf] }
 0x154   :  { %v403_v43 = vpop.f32.mrf.mxu0  ;;  %v3994_v42 = vor.u32 %v4485_v36, %v3993_v33 }
 0x155   :  { %v404_v44 = vadd.f32 %v403_v43, %v5304_v16  ;;  %v492_v45 = vpop.f32.mrf.mxu1 }
 0x156   :  { %v493_v46 = vadd.f32 %v492_v45, %v5306_v17  ;;  %v830_v47 = vpop.f32.mrf.mxu2  ;;  %1997 = vmatpush.bf16.msrb.mxu2 %v3994_v42  ;;  %v4217_v45 = vld [vmem:[#allocation10 + $0x1f8] sm:$0xf] }
 0x157   :  { %v563_v48 = vmax.f32 %v404_v44, 0.0  ;;  %v831_v56 = vadd.f32 %v830_v47, %v5405_v20  ;;  %v919_v49 = vpop.f32.mrf.mxu3 }
 0x158   :  { %v564_v51 = vmax.f32 %v493_v46, 0.0  ;;  %v4541_v46 = vld [vmem:[#allocation10 + $0x210] sm:$0xf0] }
 0x159   :  { %v920_v52 = vadd.f32 %v919_v49, %v831_v56  ;;  %v5416_v53 = vpack.c.bf16 %v563_v48, %v561_v55  ;;  %v4218_v55 = vor.u32 %v4541_v46, %v4217_v45 }
 0x15a   :  { %v5418_v54 = vpack.c.bf16 %v564_v51, %v562_v50 }
 0x15b   :  { %v1177_v58 = vmax.f32 %v920_v52, 0.0  ;;  %872 = vmatmul.bf16.gmra.mxu2 %v5416_v53  ;;  %2086 = vmatpush.bf16.msrb.mxu3 %v4218_v55 }
 0x15c   :  { %961 = vmatmul.bf16.gmra.mxu3 %v5418_v54  ;;  %v406_v59 = vpop.f32.mrf.mxu0 }
 0x15d   :  { %v5422_v62 = vpack.c.bf16 %v1177_v58, %v1175_v57  ;;  %v495_v63 = vpop.f32.mrf.mxu1  ;;  %v407_v6 = vadd.f32 %v406_v59, %v5304_v16 }
 0x15e   :  { %v833_v0 = vpop.f32.mrf.mxu2  ;;  %v496_v7 = vadd.f32 %v495_v63, %v5306_v17 }
 0x15f   :  { %v834_v3 = vadd.f32 %v833_v0, %v5405_v20  ;;  %v922_v4 = vpop.f32.mrf.mxu3  ;;  %1015 = vmatmul.bf16.gmra.mxu0 %v5332_v12  ;;  %v565_v15 = vmax.f32 %v407_v6, 0.0 }
 0x160   :  { %1104 = vmatmul.bf16.gmra.mxu1 %v5334_v13  ;;  %v566_v12 = vmax.f32 %v496_v7, 0.0 }
 0x161   :  { %v923_v5 = vadd.f32 %v922_v4, %v834_v3 }
 0x163   :  { %v1179_v28 = vmax.f32 %v923_v5, 0.0 }
 0x164   :  { %v408_v8 = vpop.f32.mrf.mxu0 }
 0x165   :  { %v409_v9 = vadd.f32 %v408_v8, %v5304_v16  ;;  %v497_v10 = vpop.f32.mrf.mxu1 }
 0x166   :  { %v498_v11 = vadd.f32 %v497_v10, %v5306_v17  ;;  %v835_v14 = vpop.f32.mrf.mxu2 }
 0x167   :  { %v567_v18 = vmax.f32 %v409_v9, 0.0  ;;  %v836_v23 = vadd.f32 %v835_v14, %v5405_v20  ;;  %v924_v24 = vpop.f32.mrf.mxu3 }
 0x168   :  { %v568_v25 = vmax.f32 %v498_v11, 0.0 }
 0x169   :  { %v925_v13 = vadd.f32 %v924_v24, %v836_v23  ;;  %v5432_v26 = vpack.c.bf16 %v567_v18, %v565_v15 }
 0x16a   :  { %v5434_v27 = vpack.c.bf16 %v568_v25, %v566_v12 }
 0x16b   :  { %v1181_v29 = vmax.f32 %v925_v13, 0.0  ;;  %877 = vmatmul.bf16.gmra.mxu2 %v5432_v26 }
 0x16c   :  { %966 = vmatmul.bf16.gmra.mxu3 %v5434_v27  ;;  %v411_v30 = vpop.f32.mrf.mxu0 }
 0x16d   :  { %v5438_v31 = vpack.c.bf16 %v1181_v29, %v1179_v28  ;;  %v500_v32 = vpop.f32.mrf.mxu1  ;;  %v412_v48 = vadd.f32 %v411_v30, %v5304_v16 }
 0x16e   :  { %v838_v39 = vpop.f32.mrf.mxu2  ;;  %v501_v56 = vadd.f32 %v500_v32, %v5306_v17 }
 0x16f   :  { %v839_v43 = vadd.f32 %v838_v39, %v5405_v20  ;;  %v927_v44 = vpop.f32.mrf.mxu3  ;;  %1020 = vmatmul.bf16.gmra.mxu0 %v5342_v37  ;;  %v569_v37 = vmax.f32 %v412_v48, 0.0  ;;  %v3965_v48 = vld [vmem:[#allocation10] sm:$0xf] }
 0x170   :  { %1109 = vmatmul.bf16.gmra.mxu1 %v5344_v38  ;;  %v570_v63 = vmax.f32 %v501_v56, 0.0  ;;  %v4478_v56 = vld [vmem:[#allocation10 + $0x18] sm:$0xf0] }
 0x171   :  { %v928_v47 = vadd.f32 %v927_v44, %v839_v43 }
 0x173   :  { %v1183_v6 = vmax.f32 %v928_v47, 0.0 }
 0x174   :  { %v413_v49 = vpop.f32.mrf.mxu0 }
 0x175   :  { %v414_v50 = vadd.f32 %v413_v49, %v5304_v16  ;;  %v502_v51 = vpop.f32.mrf.mxu1 }
 0x176   :  { %v503_v52 = vadd.f32 %v502_v51, %v5306_v17  ;;  %v840_v57 = vpop.f32.mrf.mxu2 }
 0x177   :  { %v571_v58 = vmax.f32 %v414_v50, 0.0  ;;  %v841_v38 = vadd.f32 %v840_v57, %v5405_v20  ;;  %v929_v59 = vpop.f32.mrf.mxu3  ;;  %v3966_v50 = vor.u32 %v4478_v56, %v3965_v48  ;;  %v4189_v57 = vld [vmem:[#allocation10 + $0x1c0] sm:$0xf] }
 0x178   :  { %v572_v0 = vmax.f32 %v503_v52, 0.0 }
 0x179   :  { %v930_v3 = vadd.f32 %v929_v59, %v841_v38  ;;  %v5448_v4 = vpack.c.bf16 %v571_v58, %v569_v37  ;;  %1998 = vmatpush.bf16.msrb.mxu2 %v3966_v50  ;;  %v4534_v37 = vld [vmem:[#allocation10 + $0x1d8] sm:$0xf0] }
 0x17a   :  { %v5450_v5 = vpack.c.bf16 %v572_v0, %v570_v63  ;;  %v4190_v38 = vor.u32 %v4534_v37, %v4189_v57 }
 0x17b   :  { %v1185_v7 = vmax.f32 %v930_v3, 0.0  ;;  %882 = vmatmul.bf16.gmra.mxu2 %v5448_v4 }
 0x17c   :  { %971 = vmatmul.bf16.gmra.mxu3 %v5450_v5  ;;  %v416_v8 = vpop.f32.mrf.mxu0 }
 0x17d   :  { %v5454_v9 = vpack.c.bf16 %v1185_v7, %v1183_v6  ;;  %v505_v10 = vpop.f32.mrf.mxu1  ;;  %v417_v23 = vadd.f32 %v416_v8, %v5304_v16  ;;  %2087 = vmatpush.bf16.msrb.mxu3 %v4190_v38 }
 0x17e   :  { %v843_v11 = vpop.f32.mrf.mxu2  ;;  %v506_v24 = vadd.f32 %v505_v10, %v5306_v17 }
 0x17f   :  { %v844_v14 = vadd.f32 %v843_v11, %v5405_v20  ;;  %v932_v15 = vpop.f32.mrf.mxu3  ;;  %1025 = vmatmul.bf16.gmra.mxu0 %v5352_v60  ;;  %v573_v30 = vmax.f32 %v417_v23, 0.0 }
 0x180   :  { %1114 = vmatmul.bf16.gmra.mxu1 %v5354_v61  ;;  %v574_v60 = vmax.f32 %v506_v24, 0.0 }
 0x181   :  { %v933_v18 = vadd.f32 %v932_v15, %v844_v14 }
 0x183   :  { %v1187_v44 = vmax.f32 %v933_v18, 0.0 }
 0x184   :  { %v418_v12 = vpop.f32.mrf.mxu0 }
 0x185   :  { %v419_v25 = vadd.f32 %v418_v12, %v5304_v16  ;;  %v507_v13 = vpop.f32.mrf.mxu1 }
 0x186   :  { %v508_v28 = vadd.f32 %v507_v13, %v5306_v17  ;;  %v845_v29 = vpop.f32.mrf.mxu2 }
 0x187   :  { %v575_v32 = vmax.f32 %v419_v25, 0.0  ;;  %v846_v33 = vadd.f32 %v845_v29, %v5405_v20  ;;  %v934_v36 = vpop.f32.mrf.mxu3 }
 0x188   :  { %v576_v39 = vmax.f32 %v508_v28, 0.0 }
 0x189   :  { %v935_v61 = vadd.f32 %v934_v36, %v846_v33  ;;  %v5464_v42 = vpack.c.bf16 %v575_v32, %v573_v30 }
 0x18a   :  { %v5466_v43 = vpack.c.bf16 %v576_v39, %v574_v60 }
 0x18b   :  { %v1189_v45 = vmax.f32 %v935_v61, 0.0  ;;  %887 = vmatmul.bf16.gmra.mxu2 %v5464_v42 }
 0x18c   :  { %976 = vmatmul.bf16.gmra.mxu3 %v5466_v43  ;;  %v421_v46 = vpop.f32.mrf.mxu0 }
 0x18d   :  { %v5470_v47 = vpack.c.bf16 %v1189_v45, %v1187_v44  ;;  %v510_v55 = vpop.f32.mrf.mxu1  ;;  %v422_v59 = vadd.f32 %v421_v46, %v5304_v16 }
 0x18e   :  { %v848_v49 = vpop.f32.mrf.mxu2  ;;  %v511_v63 = vadd.f32 %v510_v55, %v5306_v17 }
 0x18f   :  { %v849_v51 = vadd.f32 %v848_v49, %v5405_v20  ;;  %v937_v52 = vpop.f32.mrf.mxu3  ;;  %1030 = vmatmul.bf16.gmra.mxu0 %v5362_v21  ;;  %v577_v21 = vmax.f32 %v422_v59, 0.0 }
 0x190   :  { %1119 = vmatmul.bf16.gmra.mxu1 %v5364_v22  ;;  %v578_v14 = vmax.f32 %v511_v63, 0.0 }
 0x191   :  { %v938_v58 = vadd.f32 %v937_v52, %v849_v51 }
 0x193   :  { %v1191_v12 = vmax.f32 %v938_v58, 0.0 }
 0x194   :  { %v423_v0 = vpop.f32.mrf.mxu0 }
 0x195   :  { %v424_v3 = vadd.f32 %v423_v0, %v5304_v16  ;;  %v512_v6 = vpop.f32.mrf.mxu1  ;;  %v4169_v0 = vld [vmem:[#allocation10 + $0x190] sm:$0xf] }
 0x196   :  { %v513_v7 = vadd.f32 %v512_v6, %v5306_v17  ;;  %v850_v8 = vpop.f32.mrf.mxu2 }
 0x197   :  { %v579_v10 = vmax.f32 %v424_v3, 0.0  ;;  %v851_v22 = vadd.f32 %v850_v8, %v5405_v20  ;;  %v939_v11 = vpop.f32.mrf.mxu3  ;;  %v4528_v3 = vld [vmem:[#allocation10 + $0x1a8] sm:$0xf0] }
 0x198   :  { %v580_v15 = vmax.f32 %v513_v7, 0.0  ;;  %v4170_v7 = vor.u32 %v4528_v3, %v4169_v0 }
 0x199   :  { %v940_v18 = vadd.f32 %v939_v11, %v851_v22  ;;  %v5480_v23 = vpack.c.bf16 %v579_v10, %v577_v21  ;;  %v4393_v22 = vld [vmem:[#allocation10 + $0x350] sm:$0xf]  ;;  %v4584_v11 = vld [vmem:[#allocation10 + $0x368] sm:$0xf0] }
 0x19a   :  { %v5482_v24 = vpack.c.bf16 %v580_v15, %v578_v14  ;;  %2347 = vmatpush.bf16.msra.mxu2 %v4170_v7  ;;  %v4394_v14 = vor.u32 %v4584_v11, %v4393_v22 }
 0x19b   :  { %v1193_v25 = vmax.f32 %v940_v18, 0.0  ;;  %892 = vmatmul.bf16.gmra.mxu2 %v5480_v23  ;;  %v4524_v18 = vld [vmem:[#allocation10 + $0x18c] sm:$0xf] }
 0x19c   :  { %981 = vmatmul.bf16.gmra.mxu3 %v5482_v24  ;;  %v426_v13 = vpop.f32.mrf.mxu0 }
 0x19d   :  { %v5486_v28 = vpack.c.bf16 %v1193_v25, %v1191_v12  ;;  %v515_v29 = vpop.f32.mrf.mxu1  ;;  %v427_v60 = vadd.f32 %v426_v13, %v5304_v16  ;;  %v4163_v12 = vld [vmem:[#allocation10 + $0x1a4] sm:$0xf0]  ;;  %2436 = vmatpush.bf16.msra.mxu3 %v4394_v14 }
 0x19e   :  { %v853_v30 = vpop.f32.mrf.mxu2  ;;  %v516_v39 = vadd.f32 %v515_v29, %v5306_v17  ;;  %v4166_v29 = vor.u32 %v4524_v18, %v4163_v12 }
 0x19f   :  { %v854_v32 = vadd.f32 %v853_v30, %v5405_v20  ;;  %v942_v33 = vpop.f32.mrf.mxu3  ;;  %1035 = vmatmul.bf16.gmra.mxu0 %v5372_v40  ;;  %v581_v48 = vmax.f32 %v427_v60, 0.0  ;;  %v4580_v30 = vld [vmem:[#allocation10 + $0x34c] sm:$0xf] }
 0x1a0   :  { %1124 = vmatmul.bf16.gmra.mxu1 %v5374_v41  ;;  %v582_v40 = vmax.f32 %v516_v39, 0.0  ;;  %2169 = vmatpush.bf16.msra.mxu0 %v4166_v29  ;;  %v4141_v29 = vld [vmem:[#allocation10 + $0x158] sm:$0xf] }
 0x1a1   :  { %v943_v36 = vadd.f32 %v942_v33, %v854_v32  ;;  %v4387_v32 = vld [vmem:[#allocation10 + $0x364] sm:$0xf0] }
 0x1a3   :  { %v1195_v37 = vmax.f32 %v943_v36, 0.0 }
 0x1a4   :  { %v428_v61 = vpop.f32.mrf.mxu0 }
 0x1a5   :  { %v429_v44 = vadd.f32 %v428_v61, %v5304_v16  ;;  %v517_v45 = vpop.f32.mrf.mxu1 }
 0x1a6   :  { %v518_v46 = vadd.f32 %v517_v45, %v5306_v17  ;;  %v855_v55 = vpop.f32.mrf.mxu2 }
 0x1a7   :  { %v583_v56 = vmax.f32 %v429_v44, 0.0  ;;  %v856_v49 = vadd.f32 %v855_v55, %v5405_v20  ;;  %v944_v50 = vpop.f32.mrf.mxu3 }
 0x1a8   :  { %v584_v51 = vmax.f32 %v518_v46, 0.0 }
 0x1a9   :  { %v945_v41 = vadd.f32 %v944_v50, %v856_v49  ;;  %v5496_v52 = vpack.c.bf16 %v583_v56, %v581_v48 }
 0x1aa   :  { %v5498_v57 = vpack.c.bf16 %v584_v51, %v582_v40  ;;  %v5521_v51 = vperm.slane %v5397_v34, 1 }
 0x1ab   :  { %v1197_v58 = vmax.f32 %v945_v41, 0.0  ;;  %897 = vmatmul.bf16.gmra.mxu2 %v5496_v52 }
 0x1ac   :  { %986 = vmatmul.bf16.gmra.mxu3 %v5498_v57  ;;  %v431_v38 = vpop.f32.mrf.mxu0 }
 0x1ad   :  { %v5502_v59 = vpack.c.bf16 %v1197_v58, %v1195_v37  ;;  %v520_v63 = vpop.f32.mrf.mxu1  ;;  %v432_v15 = vadd.f32 %v431_v38, %v5304_v16 }
 0x1ae   :  { %v858_v6 = vpop.f32.mrf.mxu2  ;;  %v521_v25 = vadd.f32 %v520_v63, %v5306_v17 }
 0x1af   :  { %v859_v8 = vadd.f32 %v858_v6, %v5405_v20  ;;  %v947_v21 = vpop.f32.mrf.mxu3  ;;  %1040 = vmatmul.bf16.gmra.mxu0 %v5382_v1  ;;  %v585_v39 = vmax.f32 %v432_v15, 0.0 }
 0x1b0   :  { %1129 = vmatmul.bf16.gmra.mxu1 %v5384_v2  ;;  %v4390_v2 = vor.u32 %v4580_v30, %v4387_v32  ;;  %v586_v46 = vmax.f32 %v521_v25, 0.0  ;;  %v4521_v30 = vld [vmem:[#allocation10 + $0x170] sm:$0xf0] }
 0x1b1   :  { %v948_v10 = vadd.f32 %v947_v21, %v859_v8 }
 0x1b2   :  { %2258 = vmatpush.bf16.msra.mxu1 %v4390_v2 }
 0x1b4   :  { %v433_v13 = vpop.f32.mrf.mxu0 }
 0x1b5   :  { %v434_v1 = vadd.f32 %v433_v13, %v5304_v16  ;;  %v522_v33 = vpop.f32.mrf.mxu1  ;;  %v1199_v16 = vmax.f32 %v948_v10, 0.0 }
 0x1b6   :  { %v523_v36 = vadd.f32 %v522_v33, %v5306_v17  ;;  %v860_v60 = vpop.f32.mrf.mxu2 }
 0x1b7   :  { %v587_v61 = vmax.f32 %v434_v1, 0.0  ;;  %v861_v44 = vadd.f32 %v860_v60, %v5405_v20  ;;  %v949_v45 = vpop.f32.mrf.mxu3  ;;  %v4142_v1 = vor.u32 %v4521_v30, %v4141_v29 }
 0x1b8   :  { %v588_v55 = vmax.f32 %v523_v36, 0.0 }
 0x1b9   :  { %v950_v48 = vadd.f32 %v949_v45, %v861_v44  ;;  %v5512_v56 = vpack.c.bf16 %v587_v61, %v585_v39  ;;  %2348 = vmatpush.bf16.msra.mxu2 %v4142_v1  ;;  %v4365_v39 = vld [vmem:[#allocation10 + $0x318] sm:$0xf]  ;;  %v4577_v61 = vld [vmem:[#allocation10 + $0x330] sm:$0xf0] }
 0x1ba   :  { %v5514_v49 = vpack.c.bf16 %v588_v55, %v586_v46  ;;  %v4366_v44 = vor.u32 %v4577_v61, %v4365_v39  ;;  %v4517_v45 = vld [vmem:[#allocation10 + $0x154] sm:$0xf]  ;;  %v4135_v46 = vld [vmem:[#allocation10 + $0x16c] sm:$0xf0] }
 0x1bb   :  { %v1201_v50 = vmax.f32 %v950_v48, 0.0  ;;  %902 = vmatmul.bf16.gmra.mxu2 %v5512_v56  ;;  %v4138_v48 = vor.u32 %v4517_v45, %v4135_v46 }
 0x1bc   :  { %991 = vmatmul.bf16.gmra.mxu3 %v5514_v49  ;;  %v1006_v17 = vpop.f32.mrf.mxu0 }
 0x1bd   :  { %v5518_v40 = vpack.c.bf16 %v1201_v50, %v1199_v16  ;;  %v1095_v41 = vpop.f32.mrf.mxu1  ;;  %v1007_v63 = vadd.f32 %v1006_v17, %v5521_v51  ;;  %2437 = vmatpush.bf16.msra.mxu3 %v4366_v44  ;;  %v4573_v16 = vld [vmem:[#allocation10 + $0x314] sm:$0xf]  ;;  %v4359_v50 = vld [vmem:[#allocation10 + $0x32c] sm:$0xf0]  ;;  %2170 = vmatpush.bf16.msra.mxu0 %v4138_v48  ;;  %v4514_v48 = vld [vmem:[#allocation10 + $0x138] sm:$0xf0] }
 0x1be   :  { %v863_v37 = vpop.f32.mrf.mxu2 }
 0x1bf   :  { %v864_v58 = vadd.f32 %v863_v37, %v5405_v20  ;;  %v952_v38 = vpop.f32.mrf.mxu3  ;;  %1045 = vmatmul.bf16.gmra.mxu0 %v5399_v35  ;;  %v1096_v6 = vadd.f32 %v1095_v41, %v1007_v63  ;;  %v4362_v37 = vor.u32 %v4573_v16, %v4359_v50 }
 0x1c0   :  { %1134 = vmatmul.bf16.gmra.mxu1 %v5401_v19 }
 0x1c1   :  { %v953_v0 = vadd.f32 %v952_v38, %v864_v58  ;;  %v1176_v11 = vmax.f32 %v1096_v6, 0.0  ;;  %2259 = vmatpush.bf16.msra.mxu1 %v4362_v37 }
 0x1c3   :  { %v1203_v18 = vmax.f32 %v953_v0, 0.0 }
 0x1c4   :  { %v1008_v3 = vpop.f32.mrf.mxu0 }
 0x1c5   :  { %v1009_v7 = vadd.f32 %v1008_v3, %v5521_v51  ;;  %v1097_v8 = vpop.f32.mrf.mxu1 }
 0x1c6   :  { %v865_v21 = vpop.f32.mrf.mxu2 }
 0x1c7   :  { %v1098_v34 = vadd.f32 %v1097_v8, %v1009_v7  ;;  %v866_v10 = vadd.f32 %v865_v21, %v5405_v20  ;;  %v954_v22 = vpop.f32.mrf.mxu3 }
 0x1c9   :  { %v1178_v14 = vmax.f32 %v1098_v34, 0.0  ;;  %v955_v15 = vadd.f32 %v954_v22, %v866_v10 }
 0x1cb   :  { %v5529_v35 = vpack.c.bf16 %v1178_v14, %v1176_v11  ;;  %v1205_v19 = vmax.f32 %v955_v15, 0.0  ;;  %1999 = vmatmul.bf16.vlgmr.msrb.gmra.mxu2 %v5422_v62 }
 0x1cc   :  { %v1011_v12 = vpop.f32.mrf.mxu0 }
 0x1cd   :  { %v5532_v25 = vpack.c.bf16 %v1205_v19, %v1203_v18  ;;  %v1100_v13 = vpop.f32.mrf.mxu1  ;;  %2088 = vmatmul.bf16.vlgmr.msrb.gmra.mxu3 %v5529_v35  ;;  %v1012_v36 = vadd.f32 %v1011_v12, %v5521_v51 }
 0x1ce   :  { %v868_v32 = vpop.f32.mrf.mxu2 }
 0x1cf   :  { %v869_v33 = vadd.f32 %v868_v32, %v5405_v20  ;;  %v957_v2 = vpop.f32.mrf.mxu3  ;;  %1050 = vmatmul.bf16.gmra.mxu0 %v5416_v53  ;;  %v1101_v17 = vadd.f32 %v1100_v13, %v1012_v36 }
 0x1d0   :  { %1139 = vmatmul.bf16.gmra.mxu1 %v5418_v54 }
 0x1d1   :  { %v958_v60 = vadd.f32 %v957_v2, %v869_v33  ;;  %v1180_v0 = vmax.f32 %v1101_v17, 0.0 }
 0x1d3   :  { %v1207_v7 = vmax.f32 %v958_v60, 0.0 }
 0x1d4   :  { %v1013_v55 = vpop.f32.mrf.mxu0 }
 0x1d5   :  { %v1014_v41 = vadd.f32 %v1013_v55, %v5521_v51  ;;  %v1102_v53 = vpop.f32.mrf.mxu1  ;;  %v4113_v55 = vld [vmem:[#allocation10 + $0x120] sm:$0xf] }
 0x1d6   :  { %v870_v54 = vpop.f32.mrf.mxu2  ;;  %v4114_v50 = vor.u32 %v4514_v48, %v4113_v55 }
 0x1d7   :  { %v1103_v58 = vadd.f32 %v1102_v53, %v1014_v41  ;;  %v871_v38 = vadd.f32 %v870_v54, %v5405_v20  ;;  %v959_v63 = vpop.f32.mrf.mxu3  ;;  %v4337_v54 = vld [vmem:[#allocation10 + $0x2e0] sm:$0xf] }
 0x1d8   :  { %2349 = vmatpush.bf16.msra.mxu2 %v4114_v50 }
 0x1d9   :  { %v1182_v3 = vmax.f32 %v1103_v58, 0.0  ;;  %v960_v6 = vadd.f32 %v959_v63, %v871_v38  ;;  %v4570_v58 = vld [vmem:[#allocation10 + $0x2f8] sm:$0xf0] }
 0x1da   :  { %v4338_v38 = vor.u32 %v4570_v58, %v4337_v54  ;;  %v4510_v63 = vld [vmem:[#allocation10 + $0x11c] sm:$0xf]  ;;  %v4503_v58 = vld [vmem:[#allocation10 + $0xe4] sm:$0xf] }
 0x1db   :  { %v5541_v8 = vpack.c.bf16 %v1182_v3, %v1180_v0  ;;  %v1209_v21 = vmax.f32 %v960_v6, 0.0  ;;  %2004 = vmatmul.bf16.gmra.mxu2 %v5438_v31  ;;  %v4107_v0 = vld [vmem:[#allocation10 + $0x134] sm:$0xf0] }
 0x1dc   :  { %v1016_v34 = vpop.f32.mrf.mxu0  ;;  %2438 = vmatpush.bf16.msra.mxu3 %v4338_v38  ;;  %v4110_v6 = vor.u32 %v4510_v63, %v4107_v0  ;;  %v4559_v38 = vld [vmem:[#allocation10 + $0x2a4] sm:$0xf] }
 0x1dd   :  { %v5544_v10 = vpack.c.bf16 %v1209_v21, %v1207_v7  ;;  %v1105_v22 = vpop.f32.mrf.mxu1  ;;  %2093 = vmatmul.bf16.gmra.mxu3 %v5541_v8  ;;  %v1017_v18 = vadd.f32 %v1016_v34, %v5521_v51  ;;  %v4566_v7 = vld [vmem:[#allocation10 + $0x2dc] sm:$0xf]  ;;  %v4331_v21 = vld [vmem:[#allocation10 + $0x2f4] sm:$0xf0] }
 0x1de   :  { %v873_v11 = vpop.f32.mrf.mxu2  ;;  %2171 = vmatpush.bf16.msra.mxu0 %v4110_v6  ;;  %v4303_v6 = vld [vmem:[#allocation10 + $0x2bc] sm:$0xf0] }
 0x1df   :  { %v874_v14 = vadd.f32 %v873_v11, %v5405_v20  ;;  %v962_v15 = vpop.f32.mrf.mxu3  ;;  %1055 = vmatmul.bf16.gmra.mxu0 %v5432_v26  ;;  %v1106_v13 = vadd.f32 %v1105_v22, %v1017_v18  ;;  %v4334_v11 = vor.u32 %v4566_v7, %v4331_v21  ;;  %v4306_v21 = vor.u32 %v4559_v38, %v4303_v6 }
 0x1e0   :  { %1144 = vmatmul.bf16.gmra.mxu1 %v5434_v27 }
 0x1e1   :  { %v963_v19 = vadd.f32 %v962_v15, %v874_v14  ;;  %v1184_v36 = vmax.f32 %v1106_v13, 0.0  ;;  %2260 = vmatpush.bf16.msra.mxu1 %v4334_v11  ;;  %v4507_v11 = vld [vmem:[#allocation10 + $0x100] sm:$0xf0] }
 0x1e3   :  { %v1211_v61 = vmax.f32 %v963_v19, 0.0 }
 0x1e4   :  { %v1018_v12 = vpop.f32.mrf.mxu0 }
 0x1e5   :  { %v1019_v29 = vadd.f32 %v1018_v12, %v5521_v51  ;;  %v1107_v30 = vpop.f32.mrf.mxu1  ;;  %2261 = vmatpush.bf16.msra.mxu1 %v4306_v21 }
 0x1e6   :  { %v875_v32 = vpop.f32.mrf.mxu2 }
 0x1e7   :  { %v1108_v1 = vadd.f32 %v1107_v30, %v1019_v29  ;;  %v876_v33 = vadd.f32 %v875_v32, %v5405_v20  ;;  %v964_v2 = vpop.f32.mrf.mxu3 }
 0x1e9   :  { %v1186_v60 = vmax.f32 %v1108_v1, 0.0  ;;  %v965_v39 = vadd.f32 %v964_v2, %v876_v33 }
 0x1eb   :  { %v5553_v26 = vpack.c.bf16 %v1186_v60, %v1184_v36  ;;  %v1213_v27 = vmax.f32 %v965_v39, 0.0  ;;  %2009 = vmatmul.bf16.gmra.mxu2 %v5454_v9 }
 0x1ec   :  { %v1021_v44 = vpop.f32.mrf.mxu0 }
 0x1ed   :  { %v5556_v45 = vpack.c.bf16 %v1213_v27, %v1211_v61  ;;  %v1110_v46 = vpop.f32.mrf.mxu1  ;;  %2098 = vmatmul.bf16.gmra.mxu3 %v5553_v26  ;;  %v1022_v53 = vadd.f32 %v1021_v44, %v5521_v51 }
 0x1ee   :  { %v878_v16 = vpop.f32.mrf.mxu2 }
 0x1ef   :  { %v879_v17 = vadd.f32 %v878_v16, %v5405_v20  ;;  %v967_v41 = vpop.f32.mrf.mxu3  ;;  %1060 = vmatmul.bf16.gmra.mxu0 %v5448_v4  ;;  %v1111_v34 = vadd.f32 %v1110_v46, %v1022_v53 }
 0x1f0   :  { %1149 = vmatmul.bf16.gmra.mxu1 %v5450_v5 }
 0x1f1   :  { %v968_v37 = vadd.f32 %v967_v41, %v879_v17  ;;  %v1188_v19 = vmax.f32 %v1111_v34, 0.0 }
 0x1f3   :  { %v1215_v29 = vmax.f32 %v968_v37, 0.0 }
 0x1f4   :  { %v1023_v3 = vpop.f32.mrf.mxu0 }
 0x1f5   :  { %v1024_v22 = vadd.f32 %v1023_v3, %v5521_v51  ;;  %v1112_v4 = vpop.f32.mrf.mxu1 }
 0x1f6   :  { %v880_v5 = vpop.f32.mrf.mxu2 }
 0x1f7   :  { %v1113_v14 = vadd.f32 %v1112_v4, %v1024_v22  ;;  %v881_v15 = vadd.f32 %v880_v5, %v5405_v20  ;;  %v969_v18 = vpop.f32.mrf.mxu3  ;;  %v4085_v4 = vld [vmem:[#allocation10 + $0xe8] sm:$0xf] }
 0x1f9   :  { %v1190_v12 = vmax.f32 %v1113_v14, 0.0  ;;  %v970_v13 = vadd.f32 %v969_v18, %v881_v15  ;;  %v4086_v14 = vor.u32 %v4507_v11, %v4085_v4  ;;  %v4496_v15 = vld [vmem:[#allocation10 + $0xac] sm:$0xf]  ;;  %v4051_v18 = vld [vmem:[#allocation10 + $0xc4] sm:$0xf0] }
 0x1fa   :  { %v3967_v4 = vld [vmem:[#allocation10 + $0x1c] sm:$0xf0]  ;;  %v4531_v11 = vld [vmem:[#allocation10 + $0x1c4] sm:$0xf] }
 0x1fb   :  { %v5565_v30 = vpack.c.bf16 %v1190_v12, %v1188_v19  ;;  %v1217_v32 = vmax.f32 %v970_v13, 0.0  ;;  %2014 = vmatmul.bf16.gmra.mxu2 %v5470_v47  ;;  %v4552_v19 = vld [vmem:[#allocation10 + $0x26c] sm:$0xf] }
 0x1fc   :  { %v1026_v1 = vpop.f32.mrf.mxu0  ;;  %2350 = vmatpush.bf16.msra.mxu2 %v4086_v14 }
 0x1fd   :  { %v5568_v33 = vpack.c.bf16 %v1217_v32, %v1215_v29  ;;  %v1115_v2 = vpop.f32.mrf.mxu1  ;;  %2103 = vmatmul.bf16.gmra.mxu3 %v5565_v30  ;;  %v1027_v61 = vadd.f32 %v1026_v1, %v5521_v51  ;;  %v4054_v29 = vor.u32 %v4496_v15, %v4051_v18  ;;  %v4275_v32 = vld [vmem:[#allocation10 + $0x284] sm:$0xf0] }
 0x1fe   :  { %v883_v36 = vpop.f32.mrf.mxu2  ;;  %v4278_v1 = vor.u32 %v4552_v19, %v4275_v32  ;;  %v4191_v19 = vld [vmem:[#allocation10 + $0x1dc] sm:$0xf0] }
 0x1ff   :  { %v884_v60 = vadd.f32 %v883_v36, %v5405_v20  ;;  %v972_v39 = vpop.f32.mrf.mxu3  ;;  %1065 = vmatmul.bf16.gmra.mxu0 %v5464_v42  ;;  %v1116_v46 = vadd.f32 %v1115_v2, %v1027_v61  ;;  %v4079_v42 = vld [vmem:[#allocation10 + $0xfc] sm:$0xf0] }
 0x200   :  { %1154 = vmatmul.bf16.gmra.mxu1 %v5466_v43  ;;  %v4082_v3 = vor.u32 %v4503_v58, %v4079_v42 }
 0x201   :  { %v973_v27 = vadd.f32 %v972_v39, %v884_v60  ;;  %v1192_v53 = vmax.f32 %v1116_v46, 0.0  ;;  %v4309_v60 = vld [vmem:[#allocation10 + $0x2a8] sm:$0xf]  ;;  %v4563_v39 = vld [vmem:[#allocation10 + $0x2c0] sm:$0xf0]  ;;  %2262 = vmatpush.bf16.msra.mxu1 %v4278_v1 }
 0x202   :  { %2172 = vmatpush.bf16.msra.mxu0 %v4082_v3  ;;  %v4310_v61 = vor.u32 %v4563_v39, %v4309_v60  ;;  %v4545_v46 = vld [vmem:[#allocation10 + $0x234] sm:$0xf] }
 0x203   :  { %v1219_v43 = vmax.f32 %v973_v27, 0.0  ;;  %v4489_v27 = vld [vmem:[#allocation10 + $0x74] sm:$0xf] }
 0x204   :  { %v1028_v44 = vpop.f32.mrf.mxu0  ;;  %2439 = vmatpush.bf16.msra.mxu3 %v4310_v61 }
 0x205   :  { %v1029_v55 = vadd.f32 %v1028_v44, %v5521_v51  ;;  %v1117_v48 = vpop.f32.mrf.mxu1  ;;  %v4023_v44 = vld [vmem:[#allocation10 + $0x8c] sm:$0xf0] }
 0x206   :  { %v885_v16 = vpop.f32.mrf.mxu2  ;;  %2173 = vmatpush.bf16.msra.mxu0 %v4054_v29 }
 0x207   :  { %v1118_v50 = vadd.f32 %v1117_v48, %v1029_v55  ;;  %v886_v17 = vadd.f32 %v885_v16, %v5405_v20  ;;  %v974_v41 = vpop.f32.mrf.mxu3  ;;  %v4026_v55 = vor.u32 %v4489_v27, %v4023_v44  ;;  %v4247_v48 = vld [vmem:[#allocation10 + $0x24c] sm:$0xf0] }
 0x208   :  { %v4250_v16 = vor.u32 %v4545_v46, %v4247_v48 }
 0x209   :  { %v1194_v37 = vmax.f32 %v1118_v50, 0.0  ;;  %v975_v54 = vadd.f32 %v974_v41, %v886_v17 }
 0x20a   :  { %2174 = vmatpush.bf16.msra.mxu0 %v4026_v55  ;;  %2263 = vmatpush.bf16.msra.mxu1 %v4250_v16 }
 0x20b   :  { %v5577_v63 = vpack.c.bf16 %v1194_v37, %v1192_v53  ;;  %v1221_v0 = vmax.f32 %v975_v54, 0.0  ;;  %2019 = vmatmul.bf16.gmra.mxu2 %v5486_v28  ;;  %v4482_v53 = vld [vmem:[#allocation10 + $0x3c] sm:$0xf]  ;;  %v3995_v37 = vld [vmem:[#allocation10 + $0x54] sm:$0xf0] }
 0x20c   :  { %v1031_v7 = vpop.f32.mrf.mxu0  ;;  %v4538_v54 = vld [vmem:[#allocation10 + $0x1fc] sm:$0xf] }
 0x20d   :  { %v5580_v34 = vpack.c.bf16 %v1221_v0, %v1219_v43  ;;  %v1120_v22 = vpop.f32.mrf.mxu1  ;;  %2108 = vmatmul.bf16.gmra.mxu3 %v5577_v63  ;;  %v1032_v2 = vadd.f32 %v1031_v7, %v5521_v51  ;;  %v3998_v43 = vor.u32 %v4482_v53, %v3995_v37  ;;  %v4219_v0 = vld [vmem:[#allocation10 + $0x214] sm:$0xf0] }
 0x20e   :  { %v888_v5 = vpop.f32.mrf.mxu2  ;;  %v4222_v3 = vor.u32 %v4538_v54, %v4219_v0 }
 0x20f   :  { %v889_v12 = vadd.f32 %v888_v5, %v5405_v20  ;;  %v977_v13 = vpop.f32.mrf.mxu3  ;;  %1070 = vmatmul.bf16.gmra.mxu0 %v5480_v23  ;;  %v1121_v50 = vadd.f32 %v1120_v22, %v1032_v2  ;;  %v4475_v22 = vld [vmem:[#allocation10 + $0x4] sm:$0xf] }
 0x210   :  { %1159 = vmatmul.bf16.gmra.mxu1 %v5482_v24  ;;  %2175 = vmatpush.bf16.msra.mxu0 %v3998_v43  ;;  %v3970_v18 = vor.u32 %v4475_v22, %v3967_v4  ;;  %v4556_v22 = vld [vmem:[#allocation10 + $0x288] sm:$0xf0] }
 0x211   :  { %v978_v36 = vadd.f32 %v977_v13, %v889_v12  ;;  %v1196_v6 = vmax.f32 %v1121_v50, 0.0  ;;  %2264 = vmatpush.bf16.msra.mxu1 %v4222_v3  ;;  %v4194_v13 = vor.u32 %v4531_v11, %v4191_v19 }
 0x213   :  { %v1223_v5 = vmax.f32 %v978_v36, 0.0 }
 0x214   :  { %v1033_v23 = vpop.f32.mrf.mxu0  ;;  %2176 = vmatpush.bf16.msra.mxu0 %v3970_v18 }
 0x215   :  { %v1034_v24 = vadd.f32 %v1033_v23, %v5521_v51  ;;  %v1122_v17 = vpop.f32.mrf.mxu1  ;;  %2265 = vmatpush.bf16.msra.mxu1 %v4194_v13 }
 0x216   :  { %v890_v41 = vpop.f32.mrf.mxu2 }
 0x217   :  { %v1123_v58 = vadd.f32 %v1122_v17, %v1034_v24  ;;  %v891_v42 = vadd.f32 %v890_v41, %v5405_v20  ;;  %v979_v38 = vpop.f32.mrf.mxu3 }
 0x219   :  { %v1198_v7 = vmax.f32 %v1123_v58, 0.0  ;;  %v980_v21 = vadd.f32 %v979_v38, %v891_v42  ;;  %v4057_v58 = vld [vmem:[#allocation10 + $0xb0] sm:$0xf]  ;;  %v4500_v42 = vld [vmem:[#allocation10 + $0xc8] sm:$0xf0] }
 0x21a   :  { %v4058_v43 = vor.u32 %v4500_v42, %v4057_v58  ;;  %v5625_v58 = vld [vmem:[#allocation11] sm:$0xff] }
 0x21b   :  { %v5589_v14 = vpack.c.bf16 %v1198_v7, %v1196_v6  ;;  %v1225_v15 = vmax.f32 %v980_v21, 0.0  ;;  %2024 = vmatmul.bf16.gmra.mxu2 %v5502_v59  ;;  %v4281_v21 = vld [vmem:[#allocation10 + $0x270] sm:$0xf] }
 0x21c   :  { %v1036_v12 = vpop.f32.mrf.mxu0  ;;  %2351 = vmatpush.bf16.msra.mxu2 %v4058_v43  ;;  %v4282_v4 = vor.u32 %v4556_v22, %v4281_v21 }
 0x21d   :  { %v5592_v29 = vpack.c.bf16 %v1225_v15, %v1223_v5  ;;  %v1125_v32 = vpop.f32.mrf.mxu1  ;;  %2113 = vmatmul.bf16.gmra.mxu3 %v5589_v14  ;;  %v1037_v60 = vadd.f32 %v1036_v12, %v5521_v51 }
 0x21e   :  { %v893_v1 = vpop.f32.mrf.mxu2  ;;  %2440 = vmatpush.bf16.msra.mxu3 %v4282_v4 }
 0x21f   :  { %v894_v2 = vadd.f32 %v893_v1, %v5405_v20  ;;  %v982_v36 = vpop.f32.mrf.mxu3  ;;  %1075 = vmatmul.bf16.gmra.mxu0 %v5496_v52  ;;  %v1126_v27 = vadd.f32 %v1125_v32, %v1037_v60 }
 0x220   :  { %1164 = vmatmul.bf16.gmra.mxu1 %v5498_v57 }
 0x221   :  { %v983_v39 = vadd.f32 %v982_v36, %v894_v2  ;;  %v1200_v50 = vmax.f32 %v1126_v27, 0.0 }
 0x223   :  { %v1227_v41 = vmax.f32 %v983_v39, 0.0 }
 0x224   :  { %v1038_v61 = vpop.f32.mrf.mxu0 }
 0x225   :  { %v1039_v44 = vadd.f32 %v1038_v61, %v5521_v51  ;;  %v1127_v46 = vpop.f32.mrf.mxu1 }
 0x226   :  { %v895_v55 = vpop.f32.mrf.mxu2 }
 0x227   :  { %v1128_v48 = vadd.f32 %v1127_v46, %v1039_v44  ;;  %v896_v23 = vadd.f32 %v895_v55, %v5405_v20  ;;  %v984_v16 = vpop.f32.mrf.mxu3 }
 0x229   :  { %v1202_v24 = vmax.f32 %v1128_v48, 0.0  ;;  %v985_v17 = vadd.f32 %v984_v16, %v896_v23 }
 0x22b   :  { %v5601_v52 = vpack.c.bf16 %v1202_v24, %v1200_v50  ;;  %v1229_v57 = vmax.f32 %v985_v17, 0.0  ;;  %2029 = vmatmul.bf16.gmra.mxu2 %v5518_v40 }
 0x22c   :  { %v1041_v53 = vpop.f32.mrf.mxu0 }
 0x22d   :  { %v5604_v37 = vpack.c.bf16 %v1229_v57, %v1227_v41  ;;  %v1130_v54 = vpop.f32.mrf.mxu1  ;;  %2118 = vmatmul.bf16.gmra.mxu3 %v5601_v52  ;;  %v1042_v6 = vadd.f32 %v1041_v53, %v5521_v51 }
 0x22e   :  { %v898_v38 = vpop.f32.mrf.mxu2 }
 0x22f   :  { %v899_v0 = vadd.f32 %v898_v38, %v5405_v20  ;;  %v987_v3 = vpop.f32.mrf.mxu3  ;;  %1080 = vmatmul.bf16.gmra.mxu0 %v5512_v56  ;;  %v1131_v5 = vadd.f32 %v1130_v54, %v1042_v6 }
 0x230   :  { %1169 = vmatmul.bf16.gmra.mxu1 %v5514_v49 }
 0x231   :  { %v988_v7 = vadd.f32 %v987_v3, %v899_v0  ;;  %v1204_v32 = vmax.f32 %v1131_v5, 0.0 }
 0x233   :  { %v1231_v2 = vmax.f32 %v988_v7, 0.0  ;;  %v5631_v7 = vperm.slane %v5625_v58, 0 }
 0x234   :  { %v1043_v11 = vpop.f32.mrf.mxu0 }
 0x235   :  { %v1044_v15 = vadd.f32 %v1043_v11, %v5521_v51  ;;  %v1132_v18 = vpop.f32.mrf.mxu1 }
 0x236   :  { %v900_v19 = vpop.f32.mrf.mxu2 }
 0x237   :  { %v1133_v12 = vadd.f32 %v1132_v18, %v1044_v15  ;;  %v901_v13 = vadd.f32 %v900_v19, %v5405_v20  ;;  %v989_v56 = vpop.f32.mrf.mxu3  ;;  %v4029_v19 = vld [vmem:[#allocation10 + $0x78] sm:$0xf] }
 0x239   :  { %v1206_v49 = vmax.f32 %v1133_v12, 0.0  ;;  %v990_v1 = vadd.f32 %v989_v56, %v901_v13  ;;  %v4493_v12 = vld [vmem:[#allocation10 + $0x90] sm:$0xf0]  ;;  %v4253_v13 = vld [vmem:[#allocation10 + $0x238] sm:$0xf] }
 0x23a   :  { %v4030_v56 = vor.u32 %v4493_v12, %v4029_v19 }
 0x23b   :  { %v5613_v36 = vpack.c.bf16 %v1206_v49, %v1204_v32  ;;  %v1233_v60 = vmax.f32 %v990_v1, 0.0  ;;  %2034 = vmatmul.bf16.gmra.mxu2 %v5532_v25  ;;  %v4549_v32 = vld [vmem:[#allocation10 + $0x250] sm:$0xf0] }
 0x23c   :  { %v1046_v39 = vpop.f32.mrf.mxu0  ;;  %v4254_v1 = vor.u32 %v4549_v32, %v4253_v13  ;;  %2352 = vmatpush.bf16.msra.mxu2 %v4030_v56 }
 0x23d   :  { %v5616_v61 = vpack.c.bf16 %v1233_v60, %v1231_v2  ;;  %v1135_v27 = vpop.f32.mrf.mxu1  ;;  %2123 = vmatmul.bf16.gmra.mxu3 %v5613_v36  ;;  %v1047_v48 = vadd.f32 %v1046_v39, %v5521_v51 }
 0x23e   :  { %v903_v44 = vpop.f32.mrf.mxu2  ;;  %2441 = vmatpush.bf16.msra.mxu3 %v4254_v1 }
 0x23f   :  { %v904_v46 = vadd.f32 %v903_v44, %v5405_v20  ;;  %v992_v55 = vpop.f32.mrf.mxu3  ;;  %2177 = vmatmul.bf16.vlgmr.msra.gmra.mxu0 %v5422_v62  ;;  %v1136_v50 = vadd.f32 %v1135_v27, %v1047_v48 }
 0x240   :  { %2266 = vmatmul.bf16.vlgmr.msra.gmra.mxu1 %v5529_v35 }
 0x241   :  { %v993_v23 = vadd.f32 %v992_v55, %v904_v46  ;;  %v1208_v42 = vmax.f32 %v1136_v50, 0.0 }
 0x243   :  { %v1235_v0 = vmax.f32 %v993_v23, 0.0 }
 0x244   :  { %v1048_v16 = vpop.f32.mrf.mxu0 }
 0x245   :  { %v1049_v24 = vadd.f32 %v1048_v16, %v5521_v51  ;;  %v1137_v17 = vpop.f32.mrf.mxu1 }
 0x246   :  { %v905_v41 = vpop.f32.mrf.mxu2 }
 0x247   :  { %v1138_v57 = vadd.f32 %v1137_v17, %v1049_v24  ;;  %v906_v53 = vadd.f32 %v905_v41, %v5405_v20  ;;  %v994_v54 = vpop.f32.mrf.mxu3 }
 0x249   :  { %v1210_v38 = vmax.f32 %v1138_v57, 0.0  ;;  %v995_v43 = vadd.f32 %v994_v54, %v906_v53 }
 0x24b   :  { %v5627_v3 = vpack.c.bf16 %v1210_v38, %v1208_v42  ;;  %v1237_v6 = vmax.f32 %v995_v43, 0.0  ;;  %2039 = vmatmul.bf16.gmra.mxu2 %v5544_v10 }
 0x24c   :  { %v1051_v21 = vpop.f32.mrf.mxu0 }
 0x24d   :  { %v5633_v22 = vpack.c.bf16 %v1237_v6, %v1235_v0  ;;  %v1140_v4 = vpop.f32.mrf.mxu1  ;;  %2128 = vmatmul.bf16.gmra.mxu3 %v5627_v3  ;;  %v1052_v15 = vadd.f32 %v1051_v21, %v5521_v51 }
 0x24e   :  { %v2000_v20 = vpop.f32.mrf.mxu2 }
 0x24f   :  { %v2001_v11 = vadd.f32 %v2000_v20, %v5631_v7  ;;  %2182 = vmatmul.bf16.gmra.mxu0 %v5438_v31  ;;  %v1141_v2 = vadd.f32 %v1140_v4, %v1052_v15 }
 0x250   :  { %2271 = vmatmul.bf16.gmra.mxu1 %v5541_v8  ;;  %v2089_v5 = vpop.f32.mrf.mxu3 }
 0x251   :  { %v2090_v18 = vadd.f32 %v2089_v5, %v2001_v11  ;;  %v1212_v23 = vmax.f32 %v1141_v2, 0.0 }
 0x253   :  { %4602 = vtanh.f32 %v2090_v18 }
 0x254   :  { %v1053_v49 = vpop.f32.mrf.mxu0 }
 0x255   :  { %v1054_v60 = vadd.f32 %v1053_v49, %v5521_v51  ;;  %v1142_v39 = vpop.f32.mrf.mxu1 }
 0x256   :  { %v2002_v27 = vpop.f32.mrf.mxu2 }
 0x257   :  { %v1143_v44 = vadd.f32 %v1142_v39, %v1054_v60  ;;  %v2003_v46 = vadd.f32 %v2002_v27, %v5631_v7 }
 0x258   :  { %v2091_v55 = vpop.f32.mrf.mxu3 }
 0x259   :  { %v4603_v48 = vpop.eup %4602  ;;  %v1214_v16 = vmax.f32 %v1143_v44, 0.0  ;;  %v2092_v50 = vadd.f32 %v2091_v55, %v2003_v46  ;;  %v4001_v46 = vld [vmem:[#allocation10 + $0x40] sm:$0xf]  ;;  %v4486_v55 = vld [vmem:[#allocation10 + $0x58] sm:$0xf0] }
 0x25a   :  { %3461 = vst [vmem:[#allocation13] sm:$0xff] %v4603_v48  ;;  %v4002_v48 = vor.u32 %v4486_v55, %v4001_v46 }
 0x25b   :  { %v5642_v24 = vpack.c.bf16 %v1214_v16, %v1212_v23  ;;  %4604 = vtanh.f32 %v2092_v50  ;;  %2044 = vmatmul.bf16.gmra.mxu2 %v5556_v45  ;;  %v4225_v23 = vld [vmem:[#allocation10 + $0x200] sm:$0xf]  ;;  %v4542_v16 = vld [vmem:[#allocation10 + $0x218] sm:$0xf0] }
 0x25c   :  { %v1056_v17 = vpop.f32.mrf.mxu0  ;;  %2353 = vmatpush.bf16.msra.mxu2 %v4002_v48 }
 0x25d   :  { %v1145_v41 = vpop.f32.mrf.mxu1  ;;  %2133 = vmatmul.bf16.gmra.mxu3 %v5642_v24  ;;  %v1057_v38 = vadd.f32 %v1056_v17, %v5521_v51  ;;  %v4226_v17 = vor.u32 %v4542_v16, %v4225_v23 }
 0x25e   :  { %v2005_v57 = vpop.f32.mrf.mxu2 }
 0x25f   :  { %v2006_v53 = vadd.f32 %v2005_v57, %v5631_v7  ;;  %2187 = vmatmul.bf16.gmra.mxu0 %v5454_v9  ;;  %v1146_v6 = vadd.f32 %v1145_v41, %v1057_v38  ;;  %2442 = vmatpush.bf16.msra.mxu3 %v4226_v17 }
 0x260   :  { %2276 = vmatmul.bf16.gmra.mxu1 %v5553_v26  ;;  %v2094_v54 = vpop.f32.mrf.mxu3 }
 0x261   :  { %v4605_v42 = vpop.eup %4604  ;;  %v2095_v43 = vadd.f32 %v2094_v54, %v2006_v53  ;;  %v1216_v19 = vmax.f32 %v1146_v6, 0.0 }
 0x262   :  { %3468 = vst [vmem:[#allocation13 + $0x38] sm:$0xff] %v4605_v42 }
 0x263   :  { %4606 = vtanh.f32 %v2095_v43 }
 0x264   :  { %v1058_v0 = vpop.f32.mrf.mxu0 }
 0x265   :  { %v1059_v21 = vadd.f32 %v1058_v0, %v5521_v51  ;;  %v1147_v4 = vpop.f32.mrf.mxu1 }
 0x266   :  { %v2007_v20 = vpop.f32.mrf.mxu2 }
 0x267   :  { %v1148_v11 = vadd.f32 %v1147_v4, %v1059_v21  ;;  %v2008_v5 = vadd.f32 %v2007_v20, %v5631_v7 }
 0x268   :  { %v2096_v15 = vpop.f32.mrf.mxu3 }
 0x269   :  { %v4607_v18 = vpop.eup %4606  ;;  %v1218_v12 = vmax.f32 %v1148_v11, 0.0  ;;  %v2097_v13 = vadd.f32 %v2096_v15, %v2008_v5 }
 0x26a   :  { %3475 = vst [vmem:[#allocation13 + $0x70] sm:$0xff] %v4607_v18 }
 0x26b   :  { %v5652_v56 = vpack.c.bf16 %v1218_v12, %v1216_v19  ;;  %4608 = vtanh.f32 %v2097_v13  ;;  %2049 = vmatmul.bf16.gmra.mxu2 %v5568_v33 }
 0x26c   :  { %v1061_v32 = vpop.f32.mrf.mxu0 }
 0x26d   :  { %v1150_v49 = vpop.f32.mrf.mxu1  ;;  %2138 = vmatmul.bf16.gmra.mxu3 %v5652_v56  ;;  %v1062_v27 = vadd.f32 %v1061_v32, %v5521_v51 }
 0x26e   :  { %v2010_v1 = vpop.f32.mrf.mxu2 }
 0x26f   :  { %v2011_v2 = vadd.f32 %v2010_v1, %v5631_v7  ;;  %2192 = vmatmul.bf16.gmra.mxu0 %v5470_v47  ;;  %v1151_v41 = vadd.f32 %v1150_v49, %v1062_v27 }
 0x270   :  { %2281 = vmatmul.bf16.gmra.mxu1 %v5565_v30  ;;  %v2099_v60 = vpop.f32.mrf.mxu3 }
 0x271   :  { %v4609_v39 = vpop.eup %4608  ;;  %v2100_v44 = vadd.f32 %v2099_v60, %v2011_v2  ;;  %v1220_v6 = vmax.f32 %v1151_v41, 0.0 }
 0x272   :  { %3482 = vst [vmem:[#allocation13 + $0xa8] sm:$0xff] %v4609_v39 }
 0x273   :  { %4610 = vtanh.f32 %v2100_v44 }
 0x274   :  { %v1063_v50 = vpop.f32.mrf.mxu0 }
 0x275   :  { %v1064_v57 = vadd.f32 %v1063_v50, %v5521_v51  ;;  %v1152_v53 = vpop.f32.mrf.mxu1 }
 0x276   :  { %v2012_v54 = vpop.f32.mrf.mxu2 }
 0x277   :  { %v1153_v42 = vadd.f32 %v1152_v53, %v1064_v57  ;;  %v2013_v38 = vadd.f32 %v2012_v54, %v5631_v7 }
 0x278   :  { %v2101_v43 = vpop.f32.mrf.mxu3 }
 0x279   :  { %v4611_v0 = vpop.eup %4610  ;;  %v1222_v21 = vmax.f32 %v1153_v42, 0.0  ;;  %v2102_v4 = vadd.f32 %v2101_v43, %v2013_v38 }
 0x27a   :  { %3489 = vst [vmem:[#allocation13 + $0xe0] sm:$0xff] %v4611_v0  ;;  %v3973_v0 = vld [vmem:[#allocation10 + $0x8] sm:$0xf] }
 0x27b   :  { %v5662_v20 = vpack.c.bf16 %v1222_v21, %v1220_v6  ;;  %4612 = vtanh.f32 %v2102_v4  ;;  %2054 = vmatmul.bf16.gmra.mxu2 %v5580_v34  ;;  %v4479_v6 = vld [vmem:[#allocation10 + $0x20] sm:$0xf0]  ;;  %v4197_v4 = vld [vmem:[#allocation10 + $0x1c8] sm:$0xf] }
 0x27c   :  { %v1066_v11 = vpop.f32.mrf.mxu0  ;;  %v3974_v21 = vor.u32 %v4479_v6, %v3973_v0 }
 0x27d   :  { %v1155_v5 = vpop.f32.mrf.mxu1  ;;  %2143 = vmatmul.bf16.gmra.mxu3 %v5662_v20  ;;  %v1067_v13 = vadd.f32 %v1066_v11, %v5521_v51  ;;  %v4535_v11 = vld [vmem:[#allocation10 + $0x1e0] sm:$0xf0] }
 0x27e   :  { %v2015_v15 = vpop.f32.mrf.mxu2  ;;  %2354 = vmatpush.bf16.msra.mxu2 %v3974_v21 }
 0x27f   :  { %v2016_v18 = vadd.f32 %v2015_v15, %v5631_v7  ;;  %2197 = vmatmul.bf16.gmra.mxu0 %v5486_v28  ;;  %v1156_v1 = vadd.f32 %v1155_v5, %v1067_v13  ;;  %v4198_v15 = vor.u32 %v4535_v11, %v4197_v4 }
 0x280   :  { %2286 = vmatmul.bf16.gmra.mxu1 %v5577_v63  ;;  %v2104_v19 = vpop.f32.mrf.mxu3 }
 0x281   :  { %v4613_v12 = vpop.eup %4612  ;;  %v2105_v32 = vadd.f32 %v2104_v19, %v2016_v18  ;;  %v1224_v48 = vmax.f32 %v1156_v1, 0.0  ;;  %2443 = vmatpush.bf16.msra.mxu3 %v4198_v15 }
 0x282   :  { %3496 = vst [vmem:[#allocation13 + $0x118] sm:$0xff] %v4613_v12 }
 0x283   :  { %4614 = vtanh.f32 %v2105_v32 }
 0x284   :  { %v1068_v49 = vpop.f32.mrf.mxu0 }
 0x285   :  { %v1069_v2 = vadd.f32 %v1068_v49, %v5521_v51  ;;  %v1157_v60 = vpop.f32.mrf.mxu1 }
 0x286   :  { %v2017_v39 = vpop.f32.mrf.mxu2 }
 0x287   :  { %v1158_v27 = vadd.f32 %v1157_v60, %v1069_v2  ;;  %v2018_v44 = vadd.f32 %v2017_v39, %v5631_v7 }
 0x288   :  { %v2106_v46 = vpop.f32.mrf.mxu3 }
 0x289   :  { %v4615_v55 = vpop.eup %4614  ;;  %v1226_v23 = vmax.f32 %v1158_v27, 0.0  ;;  %v2107_v16 = vadd.f32 %v2106_v46, %v2018_v44 }
 0x28a   :  { %3503 = vst [vmem:[#allocation13 + $0x150] sm:$0xff] %v4615_v55 }
 0x28b   :  { %v5672_v50 = vpack.c.bf16 %v1226_v23, %v1224_v48  ;;  %4616 = vtanh.f32 %v2107_v16  ;;  %2059 = vmatmul.bf16.gmra.mxu2 %v5592_v29 }
 0x28c   :  { %v1071_v17 = vpop.f32.mrf.mxu0 }
 0x28d   :  { %v1160_v41 = vpop.f32.mrf.mxu1  ;;  %2148 = vmatmul.bf16.gmra.mxu3 %v5672_v50  ;;  %v1072_v38 = vadd.f32 %v1071_v17, %v5521_v51 }
 0x28e   :  { %v2020_v57 = vpop.f32.mrf.mxu2 }
 0x28f   :  { %v2021_v53 = vadd.f32 %v2020_v57, %v5631_v7  ;;  %2202 = vmatmul.bf16.gmra.mxu0 %v5502_v59  ;;  %v1161_v18 = vadd.f32 %v1160_v41, %v1072_v38 }
 0x290   :  { %2291 = vmatmul.bf16.gmra.mxu1 %v5589_v14  ;;  %v2109_v54 = vpop.f32.mrf.mxu3 }
 0x291   :  { %v4617_v42 = vpop.eup %4616  ;;  %v2110_v43 = vadd.f32 %v2109_v54, %v2021_v53  ;;  %v1228_v60 = vmax.f32 %v1161_v18, 0.0 }
 0x292   :  { %3510 = vst [vmem:[#allocation13 + $0x188] sm:$0xff] %v4617_v42 }
 0x293   :  { %4618 = vtanh.f32 %v2110_v43 }
 0x294   :  { %v1073_v5 = vpop.f32.mrf.mxu0 }
 0x295   :  { %v1074_v19 = vadd.f32 %v1073_v5, %v5521_v51  ;;  %v1162_v12 = vpop.f32.mrf.mxu1 }
 0x296   :  { %v2022_v13 = vpop.f32.mrf.mxu2 }
 0x297   :  { %v1163_v32 = vadd.f32 %v1162_v12, %v1074_v19  ;;  %v2023_v49 = vadd.f32 %v2022_v13, %v5631_v7 }
 0x298   :  { %v2111_v1 = vpop.f32.mrf.mxu3 }
 0x299   :  { %v4619_v2 = vpop.eup %4618  ;;  %v1230_v39 = vmax.f32 %v1163_v32, 0.0  ;;  %v2112_v27 = vadd.f32 %v2111_v1, %v2023_v49 }
 0x29a   :  { %3517 = vst [vmem:[#allocation13 + $0x1c0] sm:$0xff] %v4619_v2 }
 0x29b   :  { %v5682_v44 = vpack.c.bf16 %v1230_v39, %v1228_v60  ;;  %4620 = vtanh.f32 %v2112_v27  ;;  %2064 = vmatmul.bf16.gmra.mxu2 %v5604_v37  ;;  %v4177_v39 = vld [vmem:[#allocation10 + $0x198] sm:$0xf]  ;;  %v4529_v27 = vld [vmem:[#allocation10 + $0x1b0] sm:$0xf0] }
 0x29c   :  { %v1076_v46 = vpop.f32.mrf.mxu0 }
 0x29d   :  { %v1165_v55 = vpop.f32.mrf.mxu1  ;;  %2153 = vmatmul.bf16.gmra.mxu3 %v5682_v44  ;;  %v1077_v41 = vadd.f32 %v1076_v46, %v5521_v51  ;;  %v4178_v46 = vor.u32 %v4529_v27, %v4177_v39 }
 0x29e   :  { %v2025_v48 = vpop.f32.mrf.mxu2 }
 0x29f   :  { %v2026_v23 = vadd.f32 %v2025_v48, %v5631_v7  ;;  %2207 = vmatmul.bf16.gmra.mxu0 %v5518_v40  ;;  %v1166_v54 = vadd.f32 %v1165_v55, %v1077_v41  ;;  %2703 = vmatpush.bf16.msrb.mxu2 %v4178_v46 }
 0x2a0   :  { %2296 = vmatmul.bf16.gmra.mxu1 %v5601_v52  ;;  %v2114_v16 = vpop.f32.mrf.mxu3 }
 0x2a1   :  { %v4621_v17 = vpop.eup %4620  ;;  %v2115_v57 = vadd.f32 %v2114_v16, %v2026_v23  ;;  %v1232_v11 = vmax.f32 %v1166_v54, 0.0  ;;  %v5703_v54 = vperm.slane %v5625_v58, 1  ;;  %v4395_v58 = vld [vmem:[#allocation10 + $0x36c] sm:$0xf0] }
 0x2a2   :  { %3524 = vst [vmem:[#allocation13 + $0x1f8] sm:$0xff] %v4621_v17 }
 0x2a3   :  { %4622 = vtanh.f32 %v2115_v57 }
 0x2a4   :  { %v1078_v53 = vpop.f32.mrf.mxu0 }
 0x2a5   :  { %v1079_v42 = vadd.f32 %v1078_v53, %v5521_v51  ;;  %v1167_v38 = vpop.f32.mrf.mxu1 }
 0x2a6   :  { %v2027_v43 = vpop.f32.mrf.mxu2 }
 0x2a7   :  { %v1168_v0 = vadd.f32 %v1167_v38, %v1079_v42  ;;  %v2028_v6 = vadd.f32 %v2027_v43, %v5631_v7  ;;  %v4401_v42 = vld [vmem:[#allocation10 + $0x358] sm:$0xf]  ;;  %v4585_v38 = vld [vmem:[#allocation10 + $0x370] sm:$0xf0] }
 0x2a8   :  { %v2116_v21 = vpop.f32.mrf.mxu3 }
 0x2a9   :  { %v4623_v4 = vpop.eup %4622  ;;  %v1234_v5 = vmax.f32 %v1168_v0, 0.0  ;;  %v2117_v15 = vadd.f32 %v2116_v21, %v2028_v6 }
 0x2aa   :  { %3531 = vst [vmem:[#allocation13 + $0x230] sm:$0xff] %v4623_v4  ;;  %v4402_v4 = vor.u32 %v4585_v38, %v4401_v42 }
 0x2ab   :  { %v5692_v18 = vpack.c.bf16 %v1234_v5, %v1232_v11  ;;  %4624 = vtanh.f32 %v2117_v15  ;;  %2069 = vmatmul.bf16.gmra.mxu2 %v5616_v61  ;;  %v4525_v11 = vld [vmem:[#allocation10 + $0x194] sm:$0xf] }
 0x2ac   :  { %v1081_v19 = vpop.f32.mrf.mxu0  ;;  %2792 = vmatpush.bf16.msrb.mxu3 %v4402_v4 }
 0x2ad   :  { %v1170_v12 = vpop.f32.mrf.mxu1  ;;  %2158 = vmatmul.bf16.gmra.mxu3 %v5692_v18  ;;  %v1082_v2 = vadd.f32 %v1081_v19, %v5521_v51  ;;  %v4581_v19 = vld [vmem:[#allocation10 + $0x354] sm:$0xf] }
 0x2ae   :  { %v2030_v13 = vpop.f32.mrf.mxu2 }
 0x2af   :  { %v2031_v32 = vadd.f32 %v2030_v13, %v5631_v7  ;;  %2212 = vmatmul.bf16.gmra.mxu0 %v5532_v25  ;;  %v1171_v48 = vadd.f32 %v1170_v12, %v1082_v2  ;;  %v4398_v13 = vor.u32 %v4581_v19, %v4395_v58 }
 0x2b0   :  { %2301 = vmatmul.bf16.gmra.mxu1 %v5613_v36  ;;  %v2119_v49 = vpop.f32.mrf.mxu3 }
 0x2b1   :  { %v4625_v1 = vpop.eup %4624  ;;  %v2120_v60 = vadd.f32 %v2119_v49, %v2031_v32  ;;  %v1236_v0 = vmax.f32 %v1171_v48, 0.0  ;;  %2614 = vmatpush.bf16.msrb.mxu1 %v4398_v13  ;;  %v4522_v13 = vld [vmem:[#allocation10 + $0x178] sm:$0xf0] }
 0x2b2   :  { %3538 = vst [vmem:[#allocation13 + $0x268] sm:$0xff] %v4625_v1 }
 0x2b3   :  { %4626 = vtanh.f32 %v2120_v60 }
 0x2b4   :  { %v1083_v55 = vpop.f32.mrf.mxu0 }
 0x2b5   :  { %v1084_v23 = vadd.f32 %v1083_v55, %v5521_v51  ;;  %v1172_v16 = vpop.f32.mrf.mxu1  ;;  %v4171_v51 = vld [vmem:[#allocation10 + $0x1ac] sm:$0xf0] }
 0x2b6   :  { %v2032_v17 = vpop.f32.mrf.mxu2  ;;  %v4174_v15 = vor.u32 %v4525_v11, %v4171_v51 }
 0x2b7   :  { %v1173_v41 = vadd.f32 %v1172_v16, %v1084_v23  ;;  %v2033_v57 = vadd.f32 %v2032_v17, %v5631_v7 }
 0x2b8   :  { %v2121_v53 = vpop.f32.mrf.mxu3  ;;  %2525 = vmatpush.bf16.msrb.mxu0 %v4174_v15 }
 0x2b9   :  { %v4627_v43 = vpop.eup %4626  ;;  %v1238_v6 = vmax.f32 %v1173_v41, 0.0  ;;  %v2122_v21 = vadd.f32 %v2121_v53, %v2033_v57 }
 0x2ba   :  { %3545 = vst [vmem:[#allocation13 + $0x2a0] sm:$0xff] %v4627_v43 }
 0x2bb   :  { %v5705_v5 = vpack.c.bf16 %v1238_v6, %v1236_v0  ;;  %4628 = vtanh.f32 %v2122_v21  ;;  %2074 = vmatmul.bf16.gmra.mxu2 %v5633_v22 }
 0x2bc   :  { %v2178_v12 = vpop.f32.mrf.mxu0 }
 0x2bd   :  { %v2179_v32 = vadd.f32 %v2178_v12, %v5703_v54  ;;  %v2267_v49 = vpop.f32.mrf.mxu1  ;;  %2163 = vmatmul.bf16.gmra.mxu3 %v5705_v5  ;;  %v4149_v12 = vld [vmem:[#allocation10 + $0x160] sm:$0xf] }
 0x2be   :  { %v2035_v1 = vpop.f32.mrf.mxu2 }
 0x2bf   :  { %v2268_v2 = vadd.f32 %v2267_v49, %v2179_v32  ;;  %v2036_v60 = vadd.f32 %v2035_v1, %v5631_v7  ;;  %2217 = vmatmul.bf16.gmra.mxu0 %v5544_v10  ;;  %v4150_v32 = vor.u32 %v4522_v13, %v4149_v12 }
 0x2c0   :  { %2306 = vmatmul.bf16.gmra.mxu1 %v5627_v3  ;;  %v2124_v39 = vpop.f32.mrf.mxu3 }
 0x2c1   :  { %v4629_v27 = vpop.eup %4628  ;;  %4630 = vtanh.f32 %v2268_v2  ;;  %v2125_v46 = vadd.f32 %v2124_v39, %v2036_v60  ;;  %2704 = vmatpush.bf16.msrb.mxu2 %v4150_v32 }
 0x2c2   :  { %3552 = vst [vmem:[#allocation13 + $0x2d8] sm:$0xff] %v4629_v27 }
 0x2c3   :  { %4632 = vtanh.f32 %v2125_v46 }
 0x2c4   :  { %v2180_v55 = vpop.f32.mrf.mxu0 }
 0x2c5   :  { %v2181_v48 = vadd.f32 %v2180_v55, %v5703_v54  ;;  %v2269_v23 = vpop.f32.mrf.mxu1 }
 0x2c6   :  { %v2037_v16 = vpop.f32.mrf.mxu2 }
 0x2c7   :  { %v4631_v17 = vpop.eup %4630  ;;  %v2270_v41 = vadd.f32 %v2269_v23, %v2181_v48  ;;  %v2038_v57 = vadd.f32 %v2037_v16, %v5631_v7  ;;  %v4373_v48 = vld [vmem:[#allocation10 + $0x320] sm:$0xf]  ;;  %v4578_v23 = vld [vmem:[#allocation10 + $0x338] sm:$0xf0] }
 0x2c8   :  { %3462 = vst [vmem:[#allocation13 + $0x8] sm:$0xff] %v4631_v17  ;;  %v2126_v53 = vpop.f32.mrf.mxu3 }
 0x2c9   :  { %v4633_v42 = vpop.eup %4632  ;;  %4634 = vtanh.f32 %v2270_v41  ;;  %v2127_v38 = vadd.f32 %v2126_v53, %v2038_v57  ;;  %v4374_v41 = vor.u32 %v4578_v23, %v4373_v48  ;;  %v4518_v57 = vld [vmem:[#allocation10 + $0x15c] sm:$0xf]  ;;  %v4143_v53 = vld [vmem:[#allocation10 + $0x174] sm:$0xf0] }
 0x2ca   :  { %3559 = vst [vmem:[#allocation13 + $0x310] sm:$0xff] %v4633_v42  ;;  %v4146_v42 = vor.u32 %v4518_v57, %v4143_v53 }
 0x2cb   :  { %4636 = vtanh.f32 %v2127_v38  ;;  %2355 = vmatmul.bf16.vlgmr.msra.gmra.mxu2 %v5422_v62  ;;  %2793 = vmatpush.bf16.msrb.mxu3 %v4374_v41  ;;  %v4574_v38 = vld [vmem:[#allocation10 + $0x31c] sm:$0xf] }
 0x2cc   :  { %v2183_v43 = vpop.f32.mrf.mxu0  ;;  %2526 = vmatpush.bf16.msrb.mxu0 %v4146_v42 }
 0x2cd   :  { %v2184_v0 = vadd.f32 %v2183_v43, %v5703_v54  ;;  %v2272_v6 = vpop.f32.mrf.mxu1  ;;  %2444 = vmatmul.bf16.vlgmr.msra.gmra.mxu3 %v5529_v35  ;;  %v4367_v43 = vld [vmem:[#allocation10 + $0x334] sm:$0xf0] }
 0x2ce   :  { %v2040_v21 = vpop.f32.mrf.mxu2 }
 0x2cf   :  { %v4635_v4 = vpop.eup %4634  ;;  %v2273_v11 = vadd.f32 %v2272_v6, %v2184_v0  ;;  %v2041_v51 = vadd.f32 %v2040_v21, %v5631_v7  ;;  %2222 = vmatmul.bf16.gmra.mxu0 %v5556_v45  ;;  %v4370_v6 = vor.u32 %v4574_v38, %v4367_v43 }
 0x2d0   :  { %3469 = vst [vmem:[#allocation13 + $0x40] sm:$0xff] %v4635_v4  ;;  %2311 = vmatmul.bf16.gmra.mxu1 %v5642_v24  ;;  %v2129_v15 = vpop.f32.mrf.mxu3 }
 0x2d1   :  { %v4637_v19 = vpop.eup %4636  ;;  %4638 = vtanh.f32 %v2273_v11  ;;  %v2130_v58 = vadd.f32 %v2129_v15, %v2041_v51  ;;  %2615 = vmatpush.bf16.msrb.mxu1 %v4370_v6  ;;  %v4121_v6 = vld [vmem:[#allocation10 + $0x128] sm:$0xf] }
 0x2d2   :  { %3566 = vst [vmem:[#allocation13 + $0x348] sm:$0xff] %v4637_v19 }
 0x2d3   :  { %4640 = vtanh.f32 %v2130_v58 }
 0x2d4   :  { %v2185_v49 = vpop.f32.mrf.mxu0 }
 0x2d5   :  { %v2186_v1 = vadd.f32 %v2185_v49, %v5703_v54  ;;  %v2274_v2 = vpop.f32.mrf.mxu1 }
 0x2d6   :  { %v2042_v60 = vpop.f32.mrf.mxu2 }
 0x2d7   :  { %v4639_v39 = vpop.eup %4638  ;;  %v2275_v27 = vadd.f32 %v2274_v2, %v2186_v1  ;;  %v2043_v46 = vadd.f32 %v2042_v60, %v5631_v7 }
 0x2d8   :  { %3476 = vst [vmem:[#allocation13 + $0x78] sm:$0xff] %v4639_v39  ;;  %v2131_v55 = vpop.f32.mrf.mxu3 }
 0x2d9   :  { %v4641_v16 = vpop.eup %4640  ;;  %4642 = vtanh.f32 %v2275_v27  ;;  %v2132_v17 = vadd.f32 %v2131_v55, %v2043_v46 }
 0x2da   :  { %3573 = vst [vmem:[#allocation13 + $0x380] sm:$0xff] %v4641_v16 }
 0x2db   :  { %4644 = vtanh.f32 %v2132_v17  ;;  %2360 = vmatmul.bf16.gmra.mxu2 %v5438_v31 }
 0x2dc   :  { %v2188_v0 = vpop.f32.mrf.mxu0 }
 0x2dd   :  { %v2189_v21 = vadd.f32 %v2188_v0, %v5703_v54  ;;  %v2277_v4 = vpop.f32.mrf.mxu1  ;;  %2449 = vmatmul.bf16.gmra.mxu3 %v5541_v8 }
 0x2de   :  { %v2045_v11 = vpop.f32.mrf.mxu2 }
 0x2df   :  { %v4643_v51 = vpop.eup %4642  ;;  %v2278_v15 = vadd.f32 %v2277_v4, %v2189_v21  ;;  %v2046_v19 = vadd.f32 %v2045_v11, %v5631_v7  ;;  %2227 = vmatmul.bf16.gmra.mxu0 %v5568_v33  ;;  %v4515_v21 = vld [vmem:[#allocation10 + $0x140] sm:$0xf0] }
 0x2e0   :  { %3483 = vst [vmem:[#allocation13 + $0xb0] sm:$0xff] %v4643_v51  ;;  %2316 = vmatmul.bf16.gmra.mxu1 %v5652_v56  ;;  %v2134_v58 = vpop.f32.mrf.mxu3  ;;  %v4122_v4 = vor.u32 %v4515_v21, %v4121_v6 }
 0x2e1   :  { %v4645_v12 = vpop.eup %4644  ;;  %4646 = vtanh.f32 %v2278_v15  ;;  %v2135_v13 = vadd.f32 %v2134_v58, %v2046_v19 }
 0x2e2   :  { %3580 = vst [vmem:[#allocation13 + $0x3b8] sm:$0xff] %v4645_v12  ;;  %2705 = vmatpush.bf16.msrb.mxu2 %v4122_v4 }
 0x2e3   :  { %4648 = vtanh.f32 %v2135_v13 }
 0x2e4   :  { %v2190_v32 = vpop.f32.mrf.mxu0 }
 0x2e5   :  { %v2191_v49 = vadd.f32 %v2190_v32, %v5703_v54  ;;  %v2279_v1 = vpop.f32.mrf.mxu1 }
 0x2e6   :  { %v2047_v2 = vpop.f32.mrf.mxu2 }
 0x2e7   :  { %v4647_v60 = vpop.eup %4646  ;;  %v2280_v39 = vadd.f32 %v2279_v1, %v2191_v49  ;;  %v2048_v27 = vadd.f32 %v2047_v2, %v5631_v7  ;;  %v4345_v49 = vld [vmem:[#allocation10 + $0x2e8] sm:$0xf]  ;;  %v4571_v1 = vld [vmem:[#allocation10 + $0x300] sm:$0xf0] }
 0x2e8   :  { %3490 = vst [vmem:[#allocation13 + $0xe8] sm:$0xff] %v4647_v60  ;;  %v2136_v46 = vpop.f32.mrf.mxu3 }
 0x2e9   :  { %v4649_v55 = vpop.eup %4648  ;;  %4650 = vtanh.f32 %v2280_v39  ;;  %v2137_v48 = vadd.f32 %v2136_v46, %v2048_v27  ;;  %v4346_v39 = vor.u32 %v4571_v1, %v4345_v49  ;;  %v4511_v27 = vld [vmem:[#allocation10 + $0x124] sm:$0xf]  ;;  %v4115_v46 = vld [vmem:[#allocation10 + $0x13c] sm:$0xf0]  ;;  %v4504_v1 = vld [vmem:[#allocation10 + $0xec] sm:$0xf] }
 0x2ea   :  { %3587 = vst [vmem:[#allocation13 + $0x3f0] sm:$0xff] %v4649_v55  ;;  %v4118_v55 = vor.u32 %v4511_v27, %v4115_v46  ;;  %v4311_v27 = vld [vmem:[#allocation10 + $0x2c4] sm:$0xf0] }
 0x2eb   :  { %4652 = vtanh.f32 %v2137_v48  ;;  %2365 = vmatmul.bf16.gmra.mxu2 %v5454_v9  ;;  %2794 = vmatpush.bf16.msrb.mxu3 %v4346_v39  ;;  %v4567_v48 = vld [vmem:[#allocation10 + $0x2e4] sm:$0xf]  ;;  %v4560_v39 = vld [vmem:[#allocation10 + $0x2ac] sm:$0xf] }
 0x2ec   :  { %v2193_v23 = vpop.f32.mrf.mxu0  ;;  %2527 = vmatpush.bf16.msrb.mxu0 %v4118_v55  ;;  %v4314_v55 = vor.u32 %v4560_v39, %v4311_v27 }
 0x2ed   :  { %v2194_v16 = vadd.f32 %v2193_v23, %v5703_v54  ;;  %v2282_v17 = vpop.f32.mrf.mxu1  ;;  %2454 = vmatmul.bf16.gmra.mxu3 %v5553_v26  ;;  %v4339_v23 = vld [vmem:[#allocation10 + $0x2fc] sm:$0xf0] }
 0x2ee   :  { %v2050_v41 = vpop.f32.mrf.mxu2 }
 0x2ef   :  { %v4651_v57 = vpop.eup %4650  ;;  %v2283_v53 = vadd.f32 %v2282_v17, %v2194_v16  ;;  %v2051_v42 = vadd.f32 %v2050_v41, %v5631_v7  ;;  %2232 = vmatmul.bf16.gmra.mxu0 %v5580_v34  ;;  %v4342_v17 = vor.u32 %v4567_v48, %v4339_v23 }
 0x2f0   :  { %3497 = vst [vmem:[#allocation13 + $0x120] sm:$0xff] %v4651_v57  ;;  %2321 = vmatmul.bf16.gmra.mxu1 %v5662_v20  ;;  %v2139_v38 = vpop.f32.mrf.mxu3 }
 0x2f1   :  { %v4653_v43 = vpop.eup %4652  ;;  %4654 = vtanh.f32 %v2283_v53  ;;  %v2140_v0 = vadd.f32 %v2139_v38, %v2051_v42  ;;  %2616 = vmatpush.bf16.msrb.mxu1 %v4342_v17  ;;  %v4497_v17 = vld [vmem:[#allocation10 + $0xb4] sm:$0xf] }
 0x2f2   :  { %3594 = vst [vmem:[#allocation13 + $0x428] sm:$0xff] %v4653_v43 }
 0x2f3   :  { %4656 = vtanh.f32 %v2140_v0 }
 0x2f4   :  { %v2195_v11 = vpop.f32.mrf.mxu0 }
 0x2f5   :  { %v2196_v51 = vadd.f32 %v2195_v11, %v5703_v54  ;;  %v2284_v15 = vpop.f32.mrf.mxu1  ;;  %2617 = vmatpush.bf16.msrb.mxu1 %v4314_v55  ;;  %v4003_v55 = vld [vmem:[#allocation10 + $0x5c] sm:$0xf0] }
 0x2f6   :  { %v2052_v19 = vpop.f32.mrf.mxu2 }
 0x2f7   :  { %v4655_v58 = vpop.eup %4654  ;;  %v2285_v12 = vadd.f32 %v2284_v15, %v2196_v51  ;;  %v2053_v13 = vadd.f32 %v2052_v19, %v5631_v7 }
 0x2f8   :  { %3504 = vst [vmem:[#allocation13 + $0x158] sm:$0xff] %v4655_v58  ;;  %v2141_v32 = vpop.f32.mrf.mxu3 }
 0x2f9   :  { %v4657_v2 = vpop.eup %4656  ;;  %4658 = vtanh.f32 %v2285_v12  ;;  %v2142_v60 = vadd.f32 %v2141_v32, %v2053_v13 }
 0x2fa   :  { %3601 = vst [vmem:[#allocation13 + $0x460] sm:$0xff] %v4657_v2  ;;  %v4087_v2 = vld [vmem:[#allocation10 + $0x104] sm:$0xf0] }
 0x2fb   :  { %4660 = vtanh.f32 %v2142_v60  ;;  %2370 = vmatmul.bf16.gmra.mxu2 %v5470_v47  ;;  %v4090_v60 = vor.u32 %v4504_v1, %v4087_v2  ;;  %v4255_v1 = vld [vmem:[#allocation10 + $0x254] sm:$0xf0] }
 0x2fc   :  { %v2198_v16 = vpop.f32.mrf.mxu0 }
 0x2fd   :  { %v2199_v41 = vadd.f32 %v2198_v16, %v5703_v54  ;;  %v2287_v57 = vpop.f32.mrf.mxu1  ;;  %2459 = vmatmul.bf16.gmra.mxu3 %v5565_v30  ;;  %2528 = vmatpush.bf16.msrb.mxu0 %v4090_v60 }
 0x2fe   :  { %v2055_v53 = vpop.f32.mrf.mxu2 }
 0x2ff   :  { %v4659_v42 = vpop.eup %4658  ;;  %v2288_v38 = vadd.f32 %v2287_v57, %v2199_v41  ;;  %v2056_v43 = vadd.f32 %v2055_v53, %v5631_v7  ;;  %2237 = vmatmul.bf16.gmra.mxu0 %v5592_v29  ;;  %v4059_v41 = vld [vmem:[#allocation10 + $0xcc] sm:$0xf0]  ;;  %v4553_v57 = vld [vmem:[#allocation10 + $0x274] sm:$0xf] }
 0x300   :  { %3511 = vst [vmem:[#allocation13 + $0x190] sm:$0xff] %v4659_v42  ;;  %2326 = vmatmul.bf16.gmra.mxu1 %v5672_v50  ;;  %v2144_v0 = vpop.f32.mrf.mxu3 }
 0x301   :  { %v4661_v6 = vpop.eup %4660  ;;  %4662 = vtanh.f32 %v2288_v38  ;;  %v2145_v21 = vadd.f32 %v2144_v0, %v2056_v43  ;;  %v4062_v43 = vor.u32 %v4497_v17, %v4059_v41  ;;  %v4283_v0 = vld [vmem:[#allocation10 + $0x28c] sm:$0xf0] }
 0x302   :  { %3608 = vst [vmem:[#allocation13 + $0x498] sm:$0xff] %v4661_v6 }
 0x303   :  { %4664 = vtanh.f32 %v2145_v21  ;;  %v4286_v21 = vor.u32 %v4553_v57, %v4283_v0  ;;  %2529 = vmatpush.bf16.msrb.mxu0 %v4062_v43  ;;  %v4227_v57 = vld [vmem:[#allocation10 + $0x21c] sm:$0xf0] }
 0x304   :  { %v2200_v4 = vpop.f32.mrf.mxu0 }
 0x305   :  { %v2201_v11 = vadd.f32 %v2200_v4, %v5703_v54  ;;  %v2289_v51 = vpop.f32.mrf.mxu1  ;;  %2618 = vmatpush.bf16.msrb.mxu1 %v4286_v21 }
 0x306   :  { %v2057_v15 = vpop.f32.mrf.mxu2 }
 0x307   :  { %v4663_v19 = vpop.eup %4662  ;;  %v2290_v58 = vadd.f32 %v2289_v51, %v2201_v11  ;;  %v2058_v12 = vadd.f32 %v2057_v15, %v5631_v7  ;;  %v4093_v51 = vld [vmem:[#allocation10 + $0xf0] sm:$0xf]  ;;  %v4508_v15 = vld [vmem:[#allocation10 + $0x108] sm:$0xf0] }
 0x308   :  { %3518 = vst [vmem:[#allocation13 + $0x1c8] sm:$0xff] %v4663_v19  ;;  %v2146_v13 = vpop.f32.mrf.mxu3  ;;  %v4094_v19 = vor.u32 %v4508_v15, %v4093_v51  ;;  %v4532_v15 = vld [vmem:[#allocation10 + $0x1cc] sm:$0xf] }
 0x309   :  { %v4665_v32 = vpop.eup %4664  ;;  %4666 = vtanh.f32 %v2290_v58  ;;  %v2147_v49 = vadd.f32 %v2146_v13, %v2058_v12  ;;  %v4490_v58 = vld [vmem:[#allocation10 + $0x7c] sm:$0xf]  ;;  %v4031_v12 = vld [vmem:[#allocation10 + $0x94] sm:$0xf0] }
 0x30a   :  { %3615 = vst [vmem:[#allocation13 + $0x4d0] sm:$0xff] %v4665_v32  ;;  %v4546_v13 = vld [vmem:[#allocation10 + $0x23c] sm:$0xf]  ;;  %2706 = vmatpush.bf16.msrb.mxu2 %v4094_v19  ;;  %v4199_v19 = vld [vmem:[#allocation10 + $0x1e4] sm:$0xf0] }
 0x30b   :  { %4668 = vtanh.f32 %v2147_v49  ;;  %2375 = vmatmul.bf16.gmra.mxu2 %v5486_v28  ;;  %v4034_v49 = vor.u32 %v4490_v58, %v4031_v12  ;;  %v4258_v39 = vor.u32 %v4546_v13, %v4255_v1 }
 0x30c   :  { %v2203_v46 = vpop.f32.mrf.mxu0 }
 0x30d   :  { %v2204_v48 = vadd.f32 %v2203_v46, %v5703_v54  ;;  %v2292_v23 = vpop.f32.mrf.mxu1  ;;  %2464 = vmatmul.bf16.gmra.mxu3 %v5577_v63  ;;  %2530 = vmatpush.bf16.msrb.mxu0 %v4034_v49  ;;  %v4483_v46 = vld [vmem:[#allocation10 + $0x44] sm:$0xf] }
 0x30e   :  { %v2060_v16 = vpop.f32.mrf.mxu2  ;;  %2619 = vmatpush.bf16.msrb.mxu1 %v4258_v39  ;;  %v4006_v41 = vor.u32 %v4483_v46, %v4003_v55 }
 0x30f   :  { %v4667_v53 = vpop.eup %4666  ;;  %v2293_v42 = vadd.f32 %v2292_v23, %v2204_v48  ;;  %v2061_v38 = vadd.f32 %v2060_v16, %v5631_v7  ;;  %2242 = vmatmul.bf16.gmra.mxu0 %v5604_v37  ;;  %v4539_v48 = vld [vmem:[#allocation10 + $0x204] sm:$0xf] }
 0x310   :  { %3525 = vst [vmem:[#allocation13 + $0x200] sm:$0xff] %v4667_v53  ;;  %2331 = vmatmul.bf16.gmra.mxu1 %v5682_v44  ;;  %v2149_v6 = vpop.f32.mrf.mxu3  ;;  %v4230_v43 = vor.u32 %v4539_v48, %v4227_v57 }
 0x311   :  { %v4669_v4 = vpop.eup %4668  ;;  %4670 = vtanh.f32 %v2293_v42  ;;  %v2150_v11 = vadd.f32 %v2149_v6, %v2061_v38  ;;  %v4317_v42 = vld [vmem:[#allocation10 + $0x2b0] sm:$0xf]  ;;  %v4564_v38 = vld [vmem:[#allocation10 + $0x2c8] sm:$0xf0]  ;;  %2531 = vmatpush.bf16.msrb.mxu0 %v4006_v41 }
 0x312   :  { %3622 = vst [vmem:[#allocation13 + $0x508] sm:$0xff] %v4669_v4  ;;  %v4318_v21 = vor.u32 %v4564_v38, %v4317_v42  ;;  %v4476_v4 = vld [vmem:[#allocation10 + $0xc] sm:$0xf]  ;;  %2620 = vmatpush.bf16.msrb.mxu1 %v4230_v43 }
 0x313   :  { %4672 = vtanh.f32 %v2150_v11  ;;  %v3975_v11 = vld [vmem:[#allocation10 + $0x24] sm:$0xf0] }
 0x314   :  { %v2205_v32 = vpop.f32.mrf.mxu0  ;;  %2795 = vmatpush.bf16.msrb.mxu3 %v4318_v21  ;;  %v3978_v51 = vor.u32 %v4476_v4, %v3975_v11 }
 0x315   :  { %v2206_v2 = vadd.f32 %v2205_v32, %v5703_v54  ;;  %v2294_v60 = vpop.f32.mrf.mxu1  ;;  %v4202_v32 = vor.u32 %v4532_v15, %v4199_v19 }
 0x316   :  { %v2062_v27 = vpop.f32.mrf.mxu2  ;;  %2532 = vmatpush.bf16.msrb.mxu0 %v3978_v51 }
 0x317   :  { %v4671_v23 = vpop.eup %4670  ;;  %v2295_v16 = vadd.f32 %v2294_v60, %v2206_v2  ;;  %v2063_v17 = vadd.f32 %v2062_v27, %v5631_v7  ;;  %2621 = vmatpush.bf16.msrb.mxu1 %v4202_v32 }
 0x318   :  { %3532 = vst [vmem:[#allocation13 + $0x238] sm:$0xff] %v4671_v23  ;;  %v2151_v53 = vpop.f32.mrf.mxu3 }
 0x319   :  { %v4673_v0 = vpop.eup %4672  ;;  %4674 = vtanh.f32 %v2295_v16  ;;  %v2152_v6 = vadd.f32 %v2151_v53, %v2063_v17 }
 0x31a   :  { %3629 = vst [vmem:[#allocation13 + $0x540] sm:$0xff] %v4673_v0 }
 0x31b   :  { %4676 = vtanh.f32 %v2152_v6  ;;  %2380 = vmatmul.bf16.gmra.mxu2 %v5502_v59 }
 0x31c   :  { %v2208_v58 = vpop.f32.mrf.mxu0 }
 0x31d   :  { %v2209_v12 = vadd.f32 %v2208_v58, %v5703_v54  ;;  %v2297_v13 = vpop.f32.mrf.mxu1  ;;  %2469 = vmatmul.bf16.gmra.mxu3 %v5589_v14 }
 0x31e   :  { %v2065_v49 = vpop.f32.mrf.mxu2 }
 0x31f   :  { %v4675_v1 = vpop.eup %4674  ;;  %v2298_v2 = vadd.f32 %v2297_v13, %v2209_v12  ;;  %v2066_v60 = vadd.f32 %v2065_v49, %v5631_v7  ;;  %2247 = vmatmul.bf16.gmra.mxu0 %v5616_v61  ;;  %v4065_v12 = vld [vmem:[#allocation10 + $0xb8] sm:$0xf]  ;;  %v4501_v13 = vld [vmem:[#allocation10 + $0xd0] sm:$0xf0] }
 0x320   :  { %3539 = vst [vmem:[#allocation13 + $0x270] sm:$0xff] %v4675_v1  ;;  %2336 = vmatmul.bf16.gmra.mxu1 %v5692_v18  ;;  %v2154_v39 = vpop.f32.mrf.mxu3  ;;  %v4066_v32 = vor.u32 %v4501_v13, %v4065_v12 }
 0x321   :  { %v4677_v27 = vpop.eup %4676  ;;  %4678 = vtanh.f32 %v2298_v2  ;;  %v2155_v46 = vadd.f32 %v2154_v39, %v2066_v60 }
 0x322   :  { %3636 = vst [vmem:[#allocation13 + $0x578] sm:$0xff] %v4677_v27  ;;  %2707 = vmatpush.bf16.msrb.mxu2 %v4066_v32 }
 0x323   :  { %4680 = vtanh.f32 %v2155_v46 }
 0x324   :  { %v2210_v55 = vpop.f32.mrf.mxu0 }
 0x325   :  { %v2211_v48 = vadd.f32 %v2210_v55, %v5703_v54  ;;  %v2299_v23 = vpop.f32.mrf.mxu1 }
 0x326   :  { %v2067_v16 = vpop.f32.mrf.mxu2 }
 0x327   :  { %v4679_v17 = vpop.eup %4678  ;;  %v2300_v41 = vadd.f32 %v2299_v23, %v2211_v48  ;;  %v2068_v57 = vadd.f32 %v2067_v16, %v5631_v7  ;;  %v4289_v48 = vld [vmem:[#allocation10 + $0x278] sm:$0xf]  ;;  %v4557_v23 = vld [vmem:[#allocation10 + $0x290] sm:$0xf0] }
 0x328   :  { %3546 = vst [vmem:[#allocation13 + $0x2a8] sm:$0xff] %v4679_v17  ;;  %v2156_v53 = vpop.f32.mrf.mxu3 }
 0x329   :  { %v4681_v42 = vpop.eup %4680  ;;  %4682 = vtanh.f32 %v2300_v41  ;;  %v2157_v38 = vadd.f32 %v2156_v53, %v2068_v57  ;;  %v4290_v41 = vor.u32 %v4557_v23, %v4289_v48 }
 0x32a   :  { %3643 = vst [vmem:[#allocation13 + $0x5b0] sm:$0xff] %v4681_v42 }
 0x32b   :  { %4684 = vtanh.f32 %v2157_v38  ;;  %2385 = vmatmul.bf16.gmra.mxu2 %v5518_v40  ;;  %2796 = vmatpush.bf16.msrb.mxu3 %v4290_v41 }
 0x32c   :  { %v2213_v43 = vpop.f32.mrf.mxu0 }
 0x32d   :  { %v2214_v0 = vadd.f32 %v2213_v43, %v5703_v54  ;;  %v2302_v6 = vpop.f32.mrf.mxu1  ;;  %2474 = vmatmul.bf16.gmra.mxu3 %v5601_v52 }
 0x32e   :  { %v2070_v21 = vpop.f32.mrf.mxu2 }
 0x32f   :  { %v4683_v4 = vpop.eup %4682  ;;  %v2303_v11 = vadd.f32 %v2302_v6, %v2214_v0  ;;  %v2071_v51 = vadd.f32 %v2070_v21, %v5631_v7  ;;  %2252 = vmatmul.bf16.gmra.mxu0 %v5633_v22 }
 0x330   :  { %3553 = vst [vmem:[#allocation13 + $0x2e0] sm:$0xff] %v4683_v4  ;;  %2341 = vmatmul.bf16.gmra.mxu1 %v5705_v5  ;;  %v2159_v15 = vpop.f32.mrf.mxu3 }
 0x331   :  { %v4685_v19 = vpop.eup %4684  ;;  %4686 = vtanh.f32 %v2303_v11  ;;  %v2160_v58 = vadd.f32 %v2159_v15, %v2071_v51 }
 0x332   :  { %3650 = vst [vmem:[#allocation13 + $0x5e8] sm:$0xff] %v4685_v19 }
 0x333   :  { %4688 = vtanh.f32 %v2160_v58 }
 0x334   :  { %v2215_v49 = vpop.f32.mrf.mxu0 }
 0x335   :  { %v2216_v1 = vadd.f32 %v2215_v49, %v5703_v54  ;;  %v2304_v2 = vpop.f32.mrf.mxu1 }
 0x336   :  { %v2072_v60 = vpop.f32.mrf.mxu2 }
 0x337   :  { %v4687_v39 = vpop.eup %4686  ;;  %v2305_v27 = vadd.f32 %v2304_v2, %v2216_v1  ;;  %v2073_v46 = vadd.f32 %v2072_v60, %v5631_v7  ;;  %v5780_v60 = vld [vmem:[#allocation11] sm:$0xff] }
 0x338   :  { %3560 = vst [vmem:[#allocation13 + $0x318] sm:$0xff] %v4687_v39  ;;  %v2161_v55 = vpop.f32.mrf.mxu3  ;;  %v5783_v39 = vperm.slane %v5780_v60, 2 }
 0x339   :  { %v4689_v16 = vpop.eup %4688  ;;  %4690 = vtanh.f32 %v2305_v27  ;;  %v2162_v17 = vadd.f32 %v2161_v55, %v2073_v46 }
 0x33a   :  { %3657 = vst [vmem:[#allocation13 + $0x620] sm:$0xff] %v4689_v16 }
 0x33b   :  { %4692 = vtanh.f32 %v2162_v17  ;;  %2390 = vmatmul.bf16.gmra.mxu2 %v5532_v25 }
 0x33c   :  { %v2218_v57 = vpop.f32.mrf.mxu0 }
 0x33d   :  { %v2219_v53 = vadd.f32 %v2218_v57, %v5703_v54  ;;  %v2307_v42 = vpop.f32.mrf.mxu1  ;;  %2479 = vmatmul.bf16.gmra.mxu3 %v5613_v36 }
 0x33e   :  { %v2075_v38 = vpop.f32.mrf.mxu2 }
 0x33f   :  { %v4691_v43 = vpop.eup %4690  ;;  %v2308_v0 = vadd.f32 %v2307_v42, %v2219_v53  ;;  %v2076_v6 = vadd.f32 %v2075_v38, %v5631_v7  ;;  %2533 = vmatmul.bf16.vlgmr.msrb.gmra.mxu0 %v5422_v62  ;;  %v4037_v53 = vld [vmem:[#allocation10 + $0x80] sm:$0xf]  ;;  %v4494_v42 = vld [vmem:[#allocation10 + $0x98] sm:$0xf0] }
 0x340   :  { %3567 = vst [vmem:[#allocation13 + $0x350] sm:$0xff] %v4691_v43  ;;  %2622 = vmatmul.bf16.vlgmr.msrb.gmra.mxu1 %v5529_v35  ;;  %v2164_v21 = vpop.f32.mrf.mxu3  ;;  %v4038_v38 = vor.u32 %v4494_v42, %v4037_v53 }
 0x341   :  { %v4693_v4 = vpop.eup %4692  ;;  %4694 = vtanh.f32 %v2308_v0  ;;  %v2165_v11 = vadd.f32 %v2164_v21, %v2076_v6 }
 0x342   :  { %3664 = vst [vmem:[#allocation13 + $0x658] sm:$0xff] %v4693_v4  ;;  %2708 = vmatpush.bf16.msrb.mxu2 %v4038_v38 }
 0x343   :  { %4696 = vtanh.f32 %v2165_v11 }
 0x344   :  { %v2220_v51 = vpop.f32.mrf.mxu0 }
 0x345   :  { %v2221_v15 = vadd.f32 %v2220_v51, %v5703_v54  ;;  %v2309_v19 = vpop.f32.mrf.mxu1 }
 0x346   :  { %v2077_v58 = vpop.f32.mrf.mxu2 }
 0x347   :  { %v4695_v12 = vpop.eup %4694  ;;  %v2310_v13 = vadd.f32 %v2309_v19, %v2221_v15  ;;  %v2078_v32 = vadd.f32 %v2077_v58, %v5631_v7  ;;  %v4261_v19 = vld [vmem:[#allocation10 + $0x240] sm:$0xf]  ;;  %v4550_v58 = vld [vmem:[#allocation10 + $0x258] sm:$0xf0] }
 0x348   :  { %3574 = vst [vmem:[#allocation13 + $0x388] sm:$0xff] %v4695_v12  ;;  %v2166_v49 = vpop.f32.mrf.mxu3 }
 0x349   :  { %v4697_v1 = vpop.eup %4696  ;;  %4698 = vtanh.f32 %v2310_v13  ;;  %v2167_v2 = vadd.f32 %v2166_v49, %v2078_v32  ;;  %v4262_v32 = vor.u32 %v4550_v58, %v4261_v19 }
 0x34a   :  { %3671 = vst [vmem:[#allocation13 + $0x690] sm:$0xff] %v4697_v1 }
 0x34b   :  { %4700 = vtanh.f32 %v2167_v2  ;;  %2395 = vmatmul.bf16.gmra.mxu2 %v5544_v10  ;;  %2797 = vmatpush.bf16.msrb.mxu3 %v4262_v32 }
 0x34c   :  { %v2223_v27 = vpop.f32.mrf.mxu0 }
 0x34d   :  { %v2224_v46 = vadd.f32 %v2223_v27, %v5703_v54  ;;  %v2312_v55 = vpop.f32.mrf.mxu1  ;;  %2484 = vmatmul.bf16.gmra.mxu3 %v5627_v3 }
 0x34e   :  { %v2356_v7 = vpop.f32.mrf.mxu2 }
 0x34f   :  { %v4699_v48 = vpop.eup %4698  ;;  %v2313_v23 = vadd.f32 %v2312_v55, %v2224_v46  ;;  %v2357_v16 = vadd.f32 %v2356_v7, %v5783_v39  ;;  %2538 = vmatmul.bf16.gmra.mxu0 %v5438_v31 }
 0x350   :  { %3581 = vst [vmem:[#allocation13 + $0x3c0] sm:$0xff] %v4699_v48  ;;  %2627 = vmatmul.bf16.gmra.mxu1 %v5541_v8  ;;  %v2445_v17 = vpop.f32.mrf.mxu3 }
 0x351   :  { %v4701_v41 = vpop.eup %4700  ;;  %4702 = vtanh.f32 %v2313_v23  ;;  %v2446_v57 = vadd.f32 %v2445_v17, %v2357_v16 }
 0x352   :  { %3678 = vst [vmem:[#allocation13 + $0x6c8] sm:$0xff] %v4701_v41 }
 0x353   :  { %4704 = vtanh.f32 %v2446_v57 }
 0x354   :  { %v2225_v43 = vpop.f32.mrf.mxu0 }
 0x355   :  { %v2226_v0 = vadd.f32 %v2225_v43, %v5703_v54  ;;  %v2314_v6 = vpop.f32.mrf.mxu1 }
 0x356   :  { %v2358_v21 = vpop.f32.mrf.mxu2 }
 0x357   :  { %v4703_v4 = vpop.eup %4702  ;;  %v2315_v11 = vadd.f32 %v2314_v6, %v2226_v0  ;;  %v2359_v51 = vadd.f32 %v2358_v21, %v5783_v39 }
 0x358   :  { %3588 = vst [vmem:[#allocation13 + $0x3f8] sm:$0xff] %v4703_v4  ;;  %v2447_v15 = vpop.f32.mrf.mxu3 }
 0x359   :  { %v4705_v12 = vpop.eup %4704  ;;  %4706 = vtanh.f32 %v2315_v11  ;;  %v2448_v13 = vadd.f32 %v2447_v15, %v2359_v51 }
 0x35a   :  { %3463 = vst [vmem:[#allocation13 + $0x10] sm:$0xff] %v4705_v12 }
 0x35b   :  { %4708 = vtanh.f32 %v2448_v13  ;;  %2400 = vmatmul.bf16.gmra.mxu2 %v5556_v45 }
 0x35c   :  { %v2228_v49 = vpop.f32.mrf.mxu0 }
 0x35d   :  { %v2229_v1 = vadd.f32 %v2228_v49, %v5703_v54  ;;  %v2317_v2 = vpop.f32.mrf.mxu1  ;;  %2489 = vmatmul.bf16.gmra.mxu3 %v5642_v24 }
 0x35e   :  { %v2361_v27 = vpop.f32.mrf.mxu2 }
 0x35f   :  { %v4707_v46 = vpop.eup %4706  ;;  %v2318_v55 = vadd.f32 %v2317_v2, %v2229_v1  ;;  %v2362_v7 = vadd.f32 %v2361_v27, %v5783_v39  ;;  %2543 = vmatmul.bf16.gmra.mxu0 %v5454_v9  ;;  %v4009_v1 = vld [vmem:[#allocation10 + $0x48] sm:$0xf]  ;;  %v4487_v2 = vld [vmem:[#allocation10 + $0x60] sm:$0xf0] }
 0x360   :  { %3595 = vst [vmem:[#allocation13 + $0x430] sm:$0xff] %v4707_v46  ;;  %2632 = vmatmul.bf16.gmra.mxu1 %v5553_v26  ;;  %v2450_v48 = vpop.f32.mrf.mxu3  ;;  %v4010_v27 = vor.u32 %v4487_v2, %v4009_v1 }
 0x361   :  { %v4709_v23 = vpop.eup %4708  ;;  %4710 = vtanh.f32 %v2318_v55  ;;  %v2451_v16 = vadd.f32 %v2450_v48, %v2362_v7 }
 0x362   :  { %3470 = vst [vmem:[#allocation13 + $0x48] sm:$0xff] %v4709_v23  ;;  %2709 = vmatpush.bf16.msrb.mxu2 %v4010_v27 }
 0x363   :  { %4712 = vtanh.f32 %v2451_v16 }
 0x364   :  { %v2230_v17 = vpop.f32.mrf.mxu0 }
 0x365   :  { %v2231_v41 = vadd.f32 %v2230_v17, %v5703_v54  ;;  %v2319_v57 = vpop.f32.mrf.mxu1 }
 0x366   :  { %v2363_v53 = vpop.f32.mrf.mxu2 }
 0x367   :  { %v4711_v42 = vpop.eup %4710  ;;  %v2320_v38 = vadd.f32 %v2319_v57, %v2231_v41  ;;  %v2364_v43 = vadd.f32 %v2363_v53, %v5783_v39  ;;  %v4233_v57 = vld [vmem:[#allocation10 + $0x208] sm:$0xf]  ;;  %v4543_v53 = vld [vmem:[#allocation10 + $0x220] sm:$0xf0] }
 0x368   :  { %3602 = vst [vmem:[#allocation13 + $0x468] sm:$0xff] %v4711_v42  ;;  %v2452_v0 = vpop.f32.mrf.mxu3 }
 0x369   :  { %v4713_v6 = vpop.eup %4712  ;;  %4714 = vtanh.f32 %v2320_v38  ;;  %v2453_v21 = vadd.f32 %v2452_v0, %v2364_v43  ;;  %v4234_v43 = vor.u32 %v4543_v53, %v4233_v57 }
 0x36a   :  { %3477 = vst [vmem:[#allocation13 + $0x80] sm:$0xff] %v4713_v6 }
 0x36b   :  { %4716 = vtanh.f32 %v2453_v21  ;;  %2405 = vmatmul.bf16.gmra.mxu2 %v5568_v33  ;;  %2798 = vmatpush.bf16.msrb.mxu3 %v4234_v43 }
 0x36c   :  { %v2233_v4 = vpop.f32.mrf.mxu0 }
 0x36d   :  { %v2234_v11 = vadd.f32 %v2233_v4, %v5703_v54  ;;  %v2322_v51 = vpop.f32.mrf.mxu1  ;;  %2494 = vmatmul.bf16.gmra.mxu3 %v5652_v56 }
 0x36e   :  { %v2366_v15 = vpop.f32.mrf.mxu2 }
 0x36f   :  { %v4715_v19 = vpop.eup %4714  ;;  %v2323_v58 = vadd.f32 %v2322_v51, %v2234_v11  ;;  %v2367_v12 = vadd.f32 %v2366_v15, %v5783_v39  ;;  %2548 = vmatmul.bf16.gmra.mxu0 %v5470_v47 }
 0x370   :  { %3609 = vst [vmem:[#allocation13 + $0x4a0] sm:$0xff] %v4715_v19  ;;  %2637 = vmatmul.bf16.gmra.mxu1 %v5565_v30  ;;  %v2455_v13 = vpop.f32.mrf.mxu3 }
 0x371   :  { %v4717_v32 = vpop.eup %4716  ;;  %4718 = vtanh.f32 %v2323_v58  ;;  %v2456_v49 = vadd.f32 %v2455_v13, %v2367_v12 }
 0x372   :  { %3484 = vst [vmem:[#allocation13 + $0xb8] sm:$0xff] %v4717_v32 }
 0x373   :  { %4720 = vtanh.f32 %v2456_v49 }
 0x374   :  { %v2235_v46 = vpop.f32.mrf.mxu0 }
 0x375   :  { %v2236_v55 = vadd.f32 %v2235_v46, %v5703_v54  ;;  %v2324_v7 = vpop.f32.mrf.mxu1 }
 0x376   :  { %v2368_v48 = vpop.f32.mrf.mxu2 }
 0x377   :  { %v4719_v23 = vpop.eup %4718  ;;  %v2325_v16 = vadd.f32 %v2324_v7, %v2236_v55  ;;  %v2369_v17 = vadd.f32 %v2368_v48, %v5783_v39 }
 0x378   :  { %3616 = vst [vmem:[#allocation13 + $0x4d8] sm:$0xff] %v4719_v23  ;;  %v2457_v41 = vpop.f32.mrf.mxu3 }
 0x379   :  { %v4721_v42 = vpop.eup %4720  ;;  %4722 = vtanh.f32 %v2325_v16  ;;  %v2458_v38 = vadd.f32 %v2457_v41, %v2369_v17 }
 0x37a   :  { %3491 = vst [vmem:[#allocation13 + $0xf0] sm:$0xff] %v4721_v42 }
 0x37b   :  { %4724 = vtanh.f32 %v2458_v38  ;;  %2410 = vmatmul.bf16.gmra.mxu2 %v5580_v34 }
 0x37c   :  { %v2238_v0 = vpop.f32.mrf.mxu0 }
 0x37d   :  { %v2239_v6 = vadd.f32 %v2238_v0, %v5703_v54  ;;  %v2327_v21 = vpop.f32.mrf.mxu1  ;;  %2499 = vmatmul.bf16.gmra.mxu3 %v5662_v20 }
 0x37e   :  { %v2371_v4 = vpop.f32.mrf.mxu2 }
 0x37f   :  { %v4723_v11 = vpop.eup %4722  ;;  %v2328_v51 = vadd.f32 %v2327_v21, %v2239_v6  ;;  %v2372_v15 = vadd.f32 %v2371_v4, %v5783_v39  ;;  %2553 = vmatmul.bf16.gmra.mxu0 %v5486_v28  ;;  %v3981_v6 = vld [vmem:[#allocation10 + $0x10] sm:$0xf]  ;;  %v4480_v21 = vld [vmem:[#allocation10 + $0x28] sm:$0xf0] }
 0x380   :  { %3623 = vst [vmem:[#allocation13 + $0x510] sm:$0xff] %v4723_v11  ;;  %2642 = vmatmul.bf16.gmra.mxu1 %v5577_v63  ;;  %v2460_v19 = vpop.f32.mrf.mxu3  ;;  %v3982_v4 = vor.u32 %v4480_v21, %v3981_v6 }
 0x381   :  { %v4725_v58 = vpop.eup %4724  ;;  %4726 = vtanh.f32 %v2328_v51  ;;  %v2461_v12 = vadd.f32 %v2460_v19, %v2372_v15 }
 0x382   :  { %3498 = vst [vmem:[#allocation13 + $0x128] sm:$0xff] %v4725_v58  ;;  %2710 = vmatpush.bf16.msrb.mxu2 %v3982_v4 }
 0x383   :  { %4728 = vtanh.f32 %v2461_v12 }
 0x384   :  { %v2240_v13 = vpop.f32.mrf.mxu0 }
 0x385   :  { %v2241_v32 = vadd.f32 %v2240_v13, %v5703_v54  ;;  %v2329_v49 = vpop.f32.mrf.mxu1 }
 0x386   :  { %v2373_v1 = vpop.f32.mrf.mxu2 }
 0x387   :  { %v4727_v2 = vpop.eup %4726  ;;  %v2330_v27 = vadd.f32 %v2329_v49, %v2241_v32  ;;  %v2374_v46 = vadd.f32 %v2373_v1, %v5783_v39  ;;  %v4205_v49 = vld [vmem:[#allocation10 + $0x1d0] sm:$0xf]  ;;  %v4536_v1 = vld [vmem:[#allocation10 + $0x1e8] sm:$0xf0] }
 0x388   :  { %3630 = vst [vmem:[#allocation13 + $0x548] sm:$0xff] %v4727_v2  ;;  %v2462_v55 = vpop.f32.mrf.mxu3 }
 0x389   :  { %v4729_v7 = vpop.eup %4728  ;;  %4730 = vtanh.f32 %v2330_v27  ;;  %v2463_v48 = vadd.f32 %v2462_v55, %v2374_v46  ;;  %v4206_v46 = vor.u32 %v4536_v1, %v4205_v49 }
 0x38a   :  { %3505 = vst [vmem:[#allocation13 + $0x160] sm:$0xff] %v4729_v7 }
 0x38b   :  { %4732 = vtanh.f32 %v2463_v48  ;;  %2415 = vmatmul.bf16.gmra.mxu2 %v5592_v29  ;;  %2799 = vmatpush.bf16.msrb.mxu3 %v4206_v46 }
 0x38c   :  { %v2243_v23 = vpop.f32.mrf.mxu0 }
 0x38d   :  { %v2244_v16 = vadd.f32 %v2243_v23, %v5703_v54  ;;  %v2332_v17 = vpop.f32.mrf.mxu1  ;;  %2504 = vmatmul.bf16.gmra.mxu3 %v5672_v50 }
 0x38e   :  { %v2376_v41 = vpop.f32.mrf.mxu2 }
 0x38f   :  { %v4731_v57 = vpop.eup %4730  ;;  %v2333_v53 = vadd.f32 %v2332_v17, %v2244_v16  ;;  %v2377_v42 = vadd.f32 %v2376_v41, %v5783_v39  ;;  %2558 = vmatmul.bf16.gmra.mxu0 %v5502_v59 }
 0x390   :  { %3637 = vst [vmem:[#allocation13 + $0x580] sm:$0xff] %v4731_v57  ;;  %2647 = vmatmul.bf16.gmra.mxu1 %v5589_v14  ;;  %v2465_v38 = vpop.f32.mrf.mxu3 }
 0x391   :  { %v4733_v43 = vpop.eup %4732  ;;  %4734 = vtanh.f32 %v2333_v53  ;;  %v2466_v0 = vadd.f32 %v2465_v38, %v2377_v42 }
 0x392   :  { %3512 = vst [vmem:[#allocation13 + $0x198] sm:$0xff] %v4733_v43 }
 0x393   :  { %4736 = vtanh.f32 %v2466_v0 }
 0x394   :  { %v2245_v11 = vpop.f32.mrf.mxu0 }
 0x395   :  { %v2246_v51 = vadd.f32 %v2245_v11, %v5703_v54  ;;  %v2334_v15 = vpop.f32.mrf.mxu1 }
 0x396   :  { %v2378_v19 = vpop.f32.mrf.mxu2 }
 0x397   :  { %v4735_v58 = vpop.eup %4734  ;;  %v2335_v12 = vadd.f32 %v2334_v15, %v2246_v51  ;;  %v2379_v13 = vadd.f32 %v2378_v19, %v5783_v39 }
 0x398   :  { %3644 = vst [vmem:[#allocation13 + $0x5b8] sm:$0xff] %v4735_v58  ;;  %v2467_v32 = vpop.f32.mrf.mxu3 }
 0x399   :  { %v4737_v2 = vpop.eup %4736  ;;  %4738 = vtanh.f32 %v2335_v12  ;;  %v2468_v27 = vadd.f32 %v2467_v32, %v2379_v13 }
 0x39a   :  { %3519 = vst [vmem:[#allocation13 + $0x1d0] sm:$0xff] %v4737_v2 }
 0x39b   :  { %4740 = vtanh.f32 %v2468_v27  ;;  %2420 = vmatmul.bf16.gmra.mxu2 %v5604_v37 }
 0x39c   :  { %v2248_v55 = vpop.f32.mrf.mxu0 }
 0x39d   :  { %v2249_v7 = vadd.f32 %v2248_v55, %v5703_v54  ;;  %v2337_v48 = vpop.f32.mrf.mxu1  ;;  %2509 = vmatmul.bf16.gmra.mxu3 %v5682_v44 }
 0x39e   :  { %v2381_v23 = vpop.f32.mrf.mxu2 }
 0x39f   :  { %v4739_v16 = vpop.eup %4738  ;;  %v2338_v17 = vadd.f32 %v2337_v48, %v2249_v7  ;;  %v2382_v41 = vadd.f32 %v2381_v23, %v5783_v39  ;;  %2563 = vmatmul.bf16.gmra.mxu0 %v5518_v40  ;;  %v4185_v7 = vld [vmem:[#allocation10 + $0x1a0] sm:$0xf]  ;;  %v4530_v48 = vld [vmem:[#allocation10 + $0x1b8] sm:$0xf0] }
 0x3a0   :  { %3651 = vst [vmem:[#allocation13 + $0x5f0] sm:$0xff] %v4739_v16  ;;  %2652 = vmatmul.bf16.gmra.mxu1 %v5601_v52  ;;  %v2470_v57 = vpop.f32.mrf.mxu3  ;;  %v4186_v23 = vor.u32 %v4530_v48, %v4185_v7 }
 0x3a1   :  { %v4741_v53 = vpop.eup %4740  ;;  %4742 = vtanh.f32 %v2338_v17  ;;  %v2471_v42 = vadd.f32 %v2470_v57, %v2382_v41 }
 0x3a2   :  { %3526 = vst [vmem:[#allocation13 + $0x208] sm:$0xff] %v4741_v53  ;;  %3059 = vmatpush.bf16.msra.mxu2 %v4186_v23 }
 0x3a3   :  { %4744 = vtanh.f32 %v2471_v42 }
 0x3a4   :  { %v2250_v38 = vpop.f32.mrf.mxu0 }
 0x3a5   :  { %v2251_v43 = vadd.f32 %v2250_v38, %v5703_v54  ;;  %v2339_v0 = vpop.f32.mrf.mxu1 }
 0x3a6   :  { %v2383_v6 = vpop.f32.mrf.mxu2 }
 0x3a7   :  { %v4743_v21 = vpop.eup %4742  ;;  %v2340_v4 = vadd.f32 %v2339_v0, %v2251_v43  ;;  %v2384_v11 = vadd.f32 %v2383_v6, %v5783_v39  ;;  %v4409_v0 = vld [vmem:[#allocation10 + $0x360] sm:$0xf]  ;;  %v4586_v6 = vld [vmem:[#allocation10 + $0x378] sm:$0xf0] }
 0x3a8   :  { %3658 = vst [vmem:[#allocation13 + $0x628] sm:$0xff] %v4743_v21  ;;  %v2472_v51 = vpop.f32.mrf.mxu3 }
 0x3a9   :  { %v4745_v15 = vpop.eup %4744  ;;  %4746 = vtanh.f32 %v2340_v4  ;;  %v2473_v19 = vadd.f32 %v2472_v51, %v2384_v11  ;;  %v5841_v11 = vperm.slane %v5780_v60, 3  ;;  %v4410_v51 = vor.u32 %v4586_v6, %v4409_v0 }
 0x3aa   :  { %3533 = vst [vmem:[#allocation13 + $0x240] sm:$0xff] %v4745_v15  ;;  %v4179_v15 = vld [vmem:[#allocation10 + $0x1b4] sm:$0xf0] }
 0x3ab   :  { %4748 = vtanh.f32 %v2473_v19  ;;  %2425 = vmatmul.bf16.gmra.mxu2 %v5616_v61  ;;  %3148 = vmatpush.bf16.msra.mxu3 %v4410_v51 }
 0x3ac   :  { %v2253_v58 = vpop.f32.mrf.mxu0 }
 0x3ad   :  { %v2254_v12 = vadd.f32 %v2253_v58, %v5703_v54  ;;  %v2342_v13 = vpop.f32.mrf.mxu1  ;;  %2514 = vmatmul.bf16.gmra.mxu3 %v5692_v18  ;;  %v4582_v58 = vld [vmem:[#allocation10 + $0x35c] sm:$0xf] }
 0x3ae   :  { %v2386_v32 = vpop.f32.mrf.mxu2 }
 0x3af   :  { %v4747_v49 = vpop.eup %4746  ;;  %v2343_v1 = vadd.f32 %v2342_v13, %v2254_v12  ;;  %v2387_v2 = vadd.f32 %v2386_v32, %v5783_v39  ;;  %2568 = vmatmul.bf16.gmra.mxu0 %v5532_v25  ;;  %v4403_v12 = vld [vmem:[#allocation10 + $0x374] sm:$0xf0] }
 0x3b0   :  { %3665 = vst [vmem:[#allocation13 + $0x660] sm:$0xff] %v4747_v49  ;;  %2657 = vmatmul.bf16.gmra.mxu1 %v5613_v36  ;;  %v2475_v27 = vpop.f32.mrf.mxu3  ;;  %v4406_v32 = vor.u32 %v4582_v58, %v4403_v12 }
 0x3b1   :  { %v4749_v46 = vpop.eup %4748  ;;  %4750 = vtanh.f32 %v2343_v1  ;;  %v2476_v55 = vadd.f32 %v2475_v27, %v2387_v2 }
 0x3b2   :  { %3540 = vst [vmem:[#allocation13 + $0x278] sm:$0xff] %v4749_v46  ;;  %2970 = vmatpush.bf16.msra.mxu1 %v4406_v32  ;;  %v4157_v32 = vld [vmem:[#allocation10 + $0x168] sm:$0xf] }
 0x3b3   :  { %4752 = vtanh.f32 %v2476_v55 }
 0x3b4   :  { %v2255_v16 = vpop.f32.mrf.mxu0 }
 0x3b5   :  { %v2256_v17 = vadd.f32 %v2255_v16, %v5703_v54  ;;  %v2344_v41 = vpop.f32.mrf.mxu1  ;;  %v4526_v54 = vld [vmem:[#allocation10 + $0x19c] sm:$0xf] }
 0x3b6   :  { %v2388_v57 = vpop.f32.mrf.mxu2  ;;  %v4182_v19 = vor.u32 %v4526_v54, %v4179_v15 }
 0x3b7   :  { %v4751_v53 = vpop.eup %4750  ;;  %v2345_v42 = vadd.f32 %v2344_v41, %v2256_v17  ;;  %v2389_v38 = vadd.f32 %v2388_v57, %v5783_v39 }
 0x3b8   :  { %3672 = vst [vmem:[#allocation13 + $0x698] sm:$0xff] %v4751_v53  ;;  %v2477_v43 = vpop.f32.mrf.mxu3  ;;  %2881 = vmatpush.bf16.msra.mxu0 %v4182_v19 }
 0x3b9   :  { %v4753_v21 = vpop.eup %4752  ;;  %4754 = vtanh.f32 %v2345_v42  ;;  %v2478_v4 = vadd.f32 %v2477_v43, %v2389_v38 }
 0x3ba   :  { %3547 = vst [vmem:[#allocation13 + $0x2b0] sm:$0xff] %v4753_v21 }
 0x3bb   :  { %4756 = vtanh.f32 %v2478_v4  ;;  %2430 = vmatmul.bf16.gmra.mxu2 %v5633_v22 }
 0x3bc   :  { %v2534_v13 = vpop.f32.mrf.mxu0 }
 0x3bd   :  { %v2535_v49 = vadd.f32 %v2534_v13, %v5841_v11  ;;  %v2623_v1 = vpop.f32.mrf.mxu1  ;;  %2519 = vmatmul.bf16.gmra.mxu3 %v5705_v5 }
 0x3be   :  { %v2391_v60 = vpop.f32.mrf.mxu2 }
 0x3bf   :  { %v4755_v2 = vpop.eup %4754  ;;  %v2624_v27 = vadd.f32 %v2623_v1, %v2535_v49  ;;  %v2392_v46 = vadd.f32 %v2391_v60, %v5783_v39  ;;  %2573 = vmatmul.bf16.gmra.mxu0 %v5544_v10  ;;  %v4523_v49 = vld [vmem:[#allocation10 + $0x180] sm:$0xf0] }
 0x3c0   :  { %3679 = vst [vmem:[#allocation13 + $0x6d0] sm:$0xff] %v4755_v2  ;;  %2662 = vmatmul.bf16.gmra.mxu1 %v5627_v3  ;;  %v2480_v55 = vpop.f32.mrf.mxu3  ;;  %v4158_v1 = vor.u32 %v4523_v49, %v4157_v32 }
 0x3c1   :  { %v4757_v7 = vpop.eup %4756  ;;  %4758 = vtanh.f32 %v2624_v27  ;;  %v2481_v48 = vadd.f32 %v2480_v55, %v2392_v46 }
 0x3c2   :  { %3554 = vst [vmem:[#allocation13 + $0x2e8] sm:$0xff] %v4757_v7  ;;  %3060 = vmatpush.bf16.msra.mxu2 %v4158_v1 }
 0x3c3   :  { %4760 = vtanh.f32 %v2481_v48 }
 0x3c4   :  { %v2536_v23 = vpop.f32.mrf.mxu0 }
 0x3c5   :  { %v2537_v16 = vadd.f32 %v2536_v23, %v5841_v11  ;;  %v2625_v17 = vpop.f32.mrf.mxu1 }
 0x3c6   :  { %v2393_v41 = vpop.f32.mrf.mxu2 }
 0x3c7   :  { %v4759_v57 = vpop.eup %4758  ;;  %v2626_v53 = vadd.f32 %v2625_v17, %v2537_v16  ;;  %v2394_v42 = vadd.f32 %v2393_v41, %v5783_v39  ;;  %v4381_v16 = vld [vmem:[#allocation10 + $0x328] sm:$0xf]  ;;  %v4579_v17 = vld [vmem:[#allocation10 + $0x340] sm:$0xf0] }
 0x3c8   :  { %3464 = vst [vmem:[#allocation13 + $0x18] sm:$0xff] %v4759_v57  ;;  %v2482_v38 = vpop.f32.mrf.mxu3 }
 0x3c9   :  { %v4761_v43 = vpop.eup %4760  ;;  %4762 = vtanh.f32 %v2626_v53  ;;  %v2483_v0 = vadd.f32 %v2482_v38, %v2394_v42  ;;  %v4382_v53 = vor.u32 %v4579_v17, %v4381_v16  ;;  %v4519_v42 = vld [vmem:[#allocation10 + $0x164] sm:$0xf]  ;;  %v4151_v38 = vld [vmem:[#allocation10 + $0x17c] sm:$0xf0] }
 0x3ca   :  { %3561 = vst [vmem:[#allocation13 + $0x320] sm:$0xff] %v4761_v43  ;;  %v4154_v43 = vor.u32 %v4519_v42, %v4151_v38 }
 0x3cb   :  { %4764 = vtanh.f32 %v2483_v0  ;;  %2711 = vmatmul.bf16.vlgmr.msrb.gmra.mxu2 %v5422_v62  ;;  %3149 = vmatpush.bf16.msra.mxu3 %v4382_v53  ;;  %v4575_v0 = vld [vmem:[#allocation10 + $0x324] sm:$0xf] }
 0x3cc   :  { %v2539_v6 = vpop.f32.mrf.mxu0  ;;  %2882 = vmatpush.bf16.msra.mxu0 %v4154_v43 }
 0x3cd   :  { %v2540_v21 = vadd.f32 %v2539_v6, %v5841_v11  ;;  %v2628_v4 = vpop.f32.mrf.mxu1  ;;  %2800 = vmatmul.bf16.vlgmr.msrb.gmra.mxu3 %v5529_v35  ;;  %v4375_v6 = vld [vmem:[#allocation10 + $0x33c] sm:$0xf0] }
 0x3ce   :  { %v2396_v51 = vpop.f32.mrf.mxu2 }
 0x3cf   :  { %v4763_v54 = vpop.eup %4762  ;;  %v2629_v15 = vadd.f32 %v2628_v4, %v2540_v21  ;;  %v2397_v19 = vadd.f32 %v2396_v51, %v5783_v39  ;;  %2578 = vmatmul.bf16.gmra.mxu0 %v5556_v45  ;;  %v4378_v4 = vor.u32 %v4575_v0, %v4375_v6 }
 0x3d0   :  { %3471 = vst [vmem:[#allocation13 + $0x50] sm:$0xff] %v4763_v54  ;;  %2667 = vmatmul.bf16.gmra.mxu1 %v5642_v24  ;;  %v2485_v58 = vpop.f32.mrf.mxu3 }
 0x3d1   :  { %v4765_v12 = vpop.eup %4764  ;;  %4766 = vtanh.f32 %v2629_v15  ;;  %v2486_v13 = vadd.f32 %v2485_v58, %v2397_v19  ;;  %2971 = vmatpush.bf16.msra.mxu1 %v4378_v4  ;;  %v4129_v4 = vld [vmem:[#allocation10 + $0x130] sm:$0xf] }
 0x3d2   :  { %3568 = vst [vmem:[#allocation13 + $0x358] sm:$0xff] %v4765_v12 }
 0x3d3   :  { %4768 = vtanh.f32 %v2486_v13 }
 0x3d4   :  { %v2541_v60 = vpop.f32.mrf.mxu0 }
 0x3d5   :  { %v2542_v2 = vadd.f32 %v2541_v60, %v5841_v11  ;;  %v2630_v27 = vpop.f32.mrf.mxu1 }
 0x3d6   :  { %v2398_v46 = vpop.f32.mrf.mxu2 }
 0x3d7   :  { %v4767_v55 = vpop.eup %4766  ;;  %v2631_v7 = vadd.f32 %v2630_v27, %v2542_v2  ;;  %v2399_v48 = vadd.f32 %v2398_v46, %v5783_v39 }
 0x3d8   :  { %3478 = vst [vmem:[#allocation13 + $0x88] sm:$0xff] %v4767_v55  ;;  %v2487_v23 = vpop.f32.mrf.mxu3 }
 0x3d9   :  { %v4769_v41 = vpop.eup %4768  ;;  %4770 = vtanh.f32 %v2631_v7  ;;  %v2488_v57 = vadd.f32 %v2487_v23, %v2399_v48 }
 0x3da   :  { %3575 = vst [vmem:[#allocation13 + $0x390] sm:$0xff] %v4769_v41 }
 0x3db   :  { %4772 = vtanh.f32 %v2488_v57  ;;  %2716 = vmatmul.bf16.gmra.mxu2 %v5438_v31 }
 0x3dc   :  { %v2544_v21 = vpop.f32.mrf.mxu0 }
 0x3dd   :  { %v2545_v51 = vadd.f32 %v2544_v21, %v5841_v11  ;;  %v2633_v54 = vpop.f32.mrf.mxu1  ;;  %2805 = vmatmul.bf16.gmra.mxu3 %v5541_v8 }
 0x3de   :  { %v2401_v15 = vpop.f32.mrf.mxu2 }
 0x3df   :  { %v4771_v19 = vpop.eup %4770  ;;  %v2634_v58 = vadd.f32 %v2633_v54, %v2545_v51  ;;  %v2402_v12 = vadd.f32 %v2401_v15, %v5783_v39  ;;  %2583 = vmatmul.bf16.gmra.mxu0 %v5568_v33  ;;  %v4516_v51 = vld [vmem:[#allocation10 + $0x148] sm:$0xf0] }
 0x3e0   :  { %3485 = vst [vmem:[#allocation13 + $0xc0] sm:$0xff] %v4771_v19  ;;  %2672 = vmatmul.bf16.gmra.mxu1 %v5652_v56  ;;  %v2490_v13 = vpop.f32.mrf.mxu3  ;;  %v4130_v54 = vor.u32 %v4516_v51, %v4129_v4 }
 0x3e1   :  { %v4773_v32 = vpop.eup %4772  ;;  %4774 = vtanh.f32 %v2634_v58  ;;  %v2491_v49 = vadd.f32 %v2490_v13, %v2402_v12 }
 0x3e2   :  { %3582 = vst [vmem:[#allocation13 + $0x3c8] sm:$0xff] %v4773_v32  ;;  %3061 = vmatpush.bf16.msra.mxu2 %v4130_v54 }
 0x3e3   :  { %4776 = vtanh.f32 %v2491_v49 }
 0x3e4   :  { %v2546_v1 = vpop.f32.mrf.mxu0 }
 0x3e5   :  { %v2547_v60 = vadd.f32 %v2546_v1, %v5841_v11  ;;  %v2635_v2 = vpop.f32.mrf.mxu1 }
 0x3e6   :  { %v2403_v27 = vpop.f32.mrf.mxu2 }
 0x3e7   :  { %v4775_v46 = vpop.eup %4774  ;;  %v2636_v55 = vadd.f32 %v2635_v2, %v2547_v60  ;;  %v2404_v7 = vadd.f32 %v2403_v27, %v5783_v39  ;;  %v4353_v60 = vld [vmem:[#allocation10 + $0x2f0] sm:$0xf]  ;;  %v4572_v2 = vld [vmem:[#allocation10 + $0x308] sm:$0xf0] }
 0x3e8   :  { %3492 = vst [vmem:[#allocation13 + $0xf8] sm:$0xff] %v4775_v46  ;;  %v2492_v48 = vpop.f32.mrf.mxu3 }
 0x3e9   :  { %v4777_v23 = vpop.eup %4776  ;;  %4778 = vtanh.f32 %v2636_v55  ;;  %v2493_v16 = vadd.f32 %v2492_v48, %v2404_v7  ;;  %v4354_v55 = vor.u32 %v4572_v2, %v4353_v60  ;;  %v4512_v7 = vld [vmem:[#allocation10 + $0x12c] sm:$0xf]  ;;  %v4123_v48 = vld [vmem:[#allocation10 + $0x144] sm:$0xf0]  ;;  %v4505_v2 = vld [vmem:[#allocation10 + $0xf4] sm:$0xf] }
 0x3ea   :  { %3589 = vst [vmem:[#allocation13 + $0x400] sm:$0xff] %v4777_v23  ;;  %v4126_v23 = vor.u32 %v4512_v7, %v4123_v48  ;;  %v4319_v7 = vld [vmem:[#allocation10 + $0x2cc] sm:$0xf0] }
 0x3eb   :  { %4780 = vtanh.f32 %v2493_v16  ;;  %2721 = vmatmul.bf16.gmra.mxu2 %v5454_v9  ;;  %3150 = vmatpush.bf16.msra.mxu3 %v4354_v55  ;;  %v4568_v16 = vld [vmem:[#allocation10 + $0x2ec] sm:$0xf]  ;;  %v4561_v55 = vld [vmem:[#allocation10 + $0x2b4] sm:$0xf] }
 0x3ec   :  { %v2549_v17 = vpop.f32.mrf.mxu0  ;;  %2883 = vmatpush.bf16.msra.mxu0 %v4126_v23  ;;  %v4322_v23 = vor.u32 %v4561_v55, %v4319_v7 }
 0x3ed   :  { %v2550_v41 = vadd.f32 %v2549_v17, %v5841_v11  ;;  %v2638_v57 = vpop.f32.mrf.mxu1  ;;  %2810 = vmatmul.bf16.gmra.mxu3 %v5553_v26  ;;  %v4347_v17 = vld [vmem:[#allocation10 + $0x304] sm:$0xf0] }
 0x3ee   :  { %v2406_v53 = vpop.f32.mrf.mxu2 }
 0x3ef   :  { %v4779_v42 = vpop.eup %4778  ;;  %v2639_v38 = vadd.f32 %v2638_v57, %v2550_v41  ;;  %v2407_v43 = vadd.f32 %v2406_v53, %v5783_v39  ;;  %2588 = vmatmul.bf16.gmra.mxu0 %v5580_v34  ;;  %v4350_v57 = vor.u32 %v4568_v16, %v4347_v17 }
 0x3f0   :  { %3499 = vst [vmem:[#allocation13 + $0x130] sm:$0xff] %v4779_v42  ;;  %2677 = vmatmul.bf16.gmra.mxu1 %v5662_v20  ;;  %v2495_v0 = vpop.f32.mrf.mxu3 }
 0x3f1   :  { %v4781_v6 = vpop.eup %4780  ;;  %4782 = vtanh.f32 %v2639_v38  ;;  %v2496_v21 = vadd.f32 %v2495_v0, %v2407_v43  ;;  %2972 = vmatpush.bf16.msra.mxu1 %v4350_v57  ;;  %v4498_v57 = vld [vmem:[#allocation10 + $0xbc] sm:$0xf] }
 0x3f2   :  { %3596 = vst [vmem:[#allocation13 + $0x438] sm:$0xff] %v4781_v6 }
 0x3f3   :  { %4784 = vtanh.f32 %v2496_v21 }
 0x3f4   :  { %v2551_v15 = vpop.f32.mrf.mxu0 }
 0x3f5   :  { %v2552_v19 = vadd.f32 %v2551_v15, %v5841_v11  ;;  %v2640_v58 = vpop.f32.mrf.mxu1  ;;  %2973 = vmatpush.bf16.msra.mxu1 %v4322_v23  ;;  %v4011_v23 = vld [vmem:[#allocation10 + $0x64] sm:$0xf0] }
 0x3f6   :  { %v2408_v12 = vpop.f32.mrf.mxu2 }
 0x3f7   :  { %v4783_v13 = vpop.eup %4782  ;;  %v2641_v32 = vadd.f32 %v2640_v58, %v2552_v19  ;;  %v2409_v49 = vadd.f32 %v2408_v12, %v5783_v39 }
 0x3f8   :  { %3506 = vst [vmem:[#allocation13 + $0x168] sm:$0xff] %v4783_v13  ;;  %v2497_v1 = vpop.f32.mrf.mxu3 }
 0x3f9   :  { %v4785_v27 = vpop.eup %4784  ;;  %4786 = vtanh.f32 %v2641_v32  ;;  %v2498_v46 = vadd.f32 %v2497_v1, %v2409_v49 }
 0x3fa   :  { %3603 = vst [vmem:[#allocation13 + $0x470] sm:$0xff] %v4785_v27  ;;  %v4095_v27 = vld [vmem:[#allocation10 + $0x10c] sm:$0xf0] }
 0x3fb   :  { %4788 = vtanh.f32 %v2498_v46  ;;  %2726 = vmatmul.bf16.gmra.mxu2 %v5470_v47  ;;  %v4098_v46 = vor.u32 %v4505_v2, %v4095_v27  ;;  %v4263_v2 = vld [vmem:[#allocation10 + $0x25c] sm:$0xf0] }
 0x3fc   :  { %v2554_v41 = vpop.f32.mrf.mxu0 }
 0x3fd   :  { %v2555_v53 = vadd.f32 %v2554_v41, %v5841_v11  ;;  %v2643_v42 = vpop.f32.mrf.mxu1  ;;  %2815 = vmatmul.bf16.gmra.mxu3 %v5565_v30  ;;  %2884 = vmatpush.bf16.msra.mxu0 %v4098_v46 }
 0x3fe   :  { %v2411_v38 = vpop.f32.mrf.mxu2 }
 0x3ff   :  { %v4787_v43 = vpop.eup %4786  ;;  %v2644_v0 = vadd.f32 %v2643_v42, %v2555_v53  ;;  %v2412_v6 = vadd.f32 %v2411_v38, %v5783_v39  ;;  %2593 = vmatmul.bf16.gmra.mxu0 %v5592_v29  ;;  %v4067_v53 = vld [vmem:[#allocation10 + $0xd4] sm:$0xf0]  ;;  %v4554_v42 = vld [vmem:[#allocation10 + $0x27c] sm:$0xf] }
 0x400   :  { %3513 = vst [vmem:[#allocation13 + $0x1a0] sm:$0xff] %v4787_v43  ;;  %2682 = vmatmul.bf16.gmra.mxu1 %v5672_v50  ;;  %v2500_v21 = vpop.f32.mrf.mxu3 }
 0x401   :  { %v4789_v4 = vpop.eup %4788  ;;  %4790 = vtanh.f32 %v2644_v0  ;;  %v2501_v51 = vadd.f32 %v2500_v21, %v2412_v6  ;;  %v4070_v6 = vor.u32 %v4498_v57, %v4067_v53  ;;  %v4291_v21 = vld [vmem:[#allocation10 + $0x294] sm:$0xf0] }
 0x402   :  { %3610 = vst [vmem:[#allocation13 + $0x4a8] sm:$0xff] %v4789_v4 }
 0x403   :  { %4792 = vtanh.f32 %v2501_v51  ;;  %v4294_v51 = vor.u32 %v4554_v42, %v4291_v21  ;;  %2885 = vmatpush.bf16.msra.mxu0 %v4070_v6  ;;  %v4235_v42 = vld [vmem:[#allocation10 + $0x224] sm:$0xf0] }
 0x404   :  { %v2556_v54 = vpop.f32.mrf.mxu0 }
 0x405   :  { %v2557_v15 = vadd.f32 %v2556_v54, %v5841_v11  ;;  %v2645_v19 = vpop.f32.mrf.mxu1  ;;  %2974 = vmatpush.bf16.msra.mxu1 %v4294_v51 }
 0x406   :  { %v2413_v58 = vpop.f32.mrf.mxu2 }
 0x407   :  { %v4791_v12 = vpop.eup %4790  ;;  %v2646_v13 = vadd.f32 %v2645_v19, %v2557_v15  ;;  %v2414_v32 = vadd.f32 %v2413_v58, %v5783_v39  ;;  %v4101_v19 = vld [vmem:[#allocation10 + $0xf8] sm:$0xf]  ;;  %v4509_v58 = vld [vmem:[#allocation10 + $0x110] sm:$0xf0] }
 0x408   :  { %3520 = vst [vmem:[#allocation13 + $0x1d8] sm:$0xff] %v4791_v12  ;;  %v2502_v49 = vpop.f32.mrf.mxu3  ;;  %v4102_v12 = vor.u32 %v4509_v58, %v4101_v19  ;;  %v4533_v58 = vld [vmem:[#allocation10 + $0x1d4] sm:$0xf] }
 0x409   :  { %v4793_v1 = vpop.eup %4792  ;;  %4794 = vtanh.f32 %v2646_v13  ;;  %v2503_v60 = vadd.f32 %v2502_v49, %v2414_v32  ;;  %v4491_v13 = vld [vmem:[#allocation10 + $0x84] sm:$0xf]  ;;  %v4039_v32 = vld [vmem:[#allocation10 + $0x9c] sm:$0xf0] }
 0x40a   :  { %3617 = vst [vmem:[#allocation13 + $0x4e0] sm:$0xff] %v4793_v1  ;;  %v4547_v49 = vld [vmem:[#allocation10 + $0x244] sm:$0xf]  ;;  %3062 = vmatpush.bf16.msra.mxu2 %v4102_v12  ;;  %v4207_v12 = vld [vmem:[#allocation10 + $0x1ec] sm:$0xf0] }
 0x40b   :  { %4796 = vtanh.f32 %v2503_v60  ;;  %2731 = vmatmul.bf16.gmra.mxu2 %v5486_v28  ;;  %v4042_v60 = vor.u32 %v4491_v13, %v4039_v32  ;;  %v4266_v55 = vor.u32 %v4547_v49, %v4263_v2 }
 0x40c   :  { %v2559_v48 = vpop.f32.mrf.mxu0 }
 0x40d   :  { %v2560_v16 = vadd.f32 %v2559_v48, %v5841_v11  ;;  %v2648_v17 = vpop.f32.mrf.mxu1  ;;  %2820 = vmatmul.bf16.gmra.mxu3 %v5577_v63  ;;  %2886 = vmatpush.bf16.msra.mxu0 %v4042_v60  ;;  %v4484_v48 = vld [vmem:[#allocation10 + $0x4c] sm:$0xf] }
 0x40e   :  { %v2416_v41 = vpop.f32.mrf.mxu2  ;;  %2975 = vmatpush.bf16.msra.mxu1 %v4266_v55  ;;  %v4014_v53 = vor.u32 %v4484_v48, %v4011_v23 }
 0x40f   :  { %v4795_v38 = vpop.eup %4794  ;;  %v2649_v43 = vadd.f32 %v2648_v17, %v2560_v16  ;;  %v2417_v0 = vadd.f32 %v2416_v41, %v5783_v39  ;;  %2598 = vmatmul.bf16.gmra.mxu0 %v5604_v37  ;;  %v4540_v16 = vld [vmem:[#allocation10 + $0x20c] sm:$0xf] }
 0x410   :  { %3527 = vst [vmem:[#allocation13 + $0x210] sm:$0xff] %v4795_v38  ;;  %2687 = vmatmul.bf16.gmra.mxu1 %v5682_v44  ;;  %v2505_v4 = vpop.f32.mrf.mxu3  ;;  %v4238_v6 = vor.u32 %v4540_v16, %v4235_v42 }
 0x411   :  { %v4797_v54 = vpop.eup %4796  ;;  %4798 = vtanh.f32 %v2649_v43  ;;  %v2506_v15 = vadd.f32 %v2505_v4, %v2417_v0  ;;  %v4325_v43 = vld [vmem:[#allocation10 + $0x2b8] sm:$0xf]  ;;  %v4565_v0 = vld [vmem:[#allocation10 + $0x2d0] sm:$0xf0]  ;;  %2887 = vmatpush.bf16.msra.mxu0 %v4014_v53 }
 0x412   :  { %3624 = vst [vmem:[#allocation13 + $0x518] sm:$0xff] %v4797_v54  ;;  %v4326_v51 = vor.u32 %v4565_v0, %v4325_v43  ;;  %v4477_v54 = vld [vmem:[#allocation10 + $0x14] sm:$0xf]  ;;  %2976 = vmatpush.bf16.msra.mxu1 %v4238_v6 }
 0x413   :  { %4800 = vtanh.f32 %v2506_v15  ;;  %v3983_v15 = vld [vmem:[#allocation10 + $0x2c] sm:$0xf0] }
 0x414   :  { %v2561_v1 = vpop.f32.mrf.mxu0  ;;  %3151 = vmatpush.bf16.msra.mxu3 %v4326_v51  ;;  %v3986_v19 = vor.u32 %v4477_v54, %v3983_v15 }
 0x415   :  { %v2562_v27 = vadd.f32 %v2561_v1, %v5841_v11  ;;  %v2650_v46 = vpop.f32.mrf.mxu1  ;;  %v4210_v1 = vor.u32 %v4533_v58, %v4207_v12 }
 0x416   :  { %v2418_v7 = vpop.f32.mrf.mxu2  ;;  %2888 = vmatpush.bf16.msra.mxu0 %v3986_v19 }
 0x417   :  { %v4799_v17 = vpop.eup %4798  ;;  %v2651_v41 = vadd.f32 %v2650_v46, %v2562_v27  ;;  %v2419_v57 = vadd.f32 %v2418_v7, %v5783_v39  ;;  %2977 = vmatpush.bf16.msra.mxu1 %v4210_v1 }
 0x418   :  { %3534 = vst [vmem:[#allocation13 + $0x248] sm:$0xff] %v4799_v17  ;;  %v2507_v38 = vpop.f32.mrf.mxu3 }
 0x419   :  { %v4801_v21 = vpop.eup %4800  ;;  %4802 = vtanh.f32 %v2651_v41  ;;  %v2508_v4 = vadd.f32 %v2507_v38, %v2419_v57 }
 0x41a   :  { %3631 = vst [vmem:[#allocation13 + $0x550] sm:$0xff] %v4801_v21 }
 0x41b   :  { %4804 = vtanh.f32 %v2508_v4  ;;  %2736 = vmatmul.bf16.gmra.mxu2 %v5502_v59 }
 0x41c   :  { %v2564_v13 = vpop.f32.mrf.mxu0 }
 0x41d   :  { %v2565_v32 = vadd.f32 %v2564_v13, %v5841_v11  ;;  %v2653_v49 = vpop.f32.mrf.mxu1  ;;  %2825 = vmatmul.bf16.gmra.mxu3 %v5589_v14 }
 0x41e   :  { %v2421_v60 = vpop.f32.mrf.mxu2 }
 0x41f   :  { %v4803_v2 = vpop.eup %4802  ;;  %v2654_v27 = vadd.f32 %v2653_v49, %v2565_v32  ;;  %v2422_v46 = vadd.f32 %v2421_v60, %v5783_v39  ;;  %2603 = vmatmul.bf16.gmra.mxu0 %v5616_v61  ;;  %v4073_v32 = vld [vmem:[#allocation10 + $0xc0] sm:$0xf]  ;;  %v4502_v49 = vld [vmem:[#allocation10 + $0xd8] sm:$0xf0] }
 0x420   :  { %3541 = vst [vmem:[#allocation13 + $0x280] sm:$0xff] %v4803_v2  ;;  %2692 = vmatmul.bf16.gmra.mxu1 %v5692_v18  ;;  %v2510_v55 = vpop.f32.mrf.mxu3  ;;  %v4074_v1 = vor.u32 %v4502_v49, %v4073_v32 }
 0x421   :  { %v4805_v7 = vpop.eup %4804  ;;  %4806 = vtanh.f32 %v2654_v27  ;;  %v2511_v48 = vadd.f32 %v2510_v55, %v2422_v46 }
 0x422   :  { %3638 = vst [vmem:[#allocation13 + $0x588] sm:$0xff] %v4805_v7  ;;  %3063 = vmatpush.bf16.msra.mxu2 %v4074_v1 }
 0x423   :  { %4808 = vtanh.f32 %v2511_v48 }
 0x424   :  { %v2566_v23 = vpop.f32.mrf.mxu0 }
 0x425   :  { %v2567_v16 = vadd.f32 %v2566_v23, %v5841_v11  ;;  %v2655_v17 = vpop.f32.mrf.mxu1 }
 0x426   :  { %v2423_v41 = vpop.f32.mrf.mxu2 }
 0x427   :  { %v4807_v57 = vpop.eup %4806  ;;  %v2656_v53 = vadd.f32 %v2655_v17, %v2567_v16  ;;  %v2424_v42 = vadd.f32 %v2423_v41, %v5783_v39  ;;  %v4297_v16 = vld [vmem:[#allocation10 + $0x280] sm:$0xf]  ;;  %v4558_v17 = vld [vmem:[#allocation10 + $0x298] sm:$0xf0] }
 0x428   :  { %3548 = vst [vmem:[#allocation13 + $0x2b8] sm:$0xff] %v4807_v57  ;;  %v2512_v38 = vpop.f32.mrf.mxu3 }
 0x429   :  { %v4809_v43 = vpop.eup %4808  ;;  %4810 = vtanh.f32 %v2656_v53  ;;  %v2513_v0 = vadd.f32 %v2512_v38, %v2424_v42  ;;  %v4298_v53 = vor.u32 %v4558_v17, %v4297_v16 }
 0x42a   :  { %3645 = vst [vmem:[#allocation13 + $0x5c0] sm:$0xff] %v4809_v43 }
 0x42b   :  { %4812 = vtanh.f32 %v2513_v0  ;;  %2741 = vmatmul.bf16.gmra.mxu2 %v5518_v40  ;;  %3152 = vmatpush.bf16.msra.mxu3 %v4298_v53 }
 0x42c   :  { %v2569_v6 = vpop.f32.mrf.mxu0 }
 0x42d   :  { %v2570_v21 = vadd.f32 %v2569_v6, %v5841_v11  ;;  %v2658_v4 = vpop.f32.mrf.mxu1  ;;  %2830 = vmatmul.bf16.gmra.mxu3 %v5601_v52 }
 0x42e   :  { %v2426_v51 = vpop.f32.mrf.mxu2 }
 0x42f   :  { %v4811_v54 = vpop.eup %4810  ;;  %v2659_v15 = vadd.f32 %v2658_v4, %v2570_v21  ;;  %v2427_v19 = vadd.f32 %v2426_v51, %v5783_v39  ;;  %2608 = vmatmul.bf16.gmra.mxu0 %v5633_v22 }
 0x430   :  { %3555 = vst [vmem:[#allocation13 + $0x2f0] sm:$0xff] %v4811_v54  ;;  %2697 = vmatmul.bf16.gmra.mxu1 %v5705_v5  ;;  %v2515_v58 = vpop.f32.mrf.mxu3 }
 0x431   :  { %v4813_v12 = vpop.eup %4812  ;;  %4814 = vtanh.f32 %v2659_v15  ;;  %v2516_v13 = vadd.f32 %v2515_v58, %v2427_v19 }
 0x432   :  { %3652 = vst [vmem:[#allocation13 + $0x5f8] sm:$0xff] %v4813_v12 }
 0x433   :  { %4816 = vtanh.f32 %v2516_v13 }
 0x434   :  { %v2571_v60 = vpop.f32.mrf.mxu0 }
 0x435   :  { %v2572_v2 = vadd.f32 %v2571_v60, %v5841_v11  ;;  %v2660_v27 = vpop.f32.mrf.mxu1 }
 0x436   :  { %v2428_v46 = vpop.f32.mrf.mxu2 }
 0x437   :  { %v4815_v55 = vpop.eup %4814  ;;  %v2661_v7 = vadd.f32 %v2660_v27, %v2572_v2  ;;  %v2429_v48 = vadd.f32 %v2428_v46, %v5783_v39  ;;  %v5916_v46 = vld [vmem:[#allocation11] sm:$0xff] }
 0x438   :  { %3562 = vst [vmem:[#allocation13 + $0x328] sm:$0xff] %v4815_v55  ;;  %v2517_v23 = vpop.f32.mrf.mxu3  ;;  %v5919_v55 = vperm.slane %v5916_v46, 4 }
 0x439   :  { %v4817_v41 = vpop.eup %4816  ;;  %4818 = vtanh.f32 %v2661_v7  ;;  %v2518_v57 = vadd.f32 %v2517_v23, %v2429_v48 }
 0x43a   :  { %3659 = vst [vmem:[#allocation13 + $0x630] sm:$0xff] %v4817_v41 }
 0x43b   :  { %4820 = vtanh.f32 %v2518_v57  ;;  %2746 = vmatmul.bf16.gmra.mxu2 %v5532_v25 }
 0x43c   :  { %v2574_v42 = vpop.f32.mrf.mxu0 }
 0x43d   :  { %v2575_v38 = vadd.f32 %v2574_v42, %v5841_v11  ;;  %v2663_v43 = vpop.f32.mrf.mxu1  ;;  %2835 = vmatmul.bf16.gmra.mxu3 %v5613_v36 }
 0x43e   :  { %v2431_v0 = vpop.f32.mrf.mxu2 }
 0x43f   :  { %v4819_v6 = vpop.eup %4818  ;;  %v2664_v21 = vadd.f32 %v2663_v43, %v2575_v38  ;;  %v2432_v4 = vadd.f32 %v2431_v0, %v5783_v39  ;;  %2889 = vmatmul.bf16.vlgmr.msra.gmra.mxu0 %v5422_v62  ;;  %v4045_v38 = vld [vmem:[#allocation10 + $0x88] sm:$0xf]  ;;  %v4495_v43 = vld [vmem:[#allocation10 + $0xa0] sm:$0xf0] }
 0x440   :  { %3569 = vst [vmem:[#allocation13 + $0x360] sm:$0xff] %v4819_v6  ;;  %2978 = vmatmul.bf16.vlgmr.msra.gmra.mxu1 %v5529_v35  ;;  %v2520_v51 = vpop.f32.mrf.mxu3  ;;  %v4046_v0 = vor.u32 %v4495_v43, %v4045_v38 }
 0x441   :  { %v4821_v54 = vpop.eup %4820  ;;  %4822 = vtanh.f32 %v2664_v21  ;;  %v2521_v15 = vadd.f32 %v2520_v51, %v2432_v4 }
 0x442   :  { %3666 = vst [vmem:[#allocation13 + $0x668] sm:$0xff] %v4821_v54  ;;  %3064 = vmatpush.bf16.msra.mxu2 %v4046_v0 }
 0x443   :  { %4824 = vtanh.f32 %v2521_v15 }
 0x444   :  { %v2576_v19 = vpop.f32.mrf.mxu0 }
 0x445   :  { %v2577_v58 = vadd.f32 %v2576_v19, %v5841_v11  ;;  %v2665_v12 = vpop.f32.mrf.mxu1 }
 0x446   :  { %v2433_v13 = vpop.f32.mrf.mxu2 }
 0x447   :  { %v4823_v32 = vpop.eup %4822  ;;  %v2666_v49 = vadd.f32 %v2665_v12, %v2577_v58  ;;  %v2434_v1 = vadd.f32 %v2433_v13, %v5783_v39  ;;  %v4269_v12 = vld [vmem:[#allocation10 + $0x248] sm:$0xf]  ;;  %v4551_v13 = vld [vmem:[#allocation10 + $0x260] sm:$0xf0] }
 0x448   :  { %3576 = vst [vmem:[#allocation13 + $0x398] sm:$0xff] %v4823_v32  ;;  %v2522_v60 = vpop.f32.mrf.mxu3 }
 0x449   :  { %v4825_v2 = vpop.eup %4824  ;;  %4826 = vtanh.f32 %v2666_v49  ;;  %v2523_v27 = vadd.f32 %v2522_v60, %v2434_v1  ;;  %v4270_v1 = vor.u32 %v4551_v13, %v4269_v12 }
 0x44a   :  { %3673 = vst [vmem:[#allocation13 + $0x6a0] sm:$0xff] %v4825_v2 }
 0x44b   :  { %4828 = vtanh.f32 %v2523_v27  ;;  %2751 = vmatmul.bf16.gmra.mxu2 %v5544_v10  ;;  %3153 = vmatpush.bf16.msra.mxu3 %v4270_v1 }
 0x44c   :  { %v2579_v7 = vpop.f32.mrf.mxu0 }
 0x44d   :  { %v2580_v48 = vadd.f32 %v2579_v7, %v5841_v11  ;;  %v2668_v23 = vpop.f32.mrf.mxu1  ;;  %2840 = vmatmul.bf16.gmra.mxu3 %v5627_v3 }
 0x44e   :  { %v2712_v39 = vpop.f32.mrf.mxu2 }
 0x44f   :  { %v4827_v16 = vpop.eup %4826  ;;  %v2669_v17 = vadd.f32 %v2668_v23, %v2580_v48  ;;  %v2713_v41 = vadd.f32 %v2712_v39, %v5919_v55  ;;  %2894 = vmatmul.bf16.gmra.mxu0 %v5438_v31 }
 0x450   :  { %3583 = vst [vmem:[#allocation13 + $0x3d0] sm:$0xff] %v4827_v16  ;;  %2983 = vmatmul.bf16.gmra.mxu1 %v5541_v8  ;;  %v2801_v57 = vpop.f32.mrf.mxu3 }
 0x451   :  { %v4829_v53 = vpop.eup %4828  ;;  %4830 = vtanh.f32 %v2669_v17  ;;  %v2802_v42 = vadd.f32 %v2801_v57, %v2713_v41 }
 0x452   :  { %3680 = vst [vmem:[#allocation13 + $0x6d8] sm:$0xff] %v4829_v53 }
 0x453   :  { %4832 = vtanh.f32 %v2802_v42 }
 0x454   :  { %v2581_v6 = vpop.f32.mrf.mxu0 }
 0x455   :  { %v2582_v21 = vadd.f32 %v2581_v6, %v5841_v11  ;;  %v2670_v4 = vpop.f32.mrf.mxu1 }
 0x456   :  { %v2714_v51 = vpop.f32.mrf.mxu2 }
 0x457   :  { %v4831_v54 = vpop.eup %4830  ;;  %v2671_v15 = vadd.f32 %v2670_v4, %v2582_v21  ;;  %v2715_v19 = vadd.f32 %v2714_v51, %v5919_v55 }
 0x458   :  { %3590 = vst [vmem:[#allocation13 + $0x408] sm:$0xff] %v4831_v54  ;;  %v2803_v58 = vpop.f32.mrf.mxu3 }
 0x459   :  { %v4833_v32 = vpop.eup %4832  ;;  %4834 = vtanh.f32 %v2671_v15  ;;  %v2804_v49 = vadd.f32 %v2803_v58, %v2715_v19 }
 0x45a   :  { %3465 = vst [vmem:[#allocation13 + $0x20] sm:$0xff] %v4833_v32 }
 0x45b   :  { %4836 = vtanh.f32 %v2804_v49  ;;  %2756 = vmatmul.bf16.gmra.mxu2 %v5556_v45 }
 0x45c   :  { %v2584_v60 = vpop.f32.mrf.mxu0 }
 0x45d   :  { %v2585_v2 = vadd.f32 %v2584_v60, %v5841_v11  ;;  %v2673_v27 = vpop.f32.mrf.mxu1  ;;  %2845 = vmatmul.bf16.gmra.mxu3 %v5642_v24 }
 0x45e   :  { %v2717_v7 = vpop.f32.mrf.mxu2 }
 0x45f   :  { %v4835_v48 = vpop.eup %4834  ;;  %v2674_v23 = vadd.f32 %v2673_v27, %v2585_v2  ;;  %v2718_v39 = vadd.f32 %v2717_v7, %v5919_v55  ;;  %2899 = vmatmul.bf16.gmra.mxu0 %v5454_v9  ;;  %v4017_v2 = vld [vmem:[#allocation10 + $0x50] sm:$0xf]  ;;  %v4488_v27 = vld [vmem:[#allocation10 + $0x68] sm:$0xf0] }
 0x460   :  { %3597 = vst [vmem:[#allocation13 + $0x440] sm:$0xff] %v4835_v48  ;;  %2988 = vmatmul.bf16.gmra.mxu1 %v5553_v26  ;;  %v2806_v16 = vpop.f32.mrf.mxu3  ;;  %v4018_v7 = vor.u32 %v4488_v27, %v4017_v2 }
 0x461   :  { %v4837_v17 = vpop.eup %4836  ;;  %4838 = vtanh.f32 %v2674_v23  ;;  %v2807_v41 = vadd.f32 %v2806_v16, %v2718_v39 }
 0x462   :  { %3472 = vst [vmem:[#allocation13 + $0x58] sm:$0xff] %v4837_v17  ;;  %3065 = vmatpush.bf16.msra.mxu2 %v4018_v7 }
 0x463   :  { %4840 = vtanh.f32 %v2807_v41 }
 0x464   :  { %v2586_v57 = vpop.f32.mrf.mxu0 }
 0x465   :  { %v2587_v53 = vadd.f32 %v2586_v57, %v5841_v11  ;;  %v2675_v42 = vpop.f32.mrf.mxu1 }
 0x466   :  { %v2719_v38 = vpop.f32.mrf.mxu2 }
 0x467   :  { %v4839_v43 = vpop.eup %4838  ;;  %v2676_v0 = vadd.f32 %v2675_v42, %v2587_v53  ;;  %v2720_v6 = vadd.f32 %v2719_v38, %v5919_v55  ;;  %v4241_v42 = vld [vmem:[#allocation10 + $0x210] sm:$0xf]  ;;  %v4544_v38 = vld [vmem:[#allocation10 + $0x228] sm:$0xf0] }
 0x468   :  { %3604 = vst [vmem:[#allocation13 + $0x478] sm:$0xff] %v4839_v43  ;;  %v2808_v21 = vpop.f32.mrf.mxu3 }
 0x469   :  { %v4841_v4 = vpop.eup %4840  ;;  %4842 = vtanh.f32 %v2676_v0  ;;  %v2809_v51 = vadd.f32 %v2808_v21, %v2720_v6  ;;  %v4242_v6 = vor.u32 %v4544_v38, %v4241_v42 }
 0x46a   :  { %3479 = vst [vmem:[#allocation13 + $0x90] sm:$0xff] %v4841_v4 }
 0x46b   :  { %4844 = vtanh.f32 %v2809_v51  ;;  %2761 = vmatmul.bf16.gmra.mxu2 %v5568_v33  ;;  %3154 = vmatpush.bf16.msra.mxu3 %v4242_v6 }
 0x46c   :  { %v2589_v54 = vpop.f32.mrf.mxu0 }
 0x46d   :  { %v2590_v15 = vadd.f32 %v2589_v54, %v5841_v11  ;;  %v2678_v19 = vpop.f32.mrf.mxu1  ;;  %2850 = vmatmul.bf16.gmra.mxu3 %v5652_v56 }
 0x46e   :  { %v2722_v58 = vpop.f32.mrf.mxu2 }
 0x46f   :  { %v4843_v12 = vpop.eup %4842  ;;  %v2679_v13 = vadd.f32 %v2678_v19, %v2590_v15  ;;  %v2723_v32 = vadd.f32 %v2722_v58, %v5919_v55  ;;  %2904 = vmatmul.bf16.gmra.mxu0 %v5470_v47 }
 0x470   :  { %3611 = vst [vmem:[#allocation13 + $0x4b0] sm:$0xff] %v4843_v12  ;;  %2993 = vmatmul.bf16.gmra.mxu1 %v5565_v30  ;;  %v2811_v49 = vpop.f32.mrf.mxu3 }
 0x471   :  { %v4845_v1 = vpop.eup %4844  ;;  %4846 = vtanh.f32 %v2679_v13  ;;  %v2812_v60 = vadd.f32 %v2811_v49, %v2723_v32 }
 0x472   :  { %3486 = vst [vmem:[#allocation13 + $0xc8] sm:$0xff] %v4845_v1 }
 0x473   :  { %4848 = vtanh.f32 %v2812_v60 }
 0x474   :  { %v2591_v48 = vpop.f32.mrf.mxu0 }
 0x475   :  { %v2592_v23 = vadd.f32 %v2591_v48, %v5841_v11  ;;  %v2680_v39 = vpop.f32.mrf.mxu1 }
 0x476   :  { %v2724_v16 = vpop.f32.mrf.mxu2 }
 0x477   :  { %v4847_v17 = vpop.eup %4846  ;;  %v2681_v41 = vadd.f32 %v2680_v39, %v2592_v23  ;;  %v2725_v57 = vadd.f32 %v2724_v16, %v5919_v55 }
 0x478   :  { %3618 = vst [vmem:[#allocation13 + $0x4e8] sm:$0xff] %v4847_v17  ;;  %v2813_v53 = vpop.f32.mrf.mxu3 }
 0x479   :  { %v4849_v43 = vpop.eup %4848  ;;  %4850 = vtanh.f32 %v2681_v41  ;;  %v2814_v0 = vadd.f32 %v2813_v53, %v2725_v57 }
 0x47a   :  { %3493 = vst [vmem:[#allocation13 + $0x100] sm:$0xff] %v4849_v43 }
 0x47b   :  { %4852 = vtanh.f32 %v2814_v0  ;;  %2766 = vmatmul.bf16.gmra.mxu2 %v5580_v34 }
 0x47c   :  { %v2594_v21 = vpop.f32.mrf.mxu0 }
 0x47d   :  { %v2595_v4 = vadd.f32 %v2594_v21, %v5841_v11  ;;  %v2683_v51 = vpop.f32.mrf.mxu1  ;;  %2855 = vmatmul.bf16.gmra.mxu3 %v5662_v20 }
 0x47e   :  { %v2727_v54 = vpop.f32.mrf.mxu2 }
 0x47f   :  { %v4851_v15 = vpop.eup %4850  ;;  %v2684_v19 = vadd.f32 %v2683_v51, %v2595_v4  ;;  %v2728_v58 = vadd.f32 %v2727_v54, %v5919_v55  ;;  %2909 = vmatmul.bf16.gmra.mxu0 %v5486_v28  ;;  %v3989_v4 = vld [vmem:[#allocation10 + $0x18] sm:$0xf]  ;;  %v4481_v51 = vld [vmem:[#allocation10 + $0x30] sm:$0xf0] }
 0x480   :  { %3625 = vst [vmem:[#allocation13 + $0x520] sm:$0xff] %v4851_v15  ;;  %2998 = vmatmul.bf16.gmra.mxu1 %v5577_v63  ;;  %v2816_v12 = vpop.f32.mrf.mxu3  ;;  %v3990_v54 = vor.u32 %v4481_v51, %v3989_v4 }
 0x481   :  { %v4853_v13 = vpop.eup %4852  ;;  %4854 = vtanh.f32 %v2684_v19  ;;  %v2817_v32 = vadd.f32 %v2816_v12, %v2728_v58 }
 0x482   :  { %3500 = vst [vmem:[#allocation13 + $0x138] sm:$0xff] %v4853_v13  ;;  %3066 = vmatpush.bf16.msra.mxu2 %v3990_v54 }
 0x483   :  { %4856 = vtanh.f32 %v2817_v32 }
 0x484   :  { %v2596_v49 = vpop.f32.mrf.mxu0 }
 0x485   :  { %v2597_v1 = vadd.f32 %v2596_v49, %v5841_v11  ;;  %v2685_v60 = vpop.f32.mrf.mxu1 }
 0x486   :  { %v2729_v2 = vpop.f32.mrf.mxu2 }
 0x487   :  { %v4855_v27 = vpop.eup %4854  ;;  %v2686_v7 = vadd.f32 %v2685_v60, %v2597_v1  ;;  %v2730_v48 = vadd.f32 %v2729_v2, %v5919_v55  ;;  %v4213_v60 = vld [vmem:[#allocation10 + $0x1d8] sm:$0xf]  ;;  %v4537_v2 = vld [vmem:[#allocation10 + $0x1f0] sm:$0xf0] }
 0x488   :  { %3632 = vst [vmem:[#allocation13 + $0x558] sm:$0xff] %v4855_v27  ;;  %v2818_v23 = vpop.f32.mrf.mxu3 }
 0x489   :  { %v4857_v39 = vpop.eup %4856  ;;  %4858 = vtanh.f32 %v2686_v7  ;;  %v2819_v16 = vadd.f32 %v2818_v23, %v2730_v48  ;;  %v4214_v48 = vor.u32 %v4537_v2, %v4213_v60 }
 0x48a   :  { %3507 = vst [vmem:[#allocation13 + $0x170] sm:$0xff] %v4857_v39 }
 0x48b   :  { %4860 = vtanh.f32 %v2819_v16  ;;  %2771 = vmatmul.bf16.gmra.mxu2 %v5592_v29  ;;  %3155 = vmatpush.bf16.msra.mxu3 %v4214_v48 }
 0x48c   :  { %v2599_v17 = vpop.f32.mrf.mxu0 }
 0x48d   :  { %v2600_v41 = vadd.f32 %v2599_v17, %v5841_v11  ;;  %v2688_v57 = vpop.f32.mrf.mxu1  ;;  %2860 = vmatmul.bf16.gmra.mxu3 %v5672_v50 }
 0x48e   :  { %v2732_v53 = vpop.f32.mrf.mxu2 }
 0x48f   :  { %v4859_v42 = vpop.eup %4858  ;;  %v2689_v38 = vadd.f32 %v2688_v57, %v2600_v41  ;;  %v2733_v43 = vadd.f32 %v2732_v53, %v5919_v55  ;;  %2914 = vmatmul.bf16.gmra.mxu0 %v5502_v59 }
 0x490   :  { %3639 = vst [vmem:[#allocation13 + $0x590] sm:$0xff] %v4859_v42  ;;  %3003 = vmatmul.bf16.gmra.mxu1 %v5589_v14  ;;  %v2821_v0 = vpop.f32.mrf.mxu3 }
 0x491   :  { %v4861_v6 = vpop.eup %4860  ;;  %4862 = vtanh.f32 %v2689_v38  ;;  %v2822_v21 = vadd.f32 %v2821_v0, %v2733_v43 }
 0x492   :  { %3514 = vst [vmem:[#allocation13 + $0x1a8] sm:$0xff] %v4861_v6 }
 0x493   :  { %4864 = vtanh.f32 %v2822_v21 }
 0x494   :  { %v2601_v15 = vpop.f32.mrf.mxu0 }
 0x495   :  { %v2602_v19 = vadd.f32 %v2601_v15, %v5841_v11  ;;  %v2690_v58 = vpop.f32.mrf.mxu1 }
 0x496   :  { %v2734_v12 = vpop.f32.mrf.mxu2 }
 0x497   :  { %v4863_v13 = vpop.eup %4862  ;;  %v2691_v32 = vadd.f32 %v2690_v58, %v2602_v19  ;;  %v2735_v49 = vadd.f32 %v2734_v12, %v5919_v55 }
 0x498   :  { %3646 = vst [vmem:[#allocation13 + $0x5c8] sm:$0xff] %v4863_v13  ;;  %v2823_v1 = vpop.f32.mrf.mxu3 }
 0x499   :  { %v4865_v27 = vpop.eup %4864  ;;  %4866 = vtanh.f32 %v2691_v32  ;;  %v2824_v7 = vadd.f32 %v2823_v1, %v2735_v49 }
 0x49a   :  { %3521 = vst [vmem:[#allocation13 + $0x1e0] sm:$0xff] %v4865_v27 }
 0x49b   :  { %4868 = vtanh.f32 %v2824_v7  ;;  %2776 = vmatmul.bf16.gmra.mxu2 %v5604_v37 }
 0x49c   :  { %v2604_v23 = vpop.f32.mrf.mxu0 }
 0x49d   :  { %v2605_v39 = vadd.f32 %v2604_v23, %v5841_v11  ;;  %v2693_v16 = vpop.f32.mrf.mxu1  ;;  %2865 = vmatmul.bf16.gmra.mxu3 %v5682_v44 }
 0x49e   :  { %v2737_v17 = vpop.f32.mrf.mxu2 }
 0x49f   :  { %v4867_v41 = vpop.eup %4866  ;;  %v2694_v57 = vadd.f32 %v2693_v16, %v2605_v39  ;;  %v2738_v53 = vadd.f32 %v2737_v17, %v5919_v55  ;;  %2919 = vmatmul.bf16.gmra.mxu0 %v5518_v40 }
 0x4a0   :  { %3653 = vst [vmem:[#allocation13 + $0x600] sm:$0xff] %v4867_v41  ;;  %3008 = vmatmul.bf16.gmra.mxu1 %v5601_v52  ;;  %v2826_v42 = vpop.f32.mrf.mxu3 }
 0x4a1   :  { %v4869_v38 = vpop.eup %4868  ;;  %4870 = vtanh.f32 %v2694_v57  ;;  %v2827_v43 = vadd.f32 %v2826_v42, %v2738_v53 }
 0x4a2   :  { %3528 = vst [vmem:[#allocation13 + $0x218] sm:$0xff] %v4869_v38 }
 0x4a3   :  { %4872 = vtanh.f32 %v2827_v43 }
 0x4a4   :  { %v2606_v0 = vpop.f32.mrf.mxu0 }
 0x4a5   :  { %v2607_v6 = vadd.f32 %v2606_v0, %v5841_v11  ;;  %v2695_v21 = vpop.f32.mrf.mxu1 }
 0x4a6   :  { %v2739_v4 = vpop.f32.mrf.mxu2 }
 0x4a7   :  { %v4871_v51 = vpop.eup %4870  ;;  %v2696_v54 = vadd.f32 %v2695_v21, %v2607_v6  ;;  %v2740_v15 = vadd.f32 %v2739_v4, %v5919_v55  ;;  %v5977_v6 = vperm.slane %v5916_v46, 5 }
 0x4a8   :  { %3660 = vst [vmem:[#allocation13 + $0x638] sm:$0xff] %v4871_v51  ;;  %v2828_v19 = vpop.f32.mrf.mxu3 }
 0x4a9   :  { %v4873_v58 = vpop.eup %4872  ;;  %4874 = vtanh.f32 %v2696_v54  ;;  %v2829_v12 = vadd.f32 %v2828_v19, %v2740_v15 }
 0x4aa   :  { %3535 = vst [vmem:[#allocation13 + $0x250] sm:$0xff] %v4873_v58 }
 0x4ab   :  { %4876 = vtanh.f32 %v2829_v12  ;;  %2781 = vmatmul.bf16.gmra.mxu2 %v5616_v61 }
 0x4ac   :  { %v2609_v13 = vpop.f32.mrf.mxu0 }
 0x4ad   :  { %v2610_v32 = vadd.f32 %v2609_v13, %v5841_v11  ;;  %v2698_v49 = vpop.f32.mrf.mxu1  ;;  %2870 = vmatmul.bf16.gmra.mxu3 %v5692_v18 }
 0x4ae   :  { %v2742_v1 = vpop.f32.mrf.mxu2 }
 0x4af   :  { %v4875_v60 = vpop.eup %4874  ;;  %v2699_v2 = vadd.f32 %v2698_v49, %v2610_v32  ;;  %v2743_v27 = vadd.f32 %v2742_v1, %v5919_v55  ;;  %2924 = vmatmul.bf16.gmra.mxu0 %v5532_v25 }
 0x4b0   :  { %3667 = vst [vmem:[#allocation13 + $0x670] sm:$0xff] %v4875_v60  ;;  %3013 = vmatmul.bf16.gmra.mxu1 %v5613_v36  ;;  %v2831_v7 = vpop.f32.mrf.mxu3 }
 0x4b1   :  { %v4877_v48 = vpop.eup %4876  ;;  %4878 = vtanh.f32 %v2699_v2  ;;  %v2832_v23 = vadd.f32 %v2831_v7, %v2743_v27 }
 0x4b2   :  { %3542 = vst [vmem:[#allocation13 + $0x288] sm:$0xff] %v4877_v48 }
 0x4b3   :  { %4880 = vtanh.f32 %v2832_v23 }
 0x4b4   :  { %v2611_v39 = vpop.f32.mrf.mxu0 }
 0x4b5   :  { %v2612_v16 = vadd.f32 %v2611_v39, %v5841_v11  ;;  %v2700_v17 = vpop.f32.mrf.mxu1 }
 0x4b6   :  { %v2744_v41 = vpop.f32.mrf.mxu2 }
 0x4b7   :  { %v4879_v57 = vpop.eup %4878  ;;  %v2701_v53 = vadd.f32 %v2700_v17, %v2612_v16  ;;  %v2745_v42 = vadd.f32 %v2744_v41, %v5919_v55 }
 0x4b8   :  { %3674 = vst [vmem:[#allocation13 + $0x6a8] sm:$0xff] %v4879_v57  ;;  %v2833_v38 = vpop.f32.mrf.mxu3 }
 0x4b9   :  { %v4881_v43 = vpop.eup %4880  ;;  %4882 = vtanh.f32 %v2701_v53  ;;  %v2834_v0 = vadd.f32 %v2833_v38, %v2745_v42 }
 0x4ba   :  { %3549 = vst [vmem:[#allocation13 + $0x2c0] sm:$0xff] %v4881_v43 }
 0x4bb   :  { %4884 = vtanh.f32 %v2834_v0  ;;  %2786 = vmatmul.bf16.gmra.mxu2 %v5633_v22 }
 0x4bc   :  { %v2890_v21 = vpop.f32.mrf.mxu0 }
 0x4bd   :  { %v2891_v11 = vadd.f32 %v2890_v21, %v5977_v6  ;;  %v2979_v4 = vpop.f32.mrf.mxu1  ;;  %2875 = vmatmul.bf16.gmra.mxu3 %v5705_v5 }
 0x4be   :  { %v2747_v51 = vpop.f32.mrf.mxu2 }
 0x4bf   :  { %v4883_v54 = vpop.eup %4882  ;;  %v2980_v15 = vadd.f32 %v2979_v4, %v2891_v11  ;;  %v2748_v19 = vadd.f32 %v2747_v51, %v5919_v55  ;;  %2929 = vmatmul.bf16.gmra.mxu0 %v5544_v10 }
 0x4c0   :  { %3681 = vst [vmem:[#allocation13 + $0x6e0] sm:$0xff] %v4883_v54  ;;  %3018 = vmatmul.bf16.gmra.mxu1 %v5627_v3  ;;  %v2836_v46 = vpop.f32.mrf.mxu3 }
 0x4c1   :  { %v4885_v58 = vpop.eup %4884  ;;  %4886 = vtanh.f32 %v2980_v15  ;;  %v2837_v12 = vadd.f32 %v2836_v46, %v2748_v19 }
 0x4c2   :  { %3556 = vst [vmem:[#allocation13 + $0x2f8] sm:$0xff] %v4885_v58 }
 0x4c3   :  { %4888 = vtanh.f32 %v2837_v12 }
 0x4c4   :  { %v2892_v13 = vpop.f32.mrf.mxu0 }
 0x4c5   :  { %v2893_v32 = vadd.f32 %v2892_v13, %v5977_v6  ;;  %v2981_v49 = vpop.f32.mrf.mxu1 }
 0x4c6   :  { %v2749_v1 = vpop.f32.mrf.mxu2 }
 0x4c7   :  { %v4887_v60 = vpop.eup %4886  ;;  %v2982_v2 = vadd.f32 %v2981_v49, %v2893_v32  ;;  %v2750_v27 = vadd.f32 %v2749_v1, %v5919_v55 }
 0x4c8   :  { %3466 = vst [vmem:[#allocation13 + $0x28] sm:$0xff] %v4887_v60  ;;  %v2838_v7 = vpop.f32.mrf.mxu3 }
 0x4c9   :  { %v4889_v48 = vpop.eup %4888  ;;  %4890 = vtanh.f32 %v2982_v2  ;;  %v2839_v23 = vadd.f32 %v2838_v7, %v2750_v27 }
 0x4ca   :  { %3563 = vst [vmem:[#allocation13 + $0x330] sm:$0xff] %v4889_v48 }
 0x4cb   :  { %4892 = vtanh.f32 %v2839_v23  ;;  %3067 = vmatmul.bf16.vlgmr.msra.gmra.mxu2 %v5422_v62 }
 0x4cc   :  { %v2895_v39 = vpop.f32.mrf.mxu0 }
 0x4cd   :  { %v2896_v16 = vadd.f32 %v2895_v39, %v5977_v6  ;;  %v2984_v17 = vpop.f32.mrf.mxu1  ;;  %3156 = vmatmul.bf16.vlgmr.msra.gmra.mxu3 %v5529_v35 }
 0x4ce   :  { %v2752_v41 = vpop.f32.mrf.mxu2 }
 0x4cf   :  { %v4891_v57 = vpop.eup %4890  ;;  %v2985_v53 = vadd.f32 %v2984_v17, %v2896_v16  ;;  %v2753_v42 = vadd.f32 %v2752_v41, %v5919_v55  ;;  %2934 = vmatmul.bf16.gmra.mxu0 %v5556_v45 }
 0x4d0   :  { %3473 = vst [vmem:[#allocation13 + $0x60] sm:$0xff] %v4891_v57  ;;  %3023 = vmatmul.bf16.gmra.mxu1 %v5642_v24  ;;  %v2841_v38 = vpop.f32.mrf.mxu3 }
 0x4d1   :  { %v4893_v43 = vpop.eup %4892  ;;  %4894 = vtanh.f32 %v2985_v53  ;;  %v2842_v62 = vadd.f32 %v2841_v38, %v2753_v42 }
 0x4d2   :  { %3570 = vst [vmem:[#allocation13 + $0x368] sm:$0xff] %v4893_v43 }
 0x4d3   :  { %4896 = vtanh.f32 %v2842_v62 }
 0x4d4   :  { %v2897_v0 = vpop.f32.mrf.mxu0 }
 0x4d5   :  { %v2898_v21 = vadd.f32 %v2897_v0, %v5977_v6  ;;  %v2986_v35 = vpop.f32.mrf.mxu1 }
 0x4d6   :  { %v2754_v11 = vpop.f32.mrf.mxu2 }
 0x4d7   :  { %v4895_v4 = vpop.eup %4894  ;;  %v2987_v51 = vadd.f32 %v2986_v35, %v2898_v21  ;;  %v2755_v54 = vadd.f32 %v2754_v11, %v5919_v55 }
 0x4d8   :  { %3480 = vst [vmem:[#allocation13 + $0x98] sm:$0xff] %v4895_v4  ;;  %v2843_v15 = vpop.f32.mrf.mxu3 }
 0x4d9   :  { %v4897_v19 = vpop.eup %4896  ;;  %4898 = vtanh.f32 %v2987_v51  ;;  %v2844_v46 = vadd.f32 %v2843_v15, %v2755_v54 }
 0x4da   :  { %3577 = vst [vmem:[#allocation13 + $0x3a0] sm:$0xff] %v4897_v19 }
 0x4db   :  { %4900 = vtanh.f32 %v2844_v46  ;;  %3072 = vmatmul.bf16.gmra.mxu2 %v5438_v31 }
 0x4dc   :  { %v2900_v58 = vpop.f32.mrf.mxu0 }
 0x4dd   :  { %v2901_v12 = vadd.f32 %v2900_v58, %v5977_v6  ;;  %v2989_v13 = vpop.f32.mrf.mxu1  ;;  %3161 = vmatmul.bf16.gmra.mxu3 %v5541_v8 }
 0x4de   :  { %v2757_v32 = vpop.f32.mrf.mxu2 }
 0x4df   :  { %v4899_v49 = vpop.eup %4898  ;;  %v2990_v1 = vadd.f32 %v2989_v13, %v2901_v12  ;;  %v2758_v60 = vadd.f32 %v2757_v32, %v5919_v55  ;;  %2939 = vmatmul.bf16.gmra.mxu0 %v5568_v33 }
 0x4e0   :  { %3487 = vst [vmem:[#allocation13 + $0xd0] sm:$0xff] %v4899_v49  ;;  %3028 = vmatmul.bf16.gmra.mxu1 %v5652_v56  ;;  %v2846_v2 = vpop.f32.mrf.mxu3 }
 0x4e1   :  { %v4901_v27 = vpop.eup %4900  ;;  %4902 = vtanh.f32 %v2990_v1  ;;  %v2847_v31 = vadd.f32 %v2846_v2, %v2758_v60 }
 0x4e2   :  { %3584 = vst [vmem:[#allocation13 + $0x3d8] sm:$0xff] %v4901_v27 }
 0x4e3   :  { %4904 = vtanh.f32 %v2847_v31 }
 0x4e4   :  { %v2902_v7 = vpop.f32.mrf.mxu0 }
 0x4e5   :  { %v2903_v48 = vadd.f32 %v2902_v7, %v5977_v6  ;;  %v2991_v8 = vpop.f32.mrf.mxu1 }
 0x4e6   :  { %v2759_v23 = vpop.f32.mrf.mxu2 }
 0x4e7   :  { %v4903_v39 = vpop.eup %4902  ;;  %v2992_v16 = vadd.f32 %v2991_v8, %v2903_v48  ;;  %v2760_v17 = vadd.f32 %v2759_v23, %v5919_v55 }
 0x4e8   :  { %3494 = vst [vmem:[#allocation13 + $0x108] sm:$0xff] %v4903_v39  ;;  %v2848_v41 = vpop.f32.mrf.mxu3 }
 0x4e9   :  { %v4905_v57 = vpop.eup %4904  ;;  %4906 = vtanh.f32 %v2992_v16  ;;  %v2849_v53 = vadd.f32 %v2848_v41, %v2760_v17 }
 0x4ea   :  { %3591 = vst [vmem:[#allocation13 + $0x410] sm:$0xff] %v4905_v57 }
 0x4eb   :  { %4908 = vtanh.f32 %v2849_v53  ;;  %3077 = vmatmul.bf16.gmra.mxu2 %v5454_v9 }
 0x4ec   :  { %v2905_v42 = vpop.f32.mrf.mxu0 }
 0x4ed   :  { %v2906_v38 = vadd.f32 %v2905_v42, %v5977_v6  ;;  %v2994_v43 = vpop.f32.mrf.mxu1  ;;  %3166 = vmatmul.bf16.gmra.mxu3 %v5553_v26 }
 0x4ee   :  { %v2762_v62 = vpop.f32.mrf.mxu2 }
 0x4ef   :  { %v4907_v0 = vpop.eup %4906  ;;  %v2995_v21 = vadd.f32 %v2994_v43, %v2906_v38  ;;  %v2763_v35 = vadd.f32 %v2762_v62, %v5919_v55  ;;  %2944 = vmatmul.bf16.gmra.mxu0 %v5580_v34 }
 0x4f0   :  { %3501 = vst [vmem:[#allocation13 + $0x140] sm:$0xff] %v4907_v0  ;;  %3033 = vmatmul.bf16.gmra.mxu1 %v5662_v20  ;;  %v2851_v11 = vpop.f32.mrf.mxu3 }
 0x4f1   :  { %v4909_v4 = vpop.eup %4908  ;;  %4910 = vtanh.f32 %v2995_v21  ;;  %v2852_v9 = vadd.f32 %v2851_v11, %v2763_v35 }
 0x4f2   :  { %3598 = vst [vmem:[#allocation13 + $0x448] sm:$0xff] %v4909_v4 }
 0x4f3   :  { %4912 = vtanh.f32 %v2852_v9 }
 0x4f4   :  { %v2907_v51 = vpop.f32.mrf.mxu0 }
 0x4f5   :  { %v2908_v54 = vadd.f32 %v2907_v51, %v5977_v6  ;;  %v2996_v26 = vpop.f32.mrf.mxu1 }
 0x4f6   :  { %v2764_v15 = vpop.f32.mrf.mxu2 }
 0x4f7   :  { %v4911_v19 = vpop.eup %4910  ;;  %v2997_v46 = vadd.f32 %v2996_v26, %v2908_v54  ;;  %v2765_v58 = vadd.f32 %v2764_v15, %v5919_v55 }
 0x4f8   :  { %3508 = vst [vmem:[#allocation13 + $0x178] sm:$0xff] %v4911_v19  ;;  %v2853_v12 = vpop.f32.mrf.mxu3 }
 0x4f9   :  { %v4913_v13 = vpop.eup %4912  ;;  %4914 = vtanh.f32 %v2997_v46  ;;  %v2854_v32 = vadd.f32 %v2853_v12, %v2765_v58 }
 0x4fa   :  { %3605 = vst [vmem:[#allocation13 + $0x480] sm:$0xff] %v4913_v13 }
 0x4fb   :  { %4916 = vtanh.f32 %v2854_v32  ;;  %3082 = vmatmul.bf16.gmra.mxu2 %v5470_v47 }
 0x4fc   :  { %v2910_v49 = vpop.f32.mrf.mxu0 }
 0x4fd   :  { %v2911_v1 = vadd.f32 %v2910_v49, %v5977_v6  ;;  %v2999_v60 = vpop.f32.mrf.mxu1  ;;  %3171 = vmatmul.bf16.gmra.mxu3 %v5565_v30 }
 0x4fe   :  { %v2767_v2 = vpop.f32.mrf.mxu2 }
 0x4ff   :  { %v4915_v27 = vpop.eup %4914  ;;  %v3000_v31 = vadd.f32 %v2999_v60, %v2911_v1  ;;  %v2768_v7 = vadd.f32 %v2767_v2, %v5919_v55  ;;  %2949 = vmatmul.bf16.gmra.mxu0 %v5592_v29 }
 0x500   :  { %3515 = vst [vmem:[#allocation13 + $0x1b0] sm:$0xff] %v4915_v27  ;;  %3038 = vmatmul.bf16.gmra.mxu1 %v5672_v50  ;;  %v2856_v48 = vpop.f32.mrf.mxu3 }
 0x501   :  { %v4917_v8 = vpop.eup %4916  ;;  %4918 = vtanh.f32 %v3000_v31  ;;  %v2857_v47 = vadd.f32 %v2856_v48, %v2768_v7 }
 0x502   :  { %3612 = vst [vmem:[#allocation13 + $0x4b8] sm:$0xff] %v4917_v8 }
 0x503   :  { %4920 = vtanh.f32 %v2857_v47 }
 0x504   :  { %v2912_v23 = vpop.f32.mrf.mxu0 }
 0x505   :  { %v2913_v39 = vadd.f32 %v2912_v23, %v5977_v6  ;;  %v3001_v30 = vpop.f32.mrf.mxu1 }
 0x506   :  { %v2769_v16 = vpop.f32.mrf.mxu2 }
 0x507   :  { %v4919_v17 = vpop.eup %4918  ;;  %v3002_v41 = vadd.f32 %v3001_v30, %v2913_v39  ;;  %v2770_v57 = vadd.f32 %v2769_v16, %v5919_v55 }
 0x508   :  { %3522 = vst [vmem:[#allocation13 + $0x1e8] sm:$0xff] %v4919_v17  ;;  %v2858_v53 = vpop.f32.mrf.mxu3 }
 0x509   :  { %v4921_v42 = vpop.eup %4920  ;;  %4922 = vtanh.f32 %v3002_v41  ;;  %v2859_v38 = vadd.f32 %v2858_v53, %v2770_v57 }
 0x50a   :  { %3619 = vst [vmem:[#allocation13 + $0x4f0] sm:$0xff] %v4921_v42 }
 0x50b   :  { %4924 = vtanh.f32 %v2859_v38  ;;  %3087 = vmatmul.bf16.gmra.mxu2 %v5486_v28 }
 0x50c   :  { %v2915_v43 = vpop.f32.mrf.mxu0 }
 0x50d   :  { %v2916_v62 = vadd.f32 %v2915_v43, %v5977_v6  ;;  %v3004_v0 = vpop.f32.mrf.mxu1  ;;  %3176 = vmatmul.bf16.gmra.mxu3 %v5577_v63 }
 0x50e   :  { %v2772_v21 = vpop.f32.mrf.mxu2 }
 0x50f   :  { %v4923_v35 = vpop.eup %4922  ;;  %v3005_v11 = vadd.f32 %v3004_v0, %v2916_v62  ;;  %v2773_v4 = vadd.f32 %v2772_v21, %v5919_v55  ;;  %2954 = vmatmul.bf16.gmra.mxu0 %v5604_v37 }
 0x510   :  { %3529 = vst [vmem:[#allocation13 + $0x220] sm:$0xff] %v4923_v35  ;;  %3043 = vmatmul.bf16.gmra.mxu1 %v5682_v44  ;;  %v2861_v9 = vpop.f32.mrf.mxu3 }
 0x511   :  { %v4925_v51 = vpop.eup %4924  ;;  %4926 = vtanh.f32 %v3005_v11  ;;  %v2862_v28 = vadd.f32 %v2861_v9, %v2773_v4 }
 0x512   :  { %3626 = vst [vmem:[#allocation13 + $0x528] sm:$0xff] %v4925_v51 }
 0x513   :  { %4928 = vtanh.f32 %v2862_v28 }
 0x514   :  { %v2917_v54 = vpop.f32.mrf.mxu0 }
 0x515   :  { %v2918_v26 = vadd.f32 %v2917_v54, %v5977_v6  ;;  %v3006_v63 = vpop.f32.mrf.mxu1 }
 0x516   :  { %v2774_v15 = vpop.f32.mrf.mxu2 }
 0x517   :  { %v4927_v19 = vpop.eup %4926  ;;  %v3007_v46 = vadd.f32 %v3006_v63, %v2918_v26  ;;  %v2775_v58 = vadd.f32 %v2774_v15, %v5919_v55 }
 0x518   :  { %3536 = vst [vmem:[#allocation13 + $0x258] sm:$0xff] %v4927_v19  ;;  %v2863_v12 = vpop.f32.mrf.mxu3 }
 0x519   :  { %v4929_v13 = vpop.eup %4928  ;;  %4930 = vtanh.f32 %v3007_v46  ;;  %v2864_v32 = vadd.f32 %v2863_v12, %v2775_v58 }
 0x51a   :  { %3633 = vst [vmem:[#allocation13 + $0x560] sm:$0xff] %v4929_v13 }
 0x51b   :  { %4932 = vtanh.f32 %v2864_v32  ;;  %3092 = vmatmul.bf16.gmra.mxu2 %v5502_v59 }
 0x51c   :  { %v2920_v49 = vpop.f32.mrf.mxu0 }
 0x51d   :  { %v2921_v1 = vadd.f32 %v2920_v49, %v5977_v6  ;;  %v3009_v60 = vpop.f32.mrf.mxu1  ;;  %3181 = vmatmul.bf16.gmra.mxu3 %v5589_v14 }
 0x51e   :  { %v2777_v2 = vpop.f32.mrf.mxu2 }
 0x51f   :  { %v4931_v27 = vpop.eup %4930  ;;  %v3010_v31 = vadd.f32 %v3009_v60, %v2921_v1  ;;  %v2778_v7 = vadd.f32 %v2777_v2, %v5919_v55  ;;  %2959 = vmatmul.bf16.gmra.mxu0 %v5616_v61 }
 0x520   :  { %3543 = vst [vmem:[#allocation13 + $0x290] sm:$0xff] %v4931_v27  ;;  %3048 = vmatmul.bf16.gmra.mxu1 %v5692_v18  ;;  %v2866_v48 = vpop.f32.mrf.mxu3 }
 0x521   :  { %v4933_v8 = vpop.eup %4932  ;;  %4934 = vtanh.f32 %v3010_v31  ;;  %v2867_v59 = vadd.f32 %v2866_v48, %v2778_v7 }
 0x522   :  { %3640 = vst [vmem:[#allocation13 + $0x598] sm:$0xff] %v4933_v8 }
 0x523   :  { %4936 = vtanh.f32 %v2867_v59 }
 0x524   :  { %v2922_v47 = vpop.f32.mrf.mxu0 }
 0x525   :  { %v2923_v23 = vadd.f32 %v2922_v47, %v5977_v6  ;;  %v3011_v14 = vpop.f32.mrf.mxu1 }
 0x526   :  { %v2779_v39 = vpop.f32.mrf.mxu2 }
 0x527   :  { %v4935_v30 = vpop.eup %4934  ;;  %v3012_v16 = vadd.f32 %v3011_v14, %v2923_v23  ;;  %v2780_v17 = vadd.f32 %v2779_v39, %v5919_v55 }
 0x528   :  { %3550 = vst [vmem:[#allocation13 + $0x2c8] sm:$0xff] %v4935_v30  ;;  %v2868_v41 = vpop.f32.mrf.mxu3  ;;  %v5052_v30 = vld [vmem:[#allocation11] sm:$0xff] }
 0x529   :  { %v4937_v57 = vpop.eup %4936  ;;  %4938 = vtanh.f32 %v3012_v16  ;;  %v2869_v53 = vadd.f32 %v2868_v41, %v2780_v17  ;;  %v6050_v16 = vperm.slane %v5052_v30, 6 }
 0x52a   :  { %3647 = vst [vmem:[#allocation13 + $0x5d0] sm:$0xff] %v4937_v57 }
 0x52b   :  { %4940 = vtanh.f32 %v2869_v53  ;;  %3097 = vmatmul.bf16.gmra.mxu2 %v5518_v40 }
 0x52c   :  { %v2925_v42 = vpop.f32.mrf.mxu0 }
 0x52d   :  { %v2926_v38 = vadd.f32 %v2925_v42, %v5977_v6  ;;  %v3014_v43 = vpop.f32.mrf.mxu1  ;;  %3186 = vmatmul.bf16.gmra.mxu3 %v5601_v52 }
 0x52e   :  { %v2782_v62 = vpop.f32.mrf.mxu2 }
 0x52f   :  { %v4939_v0 = vpop.eup %4938  ;;  %v3015_v21 = vadd.f32 %v3014_v43, %v2926_v38  ;;  %v2783_v35 = vadd.f32 %v2782_v62, %v5919_v55  ;;  %2964 = vmatmul.bf16.gmra.mxu0 %v5633_v22 }
 0x530   :  { %3557 = vst [vmem:[#allocation13 + $0x300] sm:$0xff] %v4939_v0  ;;  %3053 = vmatmul.bf16.gmra.mxu1 %v5705_v5  ;;  %v2871_v11 = vpop.f32.mrf.mxu3 }
 0x531   :  { %v4941_v4 = vpop.eup %4940  ;;  %4942 = vtanh.f32 %v3015_v21  ;;  %v2872_v40 = vadd.f32 %v2871_v11, %v2783_v35 }
 0x532   :  { %3654 = vst [vmem:[#allocation13 + $0x608] sm:$0xff] %v4941_v4 }
 0x533   :  { %4944 = vtanh.f32 %v2872_v40 }
 0x534   :  { %v2927_v9 = vpop.f32.mrf.mxu0 }
 0x535   :  { %v2928_v51 = vadd.f32 %v2927_v9, %v5977_v6  ;;  %v3016_v52 = vpop.f32.mrf.mxu1 }
 0x536   :  { %v2784_v28 = vpop.f32.mrf.mxu2 }
 0x537   :  { %v4943_v54 = vpop.eup %4942  ;;  %v3017_v26 = vadd.f32 %v3016_v52, %v2928_v51  ;;  %v2785_v63 = vadd.f32 %v2784_v28, %v5919_v55 }
 0x538   :  { %3564 = vst [vmem:[#allocation13 + $0x338] sm:$0xff] %v4943_v54  ;;  %v2873_v15 = vpop.f32.mrf.mxu3 }
 0x539   :  { %v4945_v19 = vpop.eup %4944  ;;  %4946 = vtanh.f32 %v3017_v26  ;;  %v2874_v46 = vadd.f32 %v2873_v15, %v2785_v63 }
 0x53a   :  { %3661 = vst [vmem:[#allocation13 + $0x640] sm:$0xff] %v4945_v19 }
 0x53b   :  { %4948 = vtanh.f32 %v2874_v46  ;;  %3102 = vmatmul.bf16.gmra.mxu2 %v5532_v25 }
 0x53c   :  { %v2930_v58 = vpop.f32.mrf.mxu0 }
 0x53d   :  { %v2931_v12 = vadd.f32 %v2930_v58, %v5977_v6  ;;  %v3019_v13 = vpop.f32.mrf.mxu1  ;;  %3191 = vmatmul.bf16.gmra.mxu3 %v5613_v36 }
 0x53e   :  { %v2787_v32 = vpop.f32.mrf.mxu2 }
 0x53f   :  { %v4947_v49 = vpop.eup %4946  ;;  %v3020_v1 = vadd.f32 %v3019_v13, %v2931_v12  ;;  %v2788_v60 = vadd.f32 %v2787_v32, %v5919_v55 }
 0x540   :  { %3571 = vst [vmem:[#allocation13 + $0x370] sm:$0xff] %v4947_v49  ;;  %v2876_v2 = vpop.f32.mrf.mxu3 }
 0x541   :  { %v4949_v27 = vpop.eup %4948  ;;  %4950 = vtanh.f32 %v3020_v1  ;;  %v2877_v31 = vadd.f32 %v2876_v2, %v2788_v60 }
 0x542   :  { %3668 = vst [vmem:[#allocation13 + $0x678] sm:$0xff] %v4949_v27 }
 0x543   :  { %4952 = vtanh.f32 %v2877_v31 }
 0x544   :  { %v2932_v7 = vpop.f32.mrf.mxu0 }
 0x545   :  { %v2933_v25 = vadd.f32 %v2932_v7, %v5977_v6  ;;  %v3021_v48 = vpop.f32.mrf.mxu1 }
 0x546   :  { %v2789_v8 = vpop.f32.mrf.mxu2 }
 0x547   :  { %v4951_v59 = vpop.eup %4950  ;;  %v3022_v47 = vadd.f32 %v3021_v48, %v2933_v25  ;;  %v2790_v36 = vadd.f32 %v2789_v8, %v5919_v55 }
 0x548   :  { %3578 = vst [vmem:[#allocation13 + $0x3a8] sm:$0xff] %v4951_v59  ;;  %v2878_v23 = vpop.f32.mrf.mxu3 }
 0x549   :  { %v4953_v14 = vpop.eup %4952  ;;  %4954 = vtanh.f32 %v3022_v47  ;;  %v2879_v39 = vadd.f32 %v2878_v23, %v2790_v36 }
 0x54a   :  { %3675 = vst [vmem:[#allocation13 + $0x6b0] sm:$0xff] %v4953_v14 }
 0x54b   :  { %4956 = vtanh.f32 %v2879_v39  ;;  %3107 = vmatmul.bf16.gmra.mxu2 %v5544_v10 }
 0x54c   :  { %v2935_v17 = vpop.f32.mrf.mxu0 }
 0x54d   :  { %v2936_v41 = vadd.f32 %v2935_v17, %v5977_v6  ;;  %v3024_v57 = vpop.f32.mrf.mxu1  ;;  %3196 = vmatmul.bf16.gmra.mxu3 %v5627_v3 }
 0x54e   :  { %v3068_v53 = vpop.f32.mrf.mxu2 }
 0x54f   :  { %v4955_v55 = vpop.eup %4954  ;;  %v3025_v42 = vadd.f32 %v3024_v57, %v2936_v41  ;;  %v3069_v38 = vadd.f32 %v3068_v53, %v6050_v16 }
 0x550   :  { %3585 = vst [vmem:[#allocation13 + $0x3e0] sm:$0xff] %v4955_v55  ;;  %v3157_v43 = vpop.f32.mrf.mxu3 }
 0x551   :  { %v4957_v62 = vpop.eup %4956  ;;  %4958 = vtanh.f32 %v3025_v42  ;;  %v3158_v0 = vadd.f32 %v3157_v43, %v3069_v38 }
 0x552   :  { %3682 = vst [vmem:[#allocation13 + $0x6e8] sm:$0xff] %v4957_v62 }
 0x553   :  { %4960 = vtanh.f32 %v3158_v0 }
 0x554   :  { %v2937_v10 = vpop.f32.mrf.mxu0 }
 0x555   :  { %v2938_v21 = vadd.f32 %v2937_v10, %v5977_v6  ;;  %v3026_v35 = vpop.f32.mrf.mxu1 }
 0x556   :  { %v3070_v11 = vpop.f32.mrf.mxu2 }
 0x557   :  { %v4959_v4 = vpop.eup %4958  ;;  %v3027_v40 = vadd.f32 %v3026_v35, %v2938_v21  ;;  %v3071_v3 = vadd.f32 %v3070_v11, %v6050_v16 }
 0x558   :  { %3592 = vst [vmem:[#allocation13 + $0x418] sm:$0xff] %v4959_v4  ;;  %v3159_v9 = vpop.f32.mrf.mxu3 }
 0x559   :  { %v4961_v51 = vpop.eup %4960  ;;  %4962 = vtanh.f32 %v3027_v40  ;;  %v3160_v52 = vadd.f32 %v3159_v9, %v3071_v3 }
 0x55a   :  { %3467 = vst [vmem:[#allocation13 + $0x30] sm:$0xff] %v4961_v51 }
 0x55b   :  { %4964 = vtanh.f32 %v3160_v52  ;;  %3112 = vmatmul.bf16.gmra.mxu2 %v5556_v45 }
 0x55c   :  { %v2940_v28 = vpop.f32.mrf.mxu0 }
 0x55d   :  { %v2941_v54 = vadd.f32 %v2940_v28, %v5977_v6  ;;  %v3029_v26 = vpop.f32.mrf.mxu1  ;;  %3201 = vmatmul.bf16.gmra.mxu3 %v5642_v24 }
 0x55e   :  { %v3073_v63 = vpop.f32.mrf.mxu2 }
 0x55f   :  { %v4963_v15 = vpop.eup %4962  ;;  %v3030_v19 = vadd.f32 %v3029_v26, %v2941_v54  ;;  %v3074_v46 = vadd.f32 %v3073_v63, %v6050_v16 }
 0x560   :  { %3599 = vst [vmem:[#allocation13 + $0x450] sm:$0xff] %v4963_v15  ;;  %v3162_v58 = vpop.f32.mrf.mxu3 }
 0x561   :  { %v4965_v12 = vpop.eup %4964  ;;  %4966 = vtanh.f32 %v3030_v19  ;;  %v3163_v13 = vadd.f32 %v3162_v58, %v3074_v46 }
 0x562   :  { %3474 = vst [vmem:[#allocation13 + $0x68] sm:$0xff] %v4965_v12 }
 0x563   :  { %4968 = vtanh.f32 %v3163_v13 }
 0x564   :  { %v2942_v32 = vpop.f32.mrf.mxu0 }
 0x565   :  { %v2943_v45 = vadd.f32 %v2942_v32, %v5977_v6  ;;  %v3031_v49 = vpop.f32.mrf.mxu1 }
 0x566   :  { %v3075_v1 = vpop.f32.mrf.mxu2 }
 0x567   :  { %v4967_v60 = vpop.eup %4966  ;;  %v3032_v2 = vadd.f32 %v3031_v49, %v2943_v45  ;;  %v3076_v24 = vadd.f32 %v3075_v1, %v6050_v16 }
 0x568   :  { %3606 = vst [vmem:[#allocation13 + $0x488] sm:$0xff] %v4967_v60  ;;  %v3164_v27 = vpop.f32.mrf.mxu3 }
 0x569   :  { %v4969_v31 = vpop.eup %4968  ;;  %4970 = vtanh.f32 %v3032_v2  ;;  %v3165_v7 = vadd.f32 %v3164_v27, %v3076_v24 }
 0x56a   :  { %3481 = vst [vmem:[#allocation13 + $0xa0] sm:$0xff] %v4969_v31 }
 0x56b   :  { %4972 = vtanh.f32 %v3165_v7  ;;  %3117 = vmatmul.bf16.gmra.mxu2 %v5568_v33 }
 0x56c   :  { %v2945_v25 = vpop.f32.mrf.mxu0 }
 0x56d   :  { %v2946_v48 = vadd.f32 %v2945_v25, %v5977_v6  ;;  %v3034_v8 = vpop.f32.mrf.mxu1  ;;  %3206 = vmatmul.bf16.gmra.mxu3 %v5652_v56 }
 0x56e   :  { %v3078_v59 = vpop.f32.mrf.mxu2 }
 0x56f   :  { %v4971_v47 = vpop.eup %4970  ;;  %v3035_v36 = vadd.f32 %v3034_v8, %v2946_v48  ;;  %v3079_v23 = vadd.f32 %v3078_v59, %v6050_v16 }
 0x570   :  { %3613 = vst [vmem:[#allocation13 + $0x4c0] sm:$0xff] %v4971_v47  ;;  %v3167_v14 = vpop.f32.mrf.mxu3 }
 0x571   :  { %v4973_v39 = vpop.eup %4972  ;;  %4974 = vtanh.f32 %v3035_v36  ;;  %v3168_v30 = vadd.f32 %v3167_v14, %v3079_v23 }
 0x572   :  { %3488 = vst [vmem:[#allocation13 + $0xd8] sm:$0xff] %v4973_v39 }
 0x573   :  { %4976 = vtanh.f32 %v3168_v30 }
 0x574   :  { %v2947_v17 = vpop.f32.mrf.mxu0 }
 0x575   :  { %v2948_v33 = vadd.f32 %v2947_v17, %v5977_v6  ;;  %v3036_v41 = vpop.f32.mrf.mxu1 }
 0x576   :  { %v3080_v57 = vpop.f32.mrf.mxu2 }
 0x577   :  { %v4975_v53 = vpop.eup %4974  ;;  %v3037_v55 = vadd.f32 %v3036_v41, %v2948_v33  ;;  %v3081_v56 = vadd.f32 %v3080_v57, %v6050_v16 }
 0x578   :  { %3620 = vst [vmem:[#allocation13 + $0x4f8] sm:$0xff] %v4975_v53  ;;  %v3169_v42 = vpop.f32.mrf.mxu3 }
 0x579   :  { %v4977_v38 = vpop.eup %4976  ;;  %4978 = vtanh.f32 %v3037_v55  ;;  %v3170_v43 = vadd.f32 %v3169_v42, %v3081_v56 }
 0x57a   :  { %3495 = vst [vmem:[#allocation13 + $0x110] sm:$0xff] %v4977_v38 }
 0x57b   :  { %4980 = vtanh.f32 %v3170_v43  ;;  %3122 = vmatmul.bf16.gmra.mxu2 %v5580_v34 }
 0x57c   :  { %v2950_v62 = vpop.f32.mrf.mxu0 }
 0x57d   :  { %v2951_v0 = vadd.f32 %v2950_v62, %v5977_v6  ;;  %v3039_v10 = vpop.f32.mrf.mxu1  ;;  %3211 = vmatmul.bf16.gmra.mxu3 %v5662_v20 }
 0x57e   :  { %v3083_v21 = vpop.f32.mrf.mxu2 }
 0x57f   :  { %v4979_v35 = vpop.eup %4978  ;;  %v3040_v11 = vadd.f32 %v3039_v10, %v2951_v0  ;;  %v3084_v4 = vadd.f32 %v3083_v21, %v6050_v16 }
 0x580   :  { %3627 = vst [vmem:[#allocation13 + $0x530] sm:$0xff] %v4979_v35  ;;  %v3172_v40 = vpop.f32.mrf.mxu3 }
 0x581   :  { %v4981_v3 = vpop.eup %4980  ;;  %4982 = vtanh.f32 %v3040_v11  ;;  %v3173_v9 = vadd.f32 %v3172_v40, %v3084_v4 }
 0x582   :  { %3502 = vst [vmem:[#allocation13 + $0x148] sm:$0xff] %v4981_v3 }
 0x583   :  { %4984 = vtanh.f32 %v3173_v9 }
 0x584   :  { %v2952_v51 = vpop.f32.mrf.mxu0 }
 0x585   :  { %v2953_v34 = vadd.f32 %v2952_v51, %v5977_v6  ;;  %v3041_v52 = vpop.f32.mrf.mxu1 }
 0x586   :  { %v3085_v28 = vpop.f32.mrf.mxu2 }
 0x587   :  { %v4983_v54 = vpop.eup %4982  ;;  %v3042_v26 = vadd.f32 %v3041_v52, %v2953_v34  ;;  %v3086_v20 = vadd.f32 %v3085_v28, %v6050_v16 }
 0x588   :  { %3634 = vst [vmem:[#allocation13 + $0x568] sm:$0xff] %v4983_v54  ;;  %v3174_v63 = vpop.f32.mrf.mxu3 }
 0x589   :  { %v4985_v15 = vpop.eup %4984  ;;  %4986 = vtanh.f32 %v3042_v26  ;;  %v3175_v19 = vadd.f32 %v3174_v63, %v3086_v20 }
 0x58a   :  { %3509 = vst [vmem:[#allocation13 + $0x180] sm:$0xff] %v4985_v15 }
 0x58b   :  { %4988 = vtanh.f32 %v3175_v19  ;;  %3127 = vmatmul.bf16.gmra.mxu2 %v5592_v29 }
 0x58c   :  { %v2955_v46 = vpop.f32.mrf.mxu0 }
 0x58d   :  { %v2956_v58 = vadd.f32 %v2955_v46, %v5977_v6  ;;  %v3044_v12 = vpop.f32.mrf.mxu1  ;;  %3216 = vmatmul.bf16.gmra.mxu3 %v5672_v50 }
 0x58e   :  { %v3088_v13 = vpop.f32.mrf.mxu2 }
 0x58f   :  { %v4987_v32 = vpop.eup %4986  ;;  %v3045_v45 = vadd.f32 %v3044_v12, %v2956_v58  ;;  %v3089_v49 = vadd.f32 %v3088_v13, %v6050_v16 }
 0x590   :  { %3641 = vst [vmem:[#allocation13 + $0x5a0] sm:$0xff] %v4987_v32  ;;  %v3177_v1 = vpop.f32.mrf.mxu3 }
 0x591   :  { %v4989_v60 = vpop.eup %4988  ;;  %4990 = vtanh.f32 %v3045_v45  ;;  %v3178_v2 = vadd.f32 %v3177_v1, %v3089_v49 }
 0x592   :  { %3516 = vst [vmem:[#allocation13 + $0x1b8] sm:$0xff] %v4989_v60 }
 0x593   :  { %4992 = vtanh.f32 %v3178_v2 }
 0x594   :  { %v2957_v24 = vpop.f32.mrf.mxu0 }
 0x595   :  { %v2958_v29 = vadd.f32 %v2957_v24, %v5977_v6  ;;  %v3046_v27 = vpop.f32.mrf.mxu1 }
 0x596   :  { %v3090_v31 = vpop.f32.mrf.mxu2 }
 0x597   :  { %v4991_v7 = vpop.eup %4990  ;;  %v3047_v25 = vadd.f32 %v3046_v27, %v2958_v29  ;;  %v3091_v50 = vadd.f32 %v3090_v31, %v6050_v16 }
 0x598   :  { %3648 = vst [vmem:[#allocation13 + $0x5d8] sm:$0xff] %v4991_v7  ;;  %v3179_v48 = vpop.f32.mrf.mxu3 }
 0x599   :  { %v4993_v8 = vpop.eup %4992  ;;  %4994 = vtanh.f32 %v3047_v25  ;;  %v3180_v59 = vadd.f32 %v3179_v48, %v3091_v50 }
 0x59a   :  { %3523 = vst [vmem:[#allocation13 + $0x1f0] sm:$0xff] %v4993_v8 }
 0x59b   :  { %4996 = vtanh.f32 %v3180_v59  ;;  %3132 = vmatmul.bf16.gmra.mxu2 %v5604_v37 }
 0x59c   :  { %v2960_v47 = vpop.f32.mrf.mxu0 }
 0x59d   :  { %v2961_v36 = vadd.f32 %v2960_v47, %v5977_v6  ;;  %v3049_v23 = vpop.f32.mrf.mxu1  ;;  %3221 = vmatmul.bf16.gmra.mxu3 %v5682_v44 }
 0x59e   :  { %v3093_v14 = vpop.f32.mrf.mxu2 }
 0x59f   :  { %v4995_v39 = vpop.eup %4994  ;;  %v3050_v30 = vadd.f32 %v3049_v23, %v2961_v36  ;;  %v3094_v17 = vadd.f32 %v3093_v14, %v6050_v16 }
 0x5a0   :  { %3655 = vst [vmem:[#allocation13 + $0x610] sm:$0xff] %v4995_v39  ;;  %v3182_v33 = vpop.f32.mrf.mxu3 }
 0x5a1   :  { %v4997_v41 = vpop.eup %4996  ;;  %4998 = vtanh.f32 %v3050_v30  ;;  %v3183_v57 = vadd.f32 %v3182_v33, %v3094_v17 }
 0x5a2   :  { %3530 = vst [vmem:[#allocation13 + $0x228] sm:$0xff] %v4997_v41 }
 0x5a3   :  { %5000 = vtanh.f32 %v3183_v57 }
 0x5a4   :  { %v2962_v53 = vpop.f32.mrf.mxu0 }
 0x5a5   :  { %v2963_v37 = vadd.f32 %v2962_v53, %v5977_v6  ;;  %v3051_v55 = vpop.f32.mrf.mxu1 }
 0x5a6   :  { %v3095_v56 = vpop.f32.mrf.mxu2 }
 0x5a7   :  { %v4999_v42 = vpop.eup %4998  ;;  %v3052_v38 = vadd.f32 %v3051_v55, %v2963_v37  ;;  %v3096_v44 = vadd.f32 %v3095_v56, %v6050_v16 }
 0x5a8   :  { %3662 = vst [vmem:[#allocation13 + $0x648] sm:$0xff] %v4999_v42  ;;  %v3184_v43 = vpop.f32.mrf.mxu3 }
 0x5a9   :  { %v5001_v62 = vpop.eup %5000  ;;  %5002 = vtanh.f32 %v3052_v38  ;;  %v3185_v0 = vadd.f32 %v3184_v43, %v3096_v44 }
 0x5aa   :  { %3537 = vst [vmem:[#allocation13 + $0x260] sm:$0xff] %v5001_v62 }
 0x5ab   :  { %5004 = vtanh.f32 %v3185_v0  ;;  %3137 = vmatmul.bf16.gmra.mxu2 %v5616_v61 }
 0x5ac   :  { %v2965_v10 = vpop.f32.mrf.mxu0 }
 0x5ad   :  { %v2966_v21 = vadd.f32 %v2965_v10, %v5977_v6  ;;  %v3054_v35 = vpop.f32.mrf.mxu1  ;;  %3226 = vmatmul.bf16.gmra.mxu3 %v5692_v18 }
 0x5ae   :  { %v3098_v11 = vpop.f32.mrf.mxu2 }
 0x5af   :  { %v5003_v4 = vpop.eup %5002  ;;  %v3055_v40 = vadd.f32 %v3054_v35, %v2966_v21  ;;  %v3099_v3 = vadd.f32 %v3098_v11, %v6050_v16 }
 0x5b0   :  { %3669 = vst [vmem:[#allocation13 + $0x680] sm:$0xff] %v5003_v4  ;;  %v3187_v9 = vpop.f32.mrf.mxu3 }
 0x5b1   :  { %v5005_v51 = vpop.eup %5004  ;;  %5006 = vtanh.f32 %v3055_v40  ;;  %v3188_v34 = vadd.f32 %v3187_v9, %v3099_v3 }
 0x5b2   :  { %3544 = vst [vmem:[#allocation13 + $0x298] sm:$0xff] %v5005_v51 }
 0x5b3   :  { %5008 = vtanh.f32 %v3188_v34 }
 0x5b4   :  { %v2967_v52 = vpop.f32.mrf.mxu0 }
 0x5b5   :  { %v2968_v61 = vadd.f32 %v2967_v52, %v5977_v6  ;;  %v3056_v28 = vpop.f32.mrf.mxu1 }
 0x5b6   :  { %v3100_v54 = vpop.f32.mrf.mxu2 }
 0x5b7   :  { %v5007_v26 = vpop.eup %5006  ;;  %v3057_v20 = vadd.f32 %v3056_v28, %v2968_v61  ;;  %v3101_v18 = vadd.f32 %v3100_v54, %v6050_v16 }
 0x5b8   :  { %3676 = vst [vmem:[#allocation13 + $0x6b8] sm:$0xff] %v5007_v26  ;;  %v3189_v63 = vpop.f32.mrf.mxu3 }
 0x5b9   :  { %v5009_v15 = vpop.eup %5008  ;;  %5010 = vtanh.f32 %v3057_v20  ;;  %v3190_v19 = vadd.f32 %v3189_v63, %v3101_v18 }
 0x5ba   :  { %3551 = vst [vmem:[#allocation13 + $0x2d0] sm:$0xff] %v5009_v15 }
 0x5bb   :  { %5012 = vtanh.f32 %v3190_v19  ;;  %3142 = vmatmul.bf16.gmra.mxu2 %v5633_v22 }
 0x5bd   :  { %3231 = vmatmul.bf16.gmra.mxu3 %v5705_v5 }
 0x5be   :  { %v3103_v46 = vpop.f32.mrf.mxu2 }
 0x5bf   :  { %v5011_v58 = vpop.eup %5010  ;;  %v3104_v6 = vadd.f32 %v3103_v46, %v6050_v16 }
 0x5c0   :  { %3683 = vst [vmem:[#allocation13 + $0x6f0] sm:$0xff] %v5011_v58  ;;  %v3192_v12 = vpop.f32.mrf.mxu3 }
 0x5c1   :  { %v5013_v13 = vpop.eup %5012  ;;  %v3193_v32 = vadd.f32 %v3192_v12, %v3104_v6 }
 0x5c2   :  { %3558 = vst [vmem:[#allocation13 + $0x308] sm:$0xff] %v5013_v13 }
 0x5c3   :  { %5014 = vtanh.f32 %v3193_v32 }
 0x5c6   :  { %v3105_v45 = vpop.f32.mrf.mxu2 }
 0x5c7   :  { %v3106_v49 = vadd.f32 %v3105_v45, %v6050_v16 }
 0x5c8   :  { %v3194_v1 = vpop.f32.mrf.mxu3 }
 0x5c9   :  { %v5015_v60 = vpop.eup %5014  ;;  %v3195_v2 = vadd.f32 %v3194_v1, %v3106_v49 }
 0x5ca   :  { %3565 = vst [vmem:[#allocation13 + $0x340] sm:$0xff] %v5015_v60 }
 0x5cb   :  { %5016 = vtanh.f32 %v3195_v2 }
 0x5ce   :  { %v3108_v22 = vpop.f32.mrf.mxu2 }
 0x5cf   :  { %v3109_v5 = vadd.f32 %v3108_v22, %v6050_v16 }
 0x5d0   :  { %v3197_v24 = vpop.f32.mrf.mxu3 }
 0x5d1   :  { %v5017_v29 = vpop.eup %5016  ;;  %v3198_v27 = vadd.f32 %v3197_v24, %v3109_v5 }
 0x5d2   :  { %3572 = vst [vmem:[#allocation13 + $0x378] sm:$0xff] %v5017_v29 }
 0x5d3   :  { %5018 = vtanh.f32 %v3198_v27 }
 0x5d6   :  { %v3110_v31 = vpop.f32.mrf.mxu2 }
 0x5d7   :  { %v3111_v7 = vadd.f32 %v3110_v31, %v6050_v16 }
 0x5d8   :  { %v3199_v25 = vpop.f32.mrf.mxu3 }
 0x5d9   :  { %v5019_v50 = vpop.eup %5018  ;;  %v3200_v48 = vadd.f32 %v3199_v25, %v3111_v7 }
 0x5da   :  { %3579 = vst [vmem:[#allocation13 + $0x3b0] sm:$0xff] %v5019_v50 }
 0x5db   :  { %5020 = vtanh.f32 %v3200_v48 }
 0x5de   :  { %v3113_v8 = vpop.f32.mrf.mxu2 }
 0x5df   :  { %v3114_v59 = vadd.f32 %v3113_v8, %v6050_v16 }
 0x5e0   :  { %v3202_v47 = vpop.f32.mrf.mxu3 }
 0x5e1   :  { %v5021_v36 = vpop.eup %5020  ;;  %v3203_v23 = vadd.f32 %v3202_v47, %v3114_v59 }
 0x5e2   :  { %3586 = vst [vmem:[#allocation13 + $0x3e8] sm:$0xff] %v5021_v36 }
 0x5e3   :  { %5022 = vtanh.f32 %v3203_v23 }
 0x5e6   :  { %v3115_v14 = vpop.f32.mrf.mxu2 }
 0x5e7   :  { %v3116_v39 = vadd.f32 %v3115_v14, %v6050_v16 }
 0x5e8   :  { %v3204_v30 = vpop.f32.mrf.mxu3 }
 0x5e9   :  { %v5023_v17 = vpop.eup %5022  ;;  %v3205_v33 = vadd.f32 %v3204_v30, %v3116_v39 }
 0x5ea   :  { %3593 = vst [vmem:[#allocation13 + $0x420] sm:$0xff] %v5023_v17 }
 0x5eb   :  { %5024 = vtanh.f32 %v3205_v33 }
 0x5ee   :  { %v3118_v41 = vpop.f32.mrf.mxu2 }
 0x5ef   :  { %v3119_v57 = vadd.f32 %v3118_v41, %v6050_v16 }
 0x5f0   :  { %v3207_v53 = vpop.f32.mrf.mxu3 }
 0x5f1   :  { %v5025_v37 = vpop.eup %5024  ;;  %v3208_v55 = vadd.f32 %v3207_v53, %v3119_v57 }
 0x5f2   :  { %3600 = vst [vmem:[#allocation13 + $0x458] sm:$0xff] %v5025_v37 }
 0x5f3   :  { %5026 = vtanh.f32 %v3208_v55 }
 0x5f6   :  { %v3120_v56 = vpop.f32.mrf.mxu2 }
 0x5f7   :  { %v3121_v42 = vadd.f32 %v3120_v56, %v6050_v16 }
 0x5f8   :  { %v3209_v38 = vpop.f32.mrf.mxu3 }
 0x5f9   :  { %v5027_v44 = vpop.eup %5026  ;;  %v3210_v43 = vadd.f32 %v3209_v38, %v3121_v42 }
 0x5fa   :  { %3607 = vst [vmem:[#allocation13 + $0x490] sm:$0xff] %v5027_v44 }
 0x5fb   :  { %5028 = vtanh.f32 %v3210_v43 }
 0x5fe   :  { %v3123_v62 = vpop.f32.mrf.mxu2 }
 0x5ff   :  { %v3124_v0 = vadd.f32 %v3123_v62, %v6050_v16 }
 0x600   :  { %v3212_v10 = vpop.f32.mrf.mxu3 }
 0x601   :  { %v5029_v21 = vpop.eup %5028  ;;  %v3213_v35 = vadd.f32 %v3212_v10, %v3124_v0 }
 0x602   :  { %3614 = vst [vmem:[#allocation13 + $0x4c8] sm:$0xff] %v5029_v21 }
 0x603   :  { %5030 = vtanh.f32 %v3213_v35 }
 0x606   :  { %v3125_v11 = vpop.f32.mrf.mxu2 }
 0x607   :  { %v3126_v4 = vadd.f32 %v3125_v11, %v6050_v16 }
 0x608   :  { %v3214_v40 = vpop.f32.mrf.mxu3 }
 0x609   :  { %v5031_v3 = vpop.eup %5030  ;;  %v3215_v9 = vadd.f32 %v3214_v40, %v3126_v4 }
 0x60a   :  { %3621 = vst [vmem:[#allocation13 + $0x500] sm:$0xff] %v5031_v3 }
 0x60b   :  { %5032 = vtanh.f32 %v3215_v9 }
 0x60e   :  { %v3128_v51 = vpop.f32.mrf.mxu2 }
 0x60f   :  { %v3129_v34 = vadd.f32 %v3128_v51, %v6050_v16 }
 0x610   :  { %v3217_v52 = vpop.f32.mrf.mxu3 }
 0x611   :  { %v5033_v61 = vpop.eup %5032  ;;  %v3218_v28 = vadd.f32 %v3217_v52, %v3129_v34 }
 0x612   :  { %3628 = vst [vmem:[#allocation13 + $0x538] sm:$0xff] %v5033_v61 }
 0x613   :  { %5034 = vtanh.f32 %v3218_v28 }
 0x616   :  { %v3130_v54 = vpop.f32.mrf.mxu2 }
 0x617   :  { %v3131_v26 = vadd.f32 %v3130_v54, %v6050_v16 }
 0x618   :  { %v3219_v20 = vpop.f32.mrf.mxu3 }
 0x619   :  { %v5035_v18 = vpop.eup %5034  ;;  %v3220_v63 = vadd.f32 %v3219_v20, %v3131_v26 }
 0x61a   :  { %3635 = vst [vmem:[#allocation13 + $0x570] sm:$0xff] %v5035_v18 }
 0x61b   :  { %5036 = vtanh.f32 %v3220_v63 }
 0x61e   :  { %v3133_v15 = vpop.f32.mrf.mxu2 }
 0x61f   :  { %v3134_v19 = vadd.f32 %v3133_v15, %v6050_v16 }
 0x620   :  { %v3222_v46 = vpop.f32.mrf.mxu3 }
 0x621   :  { %v5037_v58 = vpop.eup %5036  ;;  %v3223_v6 = vadd.f32 %v3222_v46, %v3134_v19 }
 0x622   :  { %3642 = vst [vmem:[#allocation13 + $0x5a8] sm:$0xff] %v5037_v58 }
 0x623   :  { %5038 = vtanh.f32 %v3223_v6 }
 0x626   :  { %v3135_v12 = vpop.f32.mrf.mxu2 }
 0x627   :  { %v3136_v13 = vadd.f32 %v3135_v12, %v6050_v16 }
 0x628   :  { %v3224_v32 = vpop.f32.mrf.mxu3 }
 0x629   :  { %v5039_v45 = vpop.eup %5038  ;;  %v3225_v49 = vadd.f32 %v3224_v32, %v3136_v13 }
 0x62a   :  { %3649 = vst [vmem:[#allocation13 + $0x5e0] sm:$0xff] %v5039_v45 }
 0x62b   :  { %5040 = vtanh.f32 %v3225_v49 }
 0x62e   :  { %v3138_v1 = vpop.f32.mrf.mxu2 }
 0x62f   :  { %v3139_v60 = vadd.f32 %v3138_v1, %v6050_v16 }
 0x630   :  { %v3227_v2 = vpop.f32.mrf.mxu3 }
 0x631   :  { %v5041_v22 = vpop.eup %5040  ;;  %v3228_v5 = vadd.f32 %v3227_v2, %v3139_v60 }
 0x632   :  { %3656 = vst [vmem:[#allocation13 + $0x618] sm:$0xff] %v5041_v22 }
 0x633   :  { %5042 = vtanh.f32 %v3228_v5 }
 0x636   :  { %v3140_v24 = vpop.f32.mrf.mxu2 }
 0x637   :  { %v3141_v29 = vadd.f32 %v3140_v24, %v6050_v16 }
 0x638   :  { %v3229_v27 = vpop.f32.mrf.mxu3 }
 0x639   :  { %v5043_v31 = vpop.eup %5042  ;;  %v3230_v7 = vadd.f32 %v3229_v27, %v3141_v29 }
 0x63a   :  { %3663 = vst [vmem:[#allocation13 + $0x650] sm:$0xff] %v5043_v31 }
 0x63b   :  { %5044 = vtanh.f32 %v3230_v7 }
 0x63e   :  { %v3143_v25 = vpop.f32.mrf.mxu2 }
 0x63f   :  { %v3144_v50 = vadd.f32 %v3143_v25, %v6050_v16 }
 0x640   :  { %v3232_v48 = vpop.f32.mrf.mxu3 }
 0x641   :  { %v5045_v8 = vpop.eup %5044  ;;  %v3233_v59 = vadd.f32 %v3232_v48, %v3144_v50 }
 0x642   :  { %3670 = vst [vmem:[#allocation13 + $0x688] sm:$0xff] %v5045_v8 }
 0x643   :  { %5046 = vtanh.f32 %v3233_v59 }
 0x646   :  { %v3145_v47 = vpop.f32.mrf.mxu2 }
 0x647   :  { %v3146_v36 = vadd.f32 %v3145_v47, %v6050_v16 }
 0x648   :  { %v3234_v23 = vpop.f32.mrf.mxu3 }
 0x649   :  { %v5047_v14 = vpop.eup %5046  ;;  %v3235_v39 = vadd.f32 %v3234_v23, %v3146_v36 }
 0x64a   :  { %3677 = vst [vmem:[#allocation13 + $0x6c0] sm:$0xff] %v5047_v14 }
 0x64b   :  { %5048 = vtanh.f32 %v3235_v39 }
 0x651   :  { %v5049_v30 = vpop.eup %5048 }
 0x652   :  { %3684 = vst [vmem:[#allocation13 + $0x6f8] sm:$0xff] %v5049_v30 }
 0x653   :  { %3697 = dma.vmem_to_hbm [thread:$0]  %s3690_s10, 28672, %s3692_s13, [#allocation4], %s5244_s14, %s5244_s14, %s5245_s15  }
 0x654   :  { %5229 = dma.done.wait [#allocation4], 28672  }
 0x655   :  { %5230 = vsyncadd [#allocation4], 4294938624 }
 0x656   :  { %3702 = vsyncpa [#allocation3], 1 }
 0x657   :  { %3703 = vsyncpa [#allocation6], 1 }
 0x658   :  { %3704 = vsyncpa [#allocation9], 1 }
 0x659   :  { %3705 = vsyncpa [#allocation12], 1 }
 0x65a   :  { %3706 = vsyncpa [#allocation4], 1 }

</bundles_post_ra>
